<compile_context>
chip_gen: v6e
topology: v6e:2x2x1
jax: 0.10.0
libtpu: 0.0.40
codegen_flags: <defaults>
</compile_context>

<pallas_src>
import functools

import jax
import jax.numpy as jnp
from jax import lax
from jax.experimental import pallas as pl
from jax.experimental.pallas import tpu as pltpu

BN_EPS = 1e-5
COUT_PAD = 128                      # lane-dense output channel width
_VMEM_LIMIT = 32 * 1024 * 1024


# ------------------------------- helpers ------------------------------------

def _round_up(x, m):
    return (x + m - 1) // m * m


def _phase_split(xp):
    """(N, Hp, Wp, C) with Hp, Wp even -> (N*4, Hp//2, Wp//2, C).

    Phase (a, b) = rows a::2, cols b::2 lives at index n*4 + a*2 + b, so a
    stride-2 window tap (kh, kw) becomes an unstrided static slice of phase
    (kh % 2, kw % 2) inside the kernel.
    """
    n, hp, wp, c = xp.shape
    ph = jnp.stack([xp[:, a::2, b::2, :] for a in range(2) for b in range(2)],
                   axis=1)                                   # (N, 4, Hp/2, Wp/2, C)
    return ph.reshape(n * 4, hp // 2, wp // 2, c)


# ---------------------------- Pallas kernels --------------------------------

def _conv_row_kernel(xph_ref, w_ref, shift_ref, out_ref, *, k, wo, cin_p, cout_p):
    """One output row of a stride-2 conv, with folded-BN shift and ReLU.

    xph_ref  : (4, Hh, Wh, cin_p)  bf16  phase-split padded input (one image, resident)
    w_ref    : (k*k, cin_p, cout_p) bf16 BN-scale-folded weights (resident)
    shift_ref: (1, cout_p)          f32  folded BN shift
    out_ref  : (1, 1, wo, cout_p)   f32
    """
    row = pl.program_id(1)                      # output row within the image
    acc = jnp.zeros((wo, cout_p), jnp.float32)
    for kh in range(k):
        for kw in range(k):
            p_idx = (kh % 2) * 2 + (kw % 2)
            tap = xph_ref[p_idx, pl.ds(row + kh // 2, 1), pl.ds(kw // 2, wo), :]
            acc = acc + jnp.dot(tap.reshape(wo, cin_p), w_ref[kh * k + kw],
                                preferred_element_type=jnp.float32)
    y = jnp.maximum(acc + shift_ref[...], 0.0)              # folded BN + ReLU
    out_ref[...] = y[None, None].astype(out_ref.dtype)


def _maxpool_kernel(yph_ref, out_ref, *, hpo, wpo):
    """3x3 / stride-2 / pad-1 max-pool of one image from its phase-split input.

    yph_ref: (4, hpo+1, wpo+1, C) f32 (-inf padded);  out_ref: (1, hpo, wpo, C) f32
    """
    r = None
    for dh in range(3):
        for dw in range(3):
            p_idx = (dh % 2) * 2 + (dw % 2)
            tap = yph_ref[p_idx, dh // 2:dh // 2 + hpo, dw // 2:dw // 2 + wpo, :]
            r = tap if r is None else jnp.maximum(r, tap)
    out_ref[...] = r[None]


# ------------------------------ block wrappers -------------------------------

def conv_bn_relu_block(x_nhwc, p, *, k, pad):
    """conv(k,k,stride=2,pad) -> BN -> ReLU, output channels zero-padded to 128."""
    n, h, w_sz, cx = x_nhwc.shape
    assert h % 2 == 0 and w_sz % 2 == 0, "stride-2 phase split needs even spatial dims"
    cin, cout = p["w"].shape[2], p["w"].shape[3]
    ho = (h + 2 * pad - k) // 2 + 1
    wo = (w_sz + 2 * pad - k) // 2 + 1

    # Fold BN into the conv: scale into the weights, shift becomes a bias.
    scale = p["gamma"] / jnp.sqrt(p["var"] + BN_EPS)
    w_f = p["w"] * scale                                    # HWIO * (Cout,)
    shift = p["beta"] - p["mean"] * scale

    # Channel padding: K (=Cin) to a multiple of 8 / to match the carried zero
    # padding of x; Cout to the full 128-lane width for lane-dense stores.
    cin_p = _round_up(cx, 8)
    if cx < cin_p:
        x_nhwc = jnp.pad(x_nhwc, ((0, 0), (0, 0), (0, 0), (0, cin_p - cx)))
    w_f = jnp.pad(w_f, ((0, 0), (0, 0), (0, cin_p - cin), (0, COUT_PAD - cout)))
    shift = jnp.pad(shift, (0, COUT_PAD - cout)).reshape(1, COUT_PAD).astype(jnp.float32)

    # Spatial zero-pad + stride-2 phase split (1x traffic, no k*k im2col blowup).
    xp = jnp.pad(x_nhwc, ((0, 0), (pad, pad), (pad, pad), (0, 0)))
    xph = _phase_split(xp).astype(jnp.bfloat16)             # (N*4, Hh, Wh, cin_p)
    w2 = w_f.reshape(k * k, cin_p, COUT_PAD).astype(jnp.bfloat16)
    hh, wh = xph.shape[1], xph.shape[2]

    kern = functools.partial(_conv_row_kernel, k=k, wo=wo, cin_p=cin_p, cout_p=COUT_PAD)
    flops = 2 * n * ho * wo * k * k * cin_p * COUT_PAD
    bytes_accessed = (xph.size * 2 + w2.size * 2 + shift.size * 4
                      + n * ho * wo * COUT_PAD * 4)
    return pl.pallas_call(
        kern,
        out_shape=jax.ShapeDtypeStruct((n, ho, wo, COUT_PAD), jnp.float32),
        grid=(n, ho),
        in_specs=[
            pl.BlockSpec((4, hh, wh, cin_p), lambda b, r: (b, 0, 0, 0)),
            pl.BlockSpec((k * k, cin_p, COUT_PAD), lambda b, r: (0, 0, 0)),
            pl.BlockSpec((1, COUT_PAD), lambda b, r: (0, 0)),
        ],
        out_specs=pl.BlockSpec((1, 1, wo, COUT_PAD), lambda b, r: (b, r, 0, 0)),
        compiler_params=pltpu.CompilerParams(
            dimension_semantics=("parallel", "parallel"),
            vmem_limit_bytes=_VMEM_LIMIT),
        cost_estimate=pl.CostEstimate(flops=flops, transcendentals=0,
                                      bytes_accessed=bytes_accessed),
    )(xph, w2, shift)


def maxpool3x3_s2_block(y):
    """3x3 / stride-2 / pad-1 max-pool of a (N, Hc, Wc, 128) activation."""
    n, hc, wc, c = y.shape
    hpo, wpo = hc // 2, wc // 2
    yp = jnp.pad(y, ((0, 0), (1, 1), (1, 1), (0, 0)), constant_values=-jnp.inf)
    yph = _phase_split(yp)                                   # (N*4, hpo+1, wpo+1, C)
    hh, wh = yph.shape[1], yph.shape[2]
    kern = functools.partial(_maxpool_kernel, hpo=hpo, wpo=wpo)
    return pl.pallas_call(
        kern,
        out_shape=jax.ShapeDtypeStruct((n, hpo, wpo, c), jnp.float32),
        grid=(n,),
        in_specs=[pl.BlockSpec((4, hh, wh, c), lambda b: (b, 0, 0, 0))],
        out_specs=pl.BlockSpec((1, hpo, wpo, c), lambda b: (b, 0, 0, 0)),
        compiler_params=pltpu.CompilerParams(
            dimension_semantics=("parallel",),
            vmem_limit_bytes=_VMEM_LIMIT),
    )(yph)


def msd_init_layer(x_nchw, params_list):
    """Forward of MSDInitLayer; returns a list of NCHW outputs (one per scale)."""
    x = jnp.transpose(x_nchw, (0, 2, 3, 1))                  # NCHW -> NHWC
    outs = []
    for i, p in enumerate(params_list):
        cout = p["w"].shape[3]
        if i == 0:
            # ResInitBlock: conv7x7/s2 + BN + ReLU, then maxpool3x3/s2.
            # TODO(synk): fuse the max-pool into the conv pallas_call via a VMEM
            # scratch of conv rows to save one small HBM round trip per image.
            y = conv_bn_relu_block(x, p, k=7, pad=3)
            y = maxpool3x3_s2_block(y)
        else:
            y = conv_bn_relu_block(x, p, k=3, pad=1)         # conv3x3_block(stride=2)
        outs.append(jnp.transpose(y[..., :cout], (0, 3, 1, 2)))  # strip channel pad
        x = y                                                # chain (keep 128-ch pad)
    return outs


# --------------------------- deterministic params ----------------------------

def init_conv_bn_params(key, k, cin, cout):
    kw_, kg, kb, km, kv = jax.random.split(key, 5)
    fan_in = k * k * cin
    return dict(
        w=jax.random.normal(kw_, (k, k, cin, cout), jnp.float32) / jnp.sqrt(fan_in),
        gamma=1.0 + 0.1 * jax.random.normal(kg, (cout,), jnp.float32),
        beta=0.1 * jax.random.normal(kb, (cout,), jnp.float32),
        mean=0.1 * jax.random.normal(km, (cout,), jnp.float32),
        var=1.0 + 0.1 * jax.random.uniform(kv, (cout,), jnp.float32),
    )


# ------------------------------- JAX reference -------------------------------

def reference(x_nchw, params_list):
    x = jnp.transpose(x_nchw, (0, 2, 3, 1))
    outs = []
    for i, p in enumerate(params_list):
        pad = 3 if i == 0 else 1
        y = lax.conv_general_dilated(
            x, p["w"], (2, 2), [(pad, pad), (pad, pad)],
            dimension_numbers=("NHWC", "HWIO", "NHWC"))
        scale = p["gamma"] / jnp.sqrt(p["var"] + BN_EPS)
        y = jnp.maximum(y * scale + (p["beta"] - p["mean"] * scale), 0.0)
        if i == 0:
            y = lax.reduce_window(y, -jnp.inf, lax.max, (1, 3, 3, 1), (1, 2, 2, 1),
                                  [(0, 0), (1, 1), (1, 1), (0, 0)])
        x = y
        outs.append(jnp.transpose(y, (0, 3, 1, 2)))
    return outs


# ------------------------------------ main ------------------------------------

if __name__ == "__main__":
    key = jax.random.PRNGKey(0)
    kx, kp = jax.random.split(key)

    N, Cin, H, W = 2, 3, 32, 32
    out_channels = (8, 16, 32)

    x = jax.random.normal(kx, (N, Cin, H, W), jnp.float32)

    params_list = []
    cin = Cin
    pkeys = jax.random.split(kp, len(out_channels))
    for i, cout in enumerate(out_channels):
        k = 7 if i == 0 else 3
        params_list.append(init_conv_bn_params(pkeys[i], k, cin, cout))
        cin = cout

    outs = jax.jit(msd_init_layer)(x, params_list)
    outs = jax.block_until_ready(outs)

    refs = reference(x, params_list)
    for o, r in zip(outs, refs):
        assert o.shape == r.shape, (o.shape, r.shape)
        err = float(jnp.max(jnp.abs(o - r)))
        assert jnp.allclose(o, r, rtol=2e-2, atol=2e-2), err

    print("KERNEL_OK")
</pallas_src>

<mosaic_0001>
module attributes {stable_mosaic.version = 11 : i64} {
  func.func @_conv_row_kernel(%arg0: i32, %arg1: i32, %arg2: memref<4x19x19x8xbf16, #tpu.memory_space<vmem>>, %arg3: memref<49x8x128xbf16, #tpu.memory_space<vmem>>, %arg4: memref<1x128xf32, #tpu.memory_space<vmem>>, %arg5: memref<1x1x16x128xf32, #tpu.memory_space<vmem>>) attributes {dimension_semantics = [#tpu.dimension_semantics<parallel>, #tpu.dimension_semantics<parallel>], iteration_bounds = array<i64: 2, 16>, scalar_prefetch = 0 : i64, scratch_operands = 0 : i64, tpu.core_type = #tpu.core_type<tc>, window_params = [{transform_indices = @transform_0, window_bounds = array<i64: 4, 19, 19, 8>}, {pipeline_mode = #tpu.pipeline_mode<synchronous>, transform_indices = @transform_1, window_bounds = array<i64: 49, 8, 128>}, {pipeline_mode = #tpu.pipeline_mode<synchronous>, transform_indices = @transform_2, window_bounds = array<i64: 1, 128>}, {transform_indices = @transform_3, window_bounds = array<i64: 1, 1, 16, 128>}]} {
    %cst = arith.constant 0.000000e+00 : f32
    %0 = vector.broadcast %cst : f32 to vector<16x128xf32>
    %c0_i32 = arith.constant 0 : i32
    %1 = arith.addi %arg1, %c0_i32 : i32
    %c0 = arith.constant 0 : index
    %2 = arith.index_cast %1 : i32 to index
    %c0_0 = arith.constant 0 : index
    %c0_1 = arith.constant 0 : index
    %3 = vector.load %arg2[%c0, %2, %c0_0, %c0_1] : memref<4x19x19x8xbf16, #tpu.memory_space<vmem>>, vector<1x1x16x8xbf16>
    %4 = vector.shape_cast %3 : vector<1x1x16x8xbf16> to vector<1x16x8xbf16>
    %5 = vector.shape_cast %4 : vector<1x16x8xbf16> to vector<16x8xbf16>
    %c0_2 = arith.constant 0 : index
    %c0_3 = arith.constant 0 : index
    %c0_4 = arith.constant 0 : index
    %6 = vector.load %arg3[%c0_2, %c0_3, %c0_4] : memref<49x8x128xbf16, #tpu.memory_space<vmem>>, vector<1x8x128xbf16>
    %7 = vector.shape_cast %6 : vector<1x8x128xbf16> to vector<8x128xbf16>
    %cst_5 = arith.constant dense<0.000000e+00> : vector<16x128xf32>
    %8 = tpu.matmul %5, %7, %cst_5 {dimension_numbers = #tpu.dot_dimension_numbers<[1], [0], [0], [1], [0, 0, 1, 1], [], []>} : vector<16x8xbf16>, vector<8x128xbf16>, vector<16x128xf32> -> vector<16x128xf32>
    %9 = arith.addf %0, %8 : vector<16x128xf32>
    %c0_i32_6 = arith.constant 0 : i32
    %10 = arith.addi %arg1, %c0_i32_6 : i32
    %c1 = arith.constant 1 : index
    %11 = arith.index_cast %10 : i32 to index
    %c0_7 = arith.constant 0 : index
    %c0_8 = arith.constant 0 : index
    %12 = vector.load %arg2[%c1, %11, %c0_7, %c0_8] : memref<4x19x19x8xbf16, #tpu.memory_space<vmem>>, vector<1x1x16x8xbf16>
    %13 = vector.shape_cast %12 : vector<1x1x16x8xbf16> to vector<1x16x8xbf16>
    %14 = vector.shape_cast %13 : vector<1x16x8xbf16> to vector<16x8xbf16>
    %c1_9 = arith.constant 1 : index
    %c0_10 = arith.constant 0 : index
    %c0_11 = arith.constant 0 : index
    %15 = vector.load %arg3[%c1_9, %c0_10, %c0_11] : memref<49x8x128xbf16, #tpu.memory_space<vmem>>, vector<1x8x128xbf16>
    %16 = vector.shape_cast %15 : vector<1x8x128xbf16> to vector<8x128xbf16>
    %cst_12 = arith.constant dense<0.000000e+00> : vector<16x128xf32>
    %17 = tpu.matmul %14, %16, %cst_12 {dimension_numbers = #tpu.dot_dimension_numbers<[1], [0], [0], [1], [0, 0, 1, 1], [], []>} : vector<16x8xbf16>, vector<8x128xbf16>, vector<16x128xf32> -> vector<16x128xf32>
    %18 = arith.addf %9, %17 : vector<16x128xf32>
    %c0_i32_13 = arith.constant 0 : i32
    %19 = arith.addi %arg1, %c0_i32_13 : i32
    %c0_14 = arith.constant 0 : index
    %20 = arith.index_cast %19 : i32 to index
    %c1_15 = arith.constant 1 : index
    %c0_16 = arith.constant 0 : index
    %21 = vector.load %arg2[%c0_14, %20, %c1_15, %c0_16] : memref<4x19x19x8xbf16, #tpu.memory_space<vmem>>, vector<1x1x16x8xbf16>
    %22 = vector.shape_cast %21 : vector<1x1x16x8xbf16> to vector<1x16x8xbf16>
    %23 = vector.shape_cast %22 : vector<1x16x8xbf16> to vector<16x8xbf16>
    %c2 = arith.constant 2 : index
    %c0_17 = arith.constant 0 : index
    %c0_18 = arith.constant 0 : index
    %24 = vector.load %arg3[%c2, %c0_17, %c0_18] : memref<49x8x128xbf16, #tpu.memory_space<vmem>>, vector<1x8x128xbf16>
    %25 = vector.shape_cast %24 : vector<1x8x128xbf16> to vector<8x128xbf16>
    %cst_19 = arith.constant dense<0.000000e+00> : vector<16x128xf32>
    %26 = tpu.matmul %23, %25, %cst_19 {dimension_numbers = #tpu.dot_dimension_numbers<[1], [0], [0], [1], [0, 0, 1, 1], [], []>} : vector<16x8xbf16>, vector<8x128xbf16>, vector<16x128xf32> -> vector<16x128xf32>
    %27 = arith.addf %18, %26 : vector<16x128xf32>
    %c0_i32_20 = arith.constant 0 : i32
    %28 = arith.addi %arg1, %c0_i32_20 : i32
    %c1_21 = arith.constant 1 : index
    %29 = arith.index_cast %28 : i32 to index
    %c1_22 = arith.constant 1 : index
    %c0_23 = arith.constant 0 : index
    %30 = vector.load %arg2[%c1_21, %29, %c1_22, %c0_23] : memref<4x19x19x8xbf16, #tpu.memory_space<vmem>>, vector<1x1x16x8xbf16>
    %31 = vector.shape_cast %30 : vector<1x1x16x8xbf16> to vector<1x16x8xbf16>
    %32 = vector.shape_cast %31 : vector<1x16x8xbf16> to vector<16x8xbf16>
    %c3 = arith.constant 3 : index
    %c0_24 = arith.constant 0 : index
    %c0_25 = arith.constant 0 : index
    %33 = vector.load %arg3[%c3, %c0_24, %c0_25] : memref<49x8x128xbf16, #tpu.memory_space<vmem>>, vector<1x8x128xbf16>
    %34 = vector.shape_cast %33 : vector<1x8x128xbf16> to vector<8x128xbf16>
    %cst_26 = arith.constant dense<0.000000e+00> : vector<16x128xf32>
    %35 = tpu.matmul %32, %34, %cst_26 {dimension_numbers = #tpu.dot_dimension_numbers<[1], [0], [0], [1], [0, 0, 1, 1], [], []>} : vector<16x8xbf16>, vector<8x128xbf16>, vector<16x128xf32> -> vector<16x128xf32>
    %36 = arith.addf %27, %35 : vector<16x128xf32>
    %c0_i32_27 = arith.constant 0 : i32
    %37 = arith.addi %arg1, %c0_i32_27 : i32
    %c0_28 = arith.constant 0 : index
    %38 = arith.index_cast %37 : i32 to index
    %c2_29 = arith.constant 2 : index
    %c0_30 = arith.constant 0 : index
    %39 = vector.load %arg2[%c0_28, %38, %c2_29, %c0_30] : memref<4x19x19x8xbf16, #tpu.memory_space<vmem>>, vector<1x1x16x8xbf16>
    %40 = vector.shape_cast %39 : vector<1x1x16x8xbf16> to vector<1x16x8xbf16>
    %41 = vector.shape_cast %40 : vector<1x16x8xbf16> to vector<16x8xbf16>
    %c4 = arith.constant 4 : index
    %c0_31 = arith.constant 0 : index
    %c0_32 = arith.constant 0 : index
    %42 = vector.load %arg3[%c4, %c0_31, %c0_32] : memref<49x8x128xbf16, #tpu.memory_space<vmem>>, vector<1x8x128xbf16>
    %43 = vector.shape_cast %42 : vector<1x8x128xbf16> to vector<8x128xbf16>
    %cst_33 = arith.constant dense<0.000000e+00> : vector<16x128xf32>
    %44 = tpu.matmul %41, %43, %cst_33 {dimension_numbers = #tpu.dot_dimension_numbers<[1], [0], [0], [1], [0, 0, 1, 1], [], []>} : vector<16x8xbf16>, vector<8x128xbf16>, vector<16x128xf32> -> vector<16x128xf32>
    %45 = arith.addf %36, %44 : vector<16x128xf32>
    %c0_i32_34 = arith.constant 0 : i32
    %46 = arith.addi %arg1, %c0_i32_34 : i32
    %c1_35 = arith.constant 1 : index
    %47 = arith.index_cast %46 : i32 to index
    %c2_36 = arith.constant 2 : index
    %c0_37 = arith.constant 0 : index
    %48 = vector.load %arg2[%c1_35, %47, %c2_36, %c0_37] : memref<4x19x19x8xbf16, #tpu.memory_space<vmem>>, vector<1x1x16x8xbf16>
    %49 = vector.shape_cast %48 : vector<1x1x16x8xbf16> to vector<1x16x8xbf16>
    %50 = vector.shape_cast %49 : vector<1x16x8xbf16> to vector<16x8xbf16>
    %c5 = arith.constant 5 : index
    %c0_38 = arith.constant 0 : index
    %c0_39 = arith.constant 0 : index
    %51 = vector.load %arg3[%c5, %c0_38, %c0_39] : memref<49x8x128xbf16, #tpu.memory_space<vmem>>, vector<1x8x128xbf16>
    %52 = vector.shape_cast %51 : vector<1x8x128xbf16> to vector<8x128xbf16>
    %cst_40 = arith.constant dense<0.000000e+00> : vector<16x128xf32>
    %53 = tpu.matmul %50, %52, %cst_40 {dimension_numbers = #tpu.dot_dimension_numbers<[1], [0], [0], [1], [0, 0, 1, 1], [], []>} : vector<16x8xbf16>, vector<8x128xbf16>, vector<16x128xf32> -> vector<16x128xf32>
    %54 = arith.addf %45, %53 : vector<16x128xf32>
    %c0_i32_41 = arith.constant 0 : i32
    %55 = arith.addi %arg1, %c0_i32_41 : i32
    %c0_42 = arith.constant 0 : index
    %56 = arith.index_cast %55 : i32 to index
    %c3_43 = arith.constant 3 : index
    %c0_44 = arith.constant 0 : index
    %57 = vector.load %arg2[%c0_42, %56, %c3_43, %c0_44] : memref<4x19x19x8xbf16, #tpu.memory_space<vmem>>, vector<1x1x16x8xbf16>
    %58 = vector.shape_cast %57 : vector<1x1x16x8xbf16> to vector<1x16x8xbf16>
    %59 = vector.shape_cast %58 : vector<1x16x8xbf16> to vector<16x8xbf16>
    %c6 = arith.constant 6 : index
    %c0_45 = arith.constant 0 : index
    %c0_46 = arith.constant 0 : index
    %60 = vector.load %arg3[%c6, %c0_45, %c0_46] : memref<49x8x128xbf16, #tpu.memory_space<vmem>>, vector<1x8x128xbf16>
    %61 = vector.shape_cast %60 : vector<1x8x128xbf16> to vector<8x128xbf16>
    %cst_47 = arith.constant dense<0.000000e+00> : vector<16x128xf32>
    %62 = tpu.matmul %59, %61, %cst_47 {dimension_numbers = #tpu.dot_dimension_numbers<[1], [0], [0], [1], [0, 0, 1, 1], [], []>} : vector<16x8xbf16>, vector<8x128xbf16>, vector<16x128xf32> -> vector<16x128xf32>
    %63 = arith.addf %54, %62 : vector<16x128xf32>
    %c0_i32_48 = arith.constant 0 : i32
    %64 = arith.addi %arg1, %c0_i32_48 : i32
    %c2_49 = arith.constant 2 : index
    %65 = arith.index_cast %64 : i32 to index
    %c0_50 = arith.constant 0 : index
    %c0_51 = arith.constant 0 : index
    %66 = vector.load %arg2[%c2_49, %65, %c0_50, %c0_51] : memref<4x19x19x8xbf16, #tpu.memory_space<vmem>>, vector<1x1x16x8xbf16>
    %67 = vector.shape_cast %66 : vector<1x1x16x8xbf16> to vector<1x16x8xbf16>
    %68 = vector.shape_cast %67 : vector<1x16x8xbf16> to vector<16x8xbf16>
    %c7 = arith.constant 7 : index
    %c0_52 = arith.constant 0 : index
    %c0_53 = arith.constant 0 : index
    %69 = vector.load %arg3[%c7, %c0_52, %c0_53] : memref<49x8x128xbf16, #tpu.memory_space<vmem>>, vector<1x8x128xbf16>
    %70 = vector.shape_cast %69 : vector<1x8x128xbf16> to vector<8x128xbf16>
    %cst_54 = arith.constant dense<0.000000e+00> : vector<16x128xf32>
    %71 = tpu.matmul %68, %70, %cst_54 {dimension_numbers = #tpu.dot_dimension_numbers<[1], [0], [0], [1], [0, 0, 1, 1], [], []>} : vector<16x8xbf16>, vector<8x128xbf16>, vector<16x128xf32> -> vector<16x128xf32>
    %72 = arith.addf %63, %71 : vector<16x128xf32>
    %c0_i32_55 = arith.constant 0 : i32
    %73 = arith.addi %arg1, %c0_i32_55 : i32
    %c3_56 = arith.constant 3 : index
    %74 = arith.index_cast %73 : i32 to index
    %c0_57 = arith.constant 0 : index
    %c0_58 = arith.constant 0 : index
    %75 = vector.load %arg2[%c3_56, %74, %c0_57, %c0_58] : memref<4x19x19x8xbf16, #tpu.memory_space<vmem>>, vector<1x1x16x8xbf16>
    %76 = vector.shape_cast %75 : vector<1x1x16x8xbf16> to vector<1x16x8xbf16>
    %77 = vector.shape_cast %76 : vector<1x16x8xbf16> to vector<16x8xbf16>
    %c8 = arith.constant 8 : index
    %c0_59 = arith.constant 0 : index
    %c0_60 = arith.constant 0 : index
    %78 = vector.load %arg3[%c8, %c0_59, %c0_60] : memref<49x8x128xbf16, #tpu.memory_space<vmem>>, vector<1x8x128xbf16>
    %79 = vector.shape_cast %78 : vector<1x8x128xbf16> to vector<8x128xbf16>
    %cst_61 = arith.constant dense<0.000000e+00> : vector<16x128xf32>
    %80 = tpu.matmul %77, %79, %cst_61 {dimension_numbers = #tpu.dot_dimension_numbers<[1], [0], [0], [1], [0, 0, 1, 1], [], []>} : vector<16x8xbf16>, vector<8x128xbf16>, vector<16x128xf32> -> vector<16x128xf32>
    %81 = arith.addf %72, %80 : vector<16x128xf32>
    %c0_i32_62 = arith.constant 0 : i32
    %82 = arith.addi %arg1, %c0_i32_62 : i32
    %c2_63 = arith.constant 2 : index
    %83 = arith.index_cast %82 : i32 to index
    %c1_64 = arith.constant 1 : index
    %c0_65 = arith.constant 0 : index
    %84 = vector.load %arg2[%c2_63, %83, %c1_64, %c0_65] : memref<4x19x19x8xbf16, #tpu.memory_space<vmem>>, vector<1x1x16x8xbf16>
    %85 = vector.shape_cast %84 : vector<1x1x16x8xbf16> to vector<1x16x8xbf16>
    %86 = vector.shape_cast %85 : vector<1x16x8xbf16> to vector<16x8xbf16>
    %c9 = arith.constant 9 : index
    %c0_66 = arith.constant 0 : index
    %c0_67 = arith.constant 0 : index
    %87 = vector.load %arg3[%c9, %c0_66, %c0_67] : memref<49x8x128xbf16, #tpu.memory_space<vmem>>, vector<1x8x128xbf16>
    %88 = vector.shape_cast %87 : vector<1x8x128xbf16> to vector<8x128xbf16>
    %cst_68 = arith.constant dense<0.000000e+00> : vector<16x128xf32>
    %89 = tpu.matmul %86, %88, %cst_68 {dimension_numbers = #tpu.dot_dimension_numbers<[1], [0], [0], [1], [0, 0, 1, 1], [], []>} : vector<16x8xbf16>, vector<8x128xbf16>, vector<16x128xf32> -> vector<16x128xf32>
    %90 = arith.addf %81, %89 : vector<16x128xf32>
    %c0_i32_69 = arith.constant 0 : i32
    %91 = arith.addi %arg1, %c0_i32_69 : i32
    %c3_70 = arith.constant 3 : index
    %92 = arith.index_cast %91 : i32 to index
    %c1_71 = arith.constant 1 : index
    %c0_72 = arith.constant 0 : index
    %93 = vector.load %arg2[%c3_70, %92, %c1_71, %c0_72] : memref<4x19x19x8xbf16, #tpu.memory_space<vmem>>, vector<1x1x16x8xbf16>
    %94 = vector.shape_cast %93 : vector<1x1x16x8xbf16> to vector<1x16x8xbf16>
    %95 = vector.shape_cast %94 : vector<1x16x8xbf16> to vector<16x8xbf16>
    %c10 = arith.constant 10 : index
    %c0_73 = arith.constant 0 : index
    %c0_74 = arith.constant 0 : index
    %96 = vector.load %arg3[%c10, %c0_73, %c0_74] : memref<49x8x128xbf16, #tpu.memory_space<vmem>>, vector<1x8x128xbf16>
    %97 = vector.shape_cast %96 : vector<1x8x128xbf16> to vector<8x128xbf16>
    %cst_75 = arith.constant dense<0.000000e+00> : vector<16x128xf32>
    %98 = tpu.matmul %95, %97, %cst_75 {dimension_numbers = #tpu.dot_dimension_numbers<[1], [0], [0], [1], [0, 0, 1, 1], [], []>} : vector<16x8xbf16>, vector<8x128xbf16>, vector<16x128xf32> -> vector<16x128xf32>
    %99 = arith.addf %90, %98 : vector<16x128xf32>
    %c0_i32_76 = arith.constant 0 : i32
    %100 = arith.addi %arg1, %c0_i32_76 : i32
    %c2_77 = arith.constant 2 : index
    %101 = arith.index_cast %100 : i32 to index
    %c2_78 = arith.constant 2 : index
    %c0_79 = arith.constant 0 : index
    %102 = vector.load %arg2[%c2_77, %101, %c2_78, %c0_79] : memref<4x19x19x8xbf16, #tpu.memory_space<vmem>>, vector<1x1x16x8xbf16>
    %103 = vector.shape_cast %102 : vector<1x1x16x8xbf16> to vector<1x16x8xbf16>
    %104 = vector.shape_cast %103 : vector<1x16x8xbf16> to vector<16x8xbf16>
    %c11 = arith.constant 11 : index
    %c0_80 = arith.constant 0 : index
    %c0_81 = arith.constant 0 : index
    %105 = vector.load %arg3[%c11, %c0_80, %c0_81] : memref<49x8x128xbf16, #tpu.memory_space<vmem>>, vector<1x8x128xbf16>
    %106 = vector.shape_cast %105 : vector<1x8x128xbf16> to vector<8x128xbf16>
    %cst_82 = arith.constant dense<0.000000e+00> : vector<16x128xf32>
    %107 = tpu.matmul %104, %106, %cst_82 {dimension_numbers = #tpu.dot_dimension_numbers<[1], [0], [0], [1], [0, 0, 1, 1], [], []>} : vector<16x8xbf16>, vector<8x128xbf16>, vector<16x128xf32> -> vector<16x128xf32>
    %108 = arith.addf %99, %107 : vector<16x128xf32>
    %c0_i32_83 = arith.constant 0 : i32
    %109 = arith.addi %arg1, %c0_i32_83 : i32
    %c3_84 = arith.constant 3 : index
    %110 = arith.index_cast %109 : i32 to index
    %c2_85 = arith.constant 2 : index
    %c0_86 = arith.constant 0 : index
    %111 = vector.load %arg2[%c3_84, %110, %c2_85, %c0_86] : memref<4x19x19x8xbf16, #tpu.memory_space<vmem>>, vector<1x1x16x8xbf16>
    %112 = vector.shape_cast %111 : vector<1x1x16x8xbf16> to vector<1x16x8xbf16>
    %113 = vector.shape_cast %112 : vector<1x16x8xbf16> to vector<16x8xbf16>
    %c12 = arith.constant 12 : index
    %c0_87 = arith.constant 0 : index
    %c0_88 = arith.constant 0 : index
    %114 = vector.load %arg3[%c12, %c0_87, %c0_88] : memref<49x8x128xbf16, #tpu.memory_space<vmem>>, vector<1x8x128xbf16>
    %115 = vector.shape_cast %114 : vector<1x8x128xbf16> to vector<8x128xbf16>
    %cst_89 = arith.constant dense<0.000000e+00> : vector<16x128xf32>
    %116 = tpu.matmul %113, %115, %cst_89 {dimension_numbers = #tpu.dot_dimension_numbers<[1], [0], [0], [1], [0, 0, 1, 1], [], []>} : vector<16x8xbf16>, vector<8x128xbf16>, vector<16x128xf32> -> vector<16x128xf32>
    %117 = arith.addf %108, %116 : vector<16x128xf32>
    %c0_i32_90 = arith.constant 0 : i32
    %118 = arith.addi %arg1, %c0_i32_90 : i32
    %c2_91 = arith.constant 2 : index
    %119 = arith.index_cast %118 : i32 to index
    %c3_92 = arith.constant 3 : index
    %c0_93 = arith.constant 0 : index
    %120 = vector.load %arg2[%c2_91, %119, %c3_92, %c0_93] : memref<4x19x19x8xbf16, #tpu.memory_space<vmem>>, vector<1x1x16x8xbf16>
    %121 = vector.shape_cast %120 : vector<1x1x16x8xbf16> to vector<1x16x8xbf16>
    %122 = vector.shape_cast %121 : vector<1x16x8xbf16> to vector<16x8xbf16>
    %c13 = arith.constant 13 : index
    %c0_94 = arith.constant 0 : index
    %c0_95 = arith.constant 0 : index
    %123 = vector.load %arg3[%c13, %c0_94, %c0_95] : memref<49x8x128xbf16, #tpu.memory_space<vmem>>, vector<1x8x128xbf16>
    %124 = vector.shape_cast %123 : vector<1x8x128xbf16> to vector<8x128xbf16>
    %cst_96 = arith.constant dense<0.000000e+00> : vector<16x128xf32>
    %125 = tpu.matmul %122, %124, %cst_96 {dimension_numbers = #tpu.dot_dimension_numbers<[1], [0], [0], [1], [0, 0, 1, 1], [], []>} : vector<16x8xbf16>, vector<8x128xbf16>, vector<16x128xf32> -> vector<16x128xf32>
    %126 = arith.addf %117, %125 : vector<16x128xf32>
    %c1_i32 = arith.constant 1 : i32
    %127 = arith.addi %arg1, %c1_i32 : i32
    %c0_97 = arith.constant 0 : index
    %128 = arith.index_cast %127 : i32 to index
    %c0_98 = arith.constant 0 : index
    %c0_99 = arith.constant 0 : index
    %129 = vector.load %arg2[%c0_97, %128, %c0_98, %c0_99] : memref<4x19x19x8xbf16, #tpu.memory_space<vmem>>, vector<1x1x16x8xbf16>
    %130 = vector.shape_cast %129 : vector<1x1x16x8xbf16> to vector<1x16x8xbf16>
    %131 = vector.shape_cast %130 : vector<1x16x8xbf16> to vector<16x8xbf16>
    %c14 = arith.constant 14 : index
    %c0_100 = arith.constant 0 : index
    %c0_101 = arith.constant 0 : index
    %132 = vector.load %arg3[%c14, %c0_100, %c0_101] : memref<49x8x128xbf16, #tpu.memory_space<vmem>>, vector<1x8x128xbf16>
    %133 = vector.shape_cast %132 : vector<1x8x128xbf16> to vector<8x128xbf16>
    %cst_102 = arith.constant dense<0.000000e+00> : vector<16x128xf32>
    %134 = tpu.matmul %131, %133, %cst_102 {dimension_numbers = #tpu.dot_dimension_numbers<[1], [0], [0], [1], [0, 0, 1, 1], [], []>} : vector<16x8xbf16>, vector<8x128xbf16>, vector<16x128xf32> -> vector<16x128xf32>
    %135 = arith.addf %126, %134 : vector<16x128xf32>
    %c1_i32_103 = arith.constant 1 : i32
    %136 = arith.addi %arg1, %c1_i32_103 : i32
    %c1_104 = arith.constant 1 : index
    %137 = arith.index_cast %136 : i32 to index
    %c0_105 = arith.constant 0 : index
    %c0_106 = arith.constant 0 : index
    %138 = vector.load %arg2[%c1_104, %137, %c0_105, %c0_106] : memref<4x19x19x8xbf16, #tpu.memory_space<vmem>>, vector<1x1x16x8xbf16>
    %139 = vector.shape_cast %138 : vector<1x1x16x8xbf16> to vector<1x16x8xbf16>
    %140 = vector.shape_cast %139 : vector<1x16x8xbf16> to vector<16x8xbf16>
    %c15 = arith.constant 15 : index
    %c0_107 = arith.constant 0 : index
    %c0_108 = arith.constant 0 : index
    %141 = vector.load %arg3[%c15, %c0_107, %c0_108] : memref<49x8x128xbf16, #tpu.memory_space<vmem>>, vector<1x8x128xbf16>
    %142 = vector.shape_cast %141 : vector<1x8x128xbf16> to vector<8x128xbf16>
    %cst_109 = arith.constant dense<0.000000e+00> : vector<16x128xf32>
    %143 = tpu.matmul %140, %142, %cst_109 {dimension_numbers = #tpu.dot_dimension_numbers<[1], [0], [0], [1], [0, 0, 1, 1], [], []>} : vector<16x8xbf16>, vector<8x128xbf16>, vector<16x128xf32> -> vector<16x128xf32>
    %144 = arith.addf %135, %143 : vector<16x128xf32>
    %c1_i32_110 = arith.constant 1 : i32
    %145 = arith.addi %arg1, %c1_i32_110 : i32
    %c0_111 = arith.constant 0 : index
    %146 = arith.index_cast %145 : i32 to index
    %c1_112 = arith.constant 1 : index
    %c0_113 = arith.constant 0 : index
    %147 = vector.load %arg2[%c0_111, %146, %c1_112, %c0_113] : memref<4x19x19x8xbf16, #tpu.memory_space<vmem>>, vector<1x1x16x8xbf16>
    %148 = vector.shape_cast %147 : vector<1x1x16x8xbf16> to vector<1x16x8xbf16>
    %149 = vector.shape_cast %148 : vector<1x16x8xbf16> to vector<16x8xbf16>
    %c16 = arith.constant 16 : index
    %c0_114 = arith.constant 0 : index
    %c0_115 = arith.constant 0 : index
    %150 = vector.load %arg3[%c16, %c0_114, %c0_115] : memref<49x8x128xbf16, #tpu.memory_space<vmem>>, vector<1x8x128xbf16>
    %151 = vector.shape_cast %150 : vector<1x8x128xbf16> to vector<8x128xbf16>
    %cst_116 = arith.constant dense<0.000000e+00> : vector<16x128xf32>
    %152 = tpu.matmul %149, %151, %cst_116 {dimension_numbers = #tpu.dot_dimension_numbers<[1], [0], [0], [1], [0, 0, 1, 1], [], []>} : vector<16x8xbf16>, vector<8x128xbf16>, vector<16x128xf32> -> vector<16x128xf32>
    %153 = arith.addf %144, %152 : vector<16x128xf32>
    %c1_i32_117 = arith.constant 1 : i32
    %154 = arith.addi %arg1, %c1_i32_117 : i32
    %c1_118 = arith.constant 1 : index
    %155 = arith.index_cast %154 : i32 to index
    %c1_119 = arith.constant 1 : index
    %c0_120 = arith.constant 0 : index
    %156 = vector.load %arg2[%c1_118, %155, %c1_119, %c0_120] : memref<4x19x19x8xbf16, #tpu.memory_space<vmem>>, vector<1x1x16x8xbf16>
    %157 = vector.shape_cast %156 : vector<1x1x16x8xbf16> to vector<1x16x8xbf16>
    %158 = vector.shape_cast %157 : vector<1x16x8xbf16> to vector<16x8xbf16>
    %c17 = arith.constant 17 : index
    %c0_121 = arith.constant 0 : index
    %c0_122 = arith.constant 0 : index
    %159 = vector.load %arg3[%c17, %c0_121, %c0_122] : memref<49x8x128xbf16, #tpu.memory_space<vmem>>, vector<1x8x128xbf16>
    %160 = vector.shape_cast %159 : vector<1x8x128xbf16> to vector<8x128xbf16>
    %cst_123 = arith.constant dense<0.000000e+00> : vector<16x128xf32>
    %161 = tpu.matmul %158, %160, %cst_123 {dimension_numbers = #tpu.dot_dimension_numbers<[1], [0], [0], [1], [0, 0, 1, 1], [], []>} : vector<16x8xbf16>, vector<8x128xbf16>, vector<16x128xf32> -> vector<16x128xf32>
    %162 = arith.addf %153, %161 : vector<16x128xf32>
    %c1_i32_124 = arith.constant 1 : i32
    %163 = arith.addi %arg1, %c1_i32_124 : i32
    %c0_125 = arith.constant 0 : index
    %164 = arith.index_cast %163 : i32 to index
    %c2_126 = arith.constant 2 : index
    %c0_127 = arith.constant 0 : index
    %165 = vector.load %arg2[%c0_125, %164, %c2_126, %c0_127] : memref<4x19x19x8xbf16, #tpu.memory_space<vmem>>, vector<1x1x16x8xbf16>
    %166 = vector.shape_cast %165 : vector<1x1x16x8xbf16> to vector<1x16x8xbf16>
    %167 = vector.shape_cast %166 : vector<1x16x8xbf16> to vector<16x8xbf16>
    %c18 = arith.constant 18 : index
    %c0_128 = arith.constant 0 : index
    %c0_129 = arith.constant 0 : index
    %168 = vector.load %arg3[%c18, %c0_128, %c0_129] : memref<49x8x128xbf16, #tpu.memory_space<vmem>>, vector<1x8x128xbf16>
    %169 = vector.shape_cast %168 : vector<1x8x128xbf16> to vector<8x128xbf16>
    %cst_130 = arith.constant dense<0.000000e+00> : vector<16x128xf32>
    %170 = tpu.matmul %167, %169, %cst_130 {dimension_numbers = #tpu.dot_dimension_numbers<[1], [0], [0], [1], [0, 0, 1, 1], [], []>} : vector<16x8xbf16>, vector<8x128xbf16>, vector<16x128xf32> -> vector<16x128xf32>
    %171 = arith.addf %162, %170 : vector<16x128xf32>
    %c1_i32_131 = arith.constant 1 : i32
    %172 = arith.addi %arg1, %c1_i32_131 : i32
    %c1_132 = arith.constant 1 : index
    %173 = arith.index_cast %172 : i32 to index
    %c2_133 = arith.constant 2 : index
    %c0_134 = arith.constant 0 : index
    %174 = vector.load %arg2[%c1_132, %173, %c2_133, %c0_134] : memref<4x19x19x8xbf16, #tpu.memory_space<vmem>>, vector<1x1x16x8xbf16>
    %175 = vector.shape_cast %174 : vector<1x1x16x8xbf16> to vector<1x16x8xbf16>
    %176 = vector.shape_cast %175 : vector<1x16x8xbf16> to vector<16x8xbf16>
    %c19 = arith.constant 19 : index
    %c0_135 = arith.constant 0 : index
    %c0_136 = arith.constant 0 : index
    %177 = vector.load %arg3[%c19, %c0_135, %c0_136] : memref<49x8x128xbf16, #tpu.memory_space<vmem>>, vector<1x8x128xbf16>
    %178 = vector.shape_cast %177 : vector<1x8x128xbf16> to vector<8x128xbf16>
    %cst_137 = arith.constant dense<0.000000e+00> : vector<16x128xf32>
    %179 = tpu.matmul %176, %178, %cst_137 {dimension_numbers = #tpu.dot_dimension_numbers<[1], [0], [0], [1], [0, 0, 1, 1], [], []>} : vector<16x8xbf16>, vector<8x128xbf16>, vector<16x128xf32> -> vector<16x128xf32>
    %180 = arith.addf %171, %179 : vector<16x128xf32>
    %c1_i32_138 = arith.constant 1 : i32
    %181 = arith.addi %arg1, %c1_i32_138 : i32
    %c0_139 = arith.constant 0 : index
    %182 = arith.index_cast %181 : i32 to index
    %c3_140 = arith.constant 3 : index
    %c0_141 = arith.constant 0 : index
    %183 = vector.load %arg2[%c0_139, %182, %c3_140, %c0_141] : memref<4x19x19x8xbf16, #tpu.memory_space<vmem>>, vector<1x1x16x8xbf16>
    %184 = vector.shape_cast %183 : vector<1x1x16x8xbf16> to vector<1x16x8xbf16>
    %185 = vector.shape_cast %184 : vector<1x16x8xbf16> to vector<16x8xbf16>
    %c20 = arith.constant 20 : index
    %c0_142 = arith.constant 0 : index
    %c0_143 = arith.constant 0 : index
    %186 = vector.load %arg3[%c20, %c0_142, %c0_143] : memref<49x8x128xbf16, #tpu.memory_space<vmem>>, vector<1x8x128xbf16>
    %187 = vector.shape_cast %186 : vector<1x8x128xbf16> to vector<8x128xbf16>
    %cst_144 = arith.constant dense<0.000000e+00> : vector<16x128xf32>
    %188 = tpu.matmul %185, %187, %cst_144 {dimension_numbers = #tpu.dot_dimension_numbers<[1], [0], [0], [1], [0, 0, 1, 1], [], []>} : vector<16x8xbf16>, vector<8x128xbf16>, vector<16x128xf32> -> vector<16x128xf32>
    %189 = arith.addf %180, %188 : vector<16x128xf32>
    %c1_i32_145 = arith.constant 1 : i32
    %190 = arith.addi %arg1, %c1_i32_145 : i32
    %c2_146 = arith.constant 2 : index
    %191 = arith.index_cast %190 : i32 to index
    %c0_147 = arith.constant 0 : index
    %c0_148 = arith.constant 0 : index
    %192 = vector.load %arg2[%c2_146, %191, %c0_147, %c0_148] : memref<4x19x19x8xbf16, #tpu.memory_space<vmem>>, vector<1x1x16x8xbf16>
    %193 = vector.shape_cast %192 : vector<1x1x16x8xbf16> to vector<1x16x8xbf16>
    %194 = vector.shape_cast %193 : vector<1x16x8xbf16> to vector<16x8xbf16>
    %c21 = arith.constant 21 : index
    %c0_149 = arith.constant 0 : index
    %c0_150 = arith.constant 0 : index
    %195 = vector.load %arg3[%c21, %c0_149, %c0_150] : memref<49x8x128xbf16, #tpu.memory_space<vmem>>, vector<1x8x128xbf16>
    %196 = vector.shape_cast %195 : vector<1x8x128xbf16> to vector<8x128xbf16>
    %cst_151 = arith.constant dense<0.000000e+00> : vector<16x128xf32>
    %197 = tpu.matmul %194, %196, %cst_151 {dimension_numbers = #tpu.dot_dimension_numbers<[1], [0], [0], [1], [0, 0, 1, 1], [], []>} : vector<16x8xbf16>, vector<8x128xbf16>, vector<16x128xf32> -> vector<16x128xf32>
    %198 = arith.addf %189, %197 : vector<16x128xf32>
    %c1_i32_152 = arith.constant 1 : i32
    %199 = arith.addi %arg1, %c1_i32_152 : i32
    %c3_153 = arith.constant 3 : index
    %200 = arith.index_cast %199 : i32 to index
    %c0_154 = arith.constant 0 : index
    %c0_155 = arith.constant 0 : index
    %201 = vector.load %arg2[%c3_153, %200, %c0_154, %c0_155] : memref<4x19x19x8xbf16, #tpu.memory_space<vmem>>, vector<1x1x16x8xbf16>
    %202 = vector.shape_cast %201 : vector<1x1x16x8xbf16> to vector<1x16x8xbf16>
    %203 = vector.shape_cast %202 : vector<1x16x8xbf16> to vector<16x8xbf16>
    %c22 = arith.constant 22 : index
    %c0_156 = arith.constant 0 : index
    %c0_157 = arith.constant 0 : index
    %204 = vector.load %arg3[%c22, %c0_156, %c0_157] : memref<49x8x128xbf16, #tpu.memory_space<vmem>>, vector<1x8x128xbf16>
    %205 = vector.shape_cast %204 : vector<1x8x128xbf16> to vector<8x128xbf16>
    %cst_158 = arith.constant dense<0.000000e+00> : vector<16x128xf32>
    %206 = tpu.matmul %203, %205, %cst_158 {dimension_numbers = #tpu.dot_dimension_numbers<[1], [0], [0], [1], [0, 0, 1, 1], [], []>} : vector<16x8xbf16>, vector<8x128xbf16>, vector<16x128xf32> -> vector<16x128xf32>
    %207 = arith.addf %198, %206 : vector<16x128xf32>
    %c1_i32_159 = arith.constant 1 : i32
    %208 = arith.addi %arg1, %c1_i32_159 : i32
    %c2_160 = arith.constant 2 : index
    %209 = arith.index_cast %208 : i32 to index
    %c1_161 = arith.constant 1 : index
    %c0_162 = arith.constant 0 : index
    %210 = vector.load %arg2[%c2_160, %209, %c1_161, %c0_162] : memref<4x19x19x8xbf16, #tpu.memory_space<vmem>>, vector<1x1x16x8xbf16>
    %211 = vector.shape_cast %210 : vector<1x1x16x8xbf16> to vector<1x16x8xbf16>
    %212 = vector.shape_cast %211 : vector<1x16x8xbf16> to vector<16x8xbf16>
    %c23 = arith.constant 23 : index
    %c0_163 = arith.constant 0 : index
    %c0_164 = arith.constant 0 : index
    %213 = vector.load %arg3[%c23, %c0_163, %c0_164] : memref<49x8x128xbf16, #tpu.memory_space<vmem>>, vector<1x8x128xbf16>
    %214 = vector.shape_cast %213 : vector<1x8x128xbf16> to vector<8x128xbf16>
    %cst_165 = arith.constant dense<0.000000e+00> : vector<16x128xf32>
    %215 = tpu.matmul %212, %214, %cst_165 {dimension_numbers = #tpu.dot_dimension_numbers<[1], [0], [0], [1], [0, 0, 1, 1], [], []>} : vector<16x8xbf16>, vector<8x128xbf16>, vector<16x128xf32> -> vector<16x128xf32>
    %216 = arith.addf %207, %215 : vector<16x128xf32>
    %c1_i32_166 = arith.constant 1 : i32
    %217 = arith.addi %arg1, %c1_i32_166 : i32
    %c3_167 = arith.constant 3 : index
    %218 = arith.index_cast %217 : i32 to index
    %c1_168 = arith.constant 1 : index
    %c0_169 = arith.constant 0 : index
    %219 = vector.load %arg2[%c3_167, %218, %c1_168, %c0_169] : memref<4x19x19x8xbf16, #tpu.memory_space<vmem>>, vector<1x1x16x8xbf16>
    %220 = vector.shape_cast %219 : vector<1x1x16x8xbf16> to vector<1x16x8xbf16>
    %221 = vector.shape_cast %220 : vector<1x16x8xbf16> to vector<16x8xbf16>
    %c24 = arith.constant 24 : index
    %c0_170 = arith.constant 0 : index
    %c0_171 = arith.constant 0 : index
    %222 = vector.load %arg3[%c24, %c0_170, %c0_171] : memref<49x8x128xbf16, #tpu.memory_space<vmem>>, vector<1x8x128xbf16>
    %223 = vector.shape_cast %222 : vector<1x8x128xbf16> to vector<8x128xbf16>
    %cst_172 = arith.constant dense<0.000000e+00> : vector<16x128xf32>
    %224 = tpu.matmul %221, %223, %cst_172 {dimension_numbers = #tpu.dot_dimension_numbers<[1], [0], [0], [1], [0, 0, 1, 1], [], []>} : vector<16x8xbf16>, vector<8x128xbf16>, vector<16x128xf32> -> vector<16x128xf32>
    %225 = arith.addf %216, %224 : vector<16x128xf32>
    %c1_i32_173 = arith.constant 1 : i32
    %226 = arith.addi %arg1, %c1_i32_173 : i32
    %c2_174 = arith.constant 2 : index
    %227 = arith.index_cast %226 : i32 to index
    %c2_175 = arith.constant 2 : index
    %c0_176 = arith.constant 0 : index
    %228 = vector.load %arg2[%c2_174, %227, %c2_175, %c0_176] : memref<4x19x19x8xbf16, #tpu.memory_space<vmem>>, vector<1x1x16x8xbf16>
    %229 = vector.shape_cast %228 : vector<1x1x16x8xbf16> to vector<1x16x8xbf16>
    %230 = vector.shape_cast %229 : vector<1x16x8xbf16> to vector<16x8xbf16>
    %c25 = arith.constant 25 : index
    %c0_177 = arith.constant 0 : index
    %c0_178 = arith.constant 0 : index
    %231 = vector.load %arg3[%c25, %c0_177, %c0_178] : memref<49x8x128xbf16, #tpu.memory_space<vmem>>, vector<1x8x128xbf16>
    %232 = vector.shape_cast %231 : vector<1x8x128xbf16> to vector<8x128xbf16>
    %cst_179 = arith.constant dense<0.000000e+00> : vector<16x128xf32>
    %233 = tpu.matmul %230, %232, %cst_179 {dimension_numbers = #tpu.dot_dimension_numbers<[1], [0], [0], [1], [0, 0, 1, 1], [], []>} : vector<16x8xbf16>, vector<8x128xbf16>, vector<16x128xf32> -> vector<16x128xf32>
    %234 = arith.addf %225, %233 : vector<16x128xf32>
    %c1_i32_180 = arith.constant 1 : i32
    %235 = arith.addi %arg1, %c1_i32_180 : i32
    %c3_181 = arith.constant 3 : index
    %236 = arith.index_cast %235 : i32 to index
    %c2_182 = arith.constant 2 : index
    %c0_183 = arith.constant 0 : index
    %237 = vector.load %arg2[%c3_181, %236, %c2_182, %c0_183] : memref<4x19x19x8xbf16, #tpu.memory_space<vmem>>, vector<1x1x16x8xbf16>
    %238 = vector.shape_cast %237 : vector<1x1x16x8xbf16> to vector<1x16x8xbf16>
    %239 = vector.shape_cast %238 : vector<1x16x8xbf16> to vector<16x8xbf16>
    %c26 = arith.constant 26 : index
    %c0_184 = arith.constant 0 : index
    %c0_185 = arith.constant 0 : index
    %240 = vector.load %arg3[%c26, %c0_184, %c0_185] : memref<49x8x128xbf16, #tpu.memory_space<vmem>>, vector<1x8x128xbf16>
    %241 = vector.shape_cast %240 : vector<1x8x128xbf16> to vector<8x128xbf16>
    %cst_186 = arith.constant dense<0.000000e+00> : vector<16x128xf32>
    %242 = tpu.matmul %239, %241, %cst_186 {dimension_numbers = #tpu.dot_dimension_numbers<[1], [0], [0], [1], [0, 0, 1, 1], [], []>} : vector<16x8xbf16>, vector<8x128xbf16>, vector<16x128xf32> -> vector<16x128xf32>
    %243 = arith.addf %234, %242 : vector<16x128xf32>
    %c1_i32_187 = arith.constant 1 : i32
    %244 = arith.addi %arg1, %c1_i32_187 : i32
    %c2_188 = arith.constant 2 : index
    %245 = arith.index_cast %244 : i32 to index
    %c3_189 = arith.constant 3 : index
    %c0_190 = arith.constant 0 : index
    %246 = vector.load %arg2[%c2_188, %245, %c3_189, %c0_190] : memref<4x19x19x8xbf16, #tpu.memory_space<vmem>>, vector<1x1x16x8xbf16>
    %247 = vector.shape_cast %246 : vector<1x1x16x8xbf16> to vector<1x16x8xbf16>
    %248 = vector.shape_cast %247 : vector<1x16x8xbf16> to vector<16x8xbf16>
    %c27 = arith.constant 27 : index
    %c0_191 = arith.constant 0 : index
    %c0_192 = arith.constant 0 : index
    %249 = vector.load %arg3[%c27, %c0_191, %c0_192] : memref<49x8x128xbf16, #tpu.memory_space<vmem>>, vector<1x8x128xbf16>
    %250 = vector.shape_cast %249 : vector<1x8x128xbf16> to vector<8x128xbf16>
    %cst_193 = arith.constant dense<0.000000e+00> : vector<16x128xf32>
    %251 = tpu.matmul %248, %250, %cst_193 {dimension_numbers = #tpu.dot_dimension_numbers<[1], [0], [0], [1], [0, 0, 1, 1], [], []>} : vector<16x8xbf16>, vector<8x128xbf16>, vector<16x128xf32> -> vector<16x128xf32>
    %252 = arith.addf %243, %251 : vector<16x128xf32>
    %c2_i32 = arith.constant 2 : i32
    %253 = arith.addi %arg1, %c2_i32 : i32
    %c0_194 = arith.constant 0 : index
    %254 = arith.index_cast %253 : i32 to index
    %c0_195 = arith.constant 0 : index
    %c0_196 = arith.constant 0 : index
    %255 = vector.load %arg2[%c0_194, %254, %c0_195, %c0_196] : memref<4x19x19x8xbf16, #tpu.memory_space<vmem>>, vector<1x1x16x8xbf16>
    %256 = vector.shape_cast %255 : vector<1x1x16x8xbf16> to vector<1x16x8xbf16>
    %257 = vector.shape_cast %256 : vector<1x16x8xbf16> to vector<16x8xbf16>
    %c28 = arith.constant 28 : index
    %c0_197 = arith.constant 0 : index
    %c0_198 = arith.constant 0 : index
    %258 = vector.load %arg3[%c28, %c0_197, %c0_198] : memref<49x8x128xbf16, #tpu.memory_space<vmem>>, vector<1x8x128xbf16>
    %259 = vector.shape_cast %258 : vector<1x8x128xbf16> to vector<8x128xbf16>
    %cst_199 = arith.constant dense<0.000000e+00> : vector<16x128xf32>
    %260 = tpu.matmul %257, %259, %cst_199 {dimension_numbers = #tpu.dot_dimension_numbers<[1], [0], [0], [1], [0, 0, 1, 1], [], []>} : vector<16x8xbf16>, vector<8x128xbf16>, vector<16x128xf32> -> vector<16x128xf32>
    %261 = arith.addf %252, %260 : vector<16x128xf32>
    %c2_i32_200 = arith.constant 2 : i32
    %262 = arith.addi %arg1, %c2_i32_200 : i32
    %c1_201 = arith.constant 1 : index
    %263 = arith.index_cast %262 : i32 to index
    %c0_202 = arith.constant 0 : index
    %c0_203 = arith.constant 0 : index
    %264 = vector.load %arg2[%c1_201, %263, %c0_202, %c0_203] : memref<4x19x19x8xbf16, #tpu.memory_space<vmem>>, vector<1x1x16x8xbf16>
    %265 = vector.shape_cast %264 : vector<1x1x16x8xbf16> to vector<1x16x8xbf16>
    %266 = vector.shape_cast %265 : vector<1x16x8xbf16> to vector<16x8xbf16>
    %c29 = arith.constant 29 : index
    %c0_204 = arith.constant 0 : index
    %c0_205 = arith.constant 0 : index
    %267 = vector.load %arg3[%c29, %c0_204, %c0_205] : memref<49x8x128xbf16, #tpu.memory_space<vmem>>, vector<1x8x128xbf16>
    %268 = vector.shape_cast %267 : vector<1x8x128xbf16> to vector<8x128xbf16>
    %cst_206 = arith.constant dense<0.000000e+00> : vector<16x128xf32>
    %269 = tpu.matmul %266, %268, %cst_206 {dimension_numbers = #tpu.dot_dimension_numbers<[1], [0], [0], [1], [0, 0, 1, 1], [], []>} : vector<16x8xbf16>, vector<8x128xbf16>, vector<16x128xf32> -> vector<16x128xf32>
    %270 = arith.addf %261, %269 : vector<16x128xf32>
    %c2_i32_207 = arith.constant 2 : i32
    %271 = arith.addi %arg1, %c2_i32_207 : i32
    %c0_208 = arith.constant 0 : index
    %272 = arith.index_cast %271 : i32 to index
    %c1_209 = arith.constant 1 : index
    %c0_210 = arith.constant 0 : index
    %273 = vector.load %arg2[%c0_208, %272, %c1_209, %c0_210] : memref<4x19x19x8xbf16, #tpu.memory_space<vmem>>, vector<1x1x16x8xbf16>
    %274 = vector.shape_cast %273 : vector<1x1x16x8xbf16> to vector<1x16x8xbf16>
    %275 = vector.shape_cast %274 : vector<1x16x8xbf16> to vector<16x8xbf16>
    %c30 = arith.constant 30 : index
    %c0_211 = arith.constant 0 : index
    %c0_212 = arith.constant 0 : index
    %276 = vector.load %arg3[%c30, %c0_211, %c0_212] : memref<49x8x128xbf16, #tpu.memory_space<vmem>>, vector<1x8x128xbf16>
    %277 = vector.shape_cast %276 : vector<1x8x128xbf16> to vector<8x128xbf16>
    %cst_213 = arith.constant dense<0.000000e+00> : vector<16x128xf32>
    %278 = tpu.matmul %275, %277, %cst_213 {dimension_numbers = #tpu.dot_dimension_numbers<[1], [0], [0], [1], [0, 0, 1, 1], [], []>} : vector<16x8xbf16>, vector<8x128xbf16>, vector<16x128xf32> -> vector<16x128xf32>
    %279 = arith.addf %270, %278 : vector<16x128xf32>
    %c2_i32_214 = arith.constant 2 : i32
    %280 = arith.addi %arg1, %c2_i32_214 : i32
    %c1_215 = arith.constant 1 : index
    %281 = arith.index_cast %280 : i32 to index
    %c1_216 = arith.constant 1 : index
    %c0_217 = arith.constant 0 : index
    %282 = vector.load %arg2[%c1_215, %281, %c1_216, %c0_217] : memref<4x19x19x8xbf16, #tpu.memory_space<vmem>>, vector<1x1x16x8xbf16>
    %283 = vector.shape_cast %282 : vector<1x1x16x8xbf16> to vector<1x16x8xbf16>
    %284 = vector.shape_cast %283 : vector<1x16x8xbf16> to vector<16x8xbf16>
    %c31 = arith.constant 31 : index
    %c0_218 = arith.constant 0 : index
    %c0_219 = arith.constant 0 : index
    %285 = vector.load %arg3[%c31, %c0_218, %c0_219] : memref<49x8x128xbf16, #tpu.memory_space<vmem>>, vector<1x8x128xbf16>
    %286 = vector.shape_cast %285 : vector<1x8x128xbf16> to vector<8x128xbf16>
    %cst_220 = arith.constant dense<0.000000e+00> : vector<16x128xf32>
    %287 = tpu.matmul %284, %286, %cst_220 {dimension_numbers = #tpu.dot_dimension_numbers<[1], [0], [0], [1], [0, 0, 1, 1], [], []>} : vector<16x8xbf16>, vector<8x128xbf16>, vector<16x128xf32> -> vector<16x128xf32>
    %288 = arith.addf %279, %287 : vector<16x128xf32>
    %c2_i32_221 = arith.constant 2 : i32
    %289 = arith.addi %arg1, %c2_i32_221 : i32
    %c0_222 = arith.constant 0 : index
    %290 = arith.index_cast %289 : i32 to index
    %c2_223 = arith.constant 2 : index
    %c0_224 = arith.constant 0 : index
    %291 = vector.load %arg2[%c0_222, %290, %c2_223, %c0_224] : memref<4x19x19x8xbf16, #tpu.memory_space<vmem>>, vector<1x1x16x8xbf16>
    %292 = vector.shape_cast %291 : vector<1x1x16x8xbf16> to vector<1x16x8xbf16>
    %293 = vector.shape_cast %292 : vector<1x16x8xbf16> to vector<16x8xbf16>
    %c32 = arith.constant 32 : index
    %c0_225 = arith.constant 0 : index
    %c0_226 = arith.constant 0 : index
    %294 = vector.load %arg3[%c32, %c0_225, %c0_226] : memref<49x8x128xbf16, #tpu.memory_space<vmem>>, vector<1x8x128xbf16>
    %295 = vector.shape_cast %294 : vector<1x8x128xbf16> to vector<8x128xbf16>
    %cst_227 = arith.constant dense<0.000000e+00> : vector<16x128xf32>
    %296 = tpu.matmul %293, %295, %cst_227 {dimension_numbers = #tpu.dot_dimension_numbers<[1], [0], [0], [1], [0, 0, 1, 1], [], []>} : vector<16x8xbf16>, vector<8x128xbf16>, vector<16x128xf32> -> vector<16x128xf32>
    %297 = arith.addf %288, %296 : vector<16x128xf32>
    %c2_i32_228 = arith.constant 2 : i32
    %298 = arith.addi %arg1, %c2_i32_228 : i32
    %c1_229 = arith.constant 1 : index
    %299 = arith.index_cast %298 : i32 to index
    %c2_230 = arith.constant 2 : index
    %c0_231 = arith.constant 0 : index
    %300 = vector.load %arg2[%c1_229, %299, %c2_230, %c0_231] : memref<4x19x19x8xbf16, #tpu.memory_space<vmem>>, vector<1x1x16x8xbf16>
    %301 = vector.shape_cast %300 : vector<1x1x16x8xbf16> to vector<1x16x8xbf16>
    %302 = vector.shape_cast %301 : vector<1x16x8xbf16> to vector<16x8xbf16>
    %c33 = arith.constant 33 : index
    %c0_232 = arith.constant 0 : index
    %c0_233 = arith.constant 0 : index
    %303 = vector.load %arg3[%c33, %c0_232, %c0_233] : memref<49x8x128xbf16, #tpu.memory_space<vmem>>, vector<1x8x128xbf16>
    %304 = vector.shape_cast %303 : vector<1x8x128xbf16> to vector<8x128xbf16>
    %cst_234 = arith.constant dense<0.000000e+00> : vector<16x128xf32>
    %305 = tpu.matmul %302, %304, %cst_234 {dimension_numbers = #tpu.dot_dimension_numbers<[1], [0], [0], [1], [0, 0, 1, 1], [], []>} : vector<16x8xbf16>, vector<8x128xbf16>, vector<16x128xf32> -> vector<16x128xf32>
    %306 = arith.addf %297, %305 : vector<16x128xf32>
    %c2_i32_235 = arith.constant 2 : i32
    %307 = arith.addi %arg1, %c2_i32_235 : i32
    %c0_236 = arith.constant 0 : index
    %308 = arith.index_cast %307 : i32 to index
    %c3_237 = arith.constant 3 : index
    %c0_238 = arith.constant 0 : index
    %309 = vector.load %arg2[%c0_236, %308, %c3_237, %c0_238] : memref<4x19x19x8xbf16, #tpu.memory_space<vmem>>, vector<1x1x16x8xbf16>
    %310 = vector.shape_cast %309 : vector<1x1x16x8xbf16> to vector<1x16x8xbf16>
    %311 = vector.shape_cast %310 : vector<1x16x8xbf16> to vector<16x8xbf16>
    %c34 = arith.constant 34 : index
    %c0_239 = arith.constant 0 : index
    %c0_240 = arith.constant 0 : index
    %312 = vector.load %arg3[%c34, %c0_239, %c0_240] : memref<49x8x128xbf16, #tpu.memory_space<vmem>>, vector<1x8x128xbf16>
    %313 = vector.shape_cast %312 : vector<1x8x128xbf16> to vector<8x128xbf16>
    %cst_241 = arith.constant dense<0.000000e+00> : vector<16x128xf32>
    %314 = tpu.matmul %311, %313, %cst_241 {dimension_numbers = #tpu.dot_dimension_numbers<[1], [0], [0], [1], [0, 0, 1, 1], [], []>} : vector<16x8xbf16>, vector<8x128xbf16>, vector<16x128xf32> -> vector<16x128xf32>
    %315 = arith.addf %306, %314 : vector<16x128xf32>
    %c2_i32_242 = arith.constant 2 : i32
    %316 = arith.addi %arg1, %c2_i32_242 : i32
    %c2_243 = arith.constant 2 : index
    %317 = arith.index_cast %316 : i32 to index
    %c0_244 = arith.constant 0 : index
    %c0_245 = arith.constant 0 : index
    %318 = vector.load %arg2[%c2_243, %317, %c0_244, %c0_245] : memref<4x19x19x8xbf16, #tpu.memory_space<vmem>>, vector<1x1x16x8xbf16>
    %319 = vector.shape_cast %318 : vector<1x1x16x8xbf16> to vector<1x16x8xbf16>
    %320 = vector.shape_cast %319 : vector<1x16x8xbf16> to vector<16x8xbf16>
    %c35 = arith.constant 35 : index
    %c0_246 = arith.constant 0 : index
    %c0_247 = arith.constant 0 : index
    %321 = vector.load %arg3[%c35, %c0_246, %c0_247] : memref<49x8x128xbf16, #tpu.memory_space<vmem>>, vector<1x8x128xbf16>
    %322 = vector.shape_cast %321 : vector<1x8x128xbf16> to vector<8x128xbf16>
    %cst_248 = arith.constant dense<0.000000e+00> : vector<16x128xf32>
    %323 = tpu.matmul %320, %322, %cst_248 {dimension_numbers = #tpu.dot_dimension_numbers<[1], [0], [0], [1], [0, 0, 1, 1], [], []>} : vector<16x8xbf16>, vector<8x128xbf16>, vector<16x128xf32> -> vector<16x128xf32>
    %324 = arith.addf %315, %323 : vector<16x128xf32>
    %c2_i32_249 = arith.constant 2 : i32
    %325 = arith.addi %arg1, %c2_i32_249 : i32
    %c3_250 = arith.constant 3 : index
    %326 = arith.index_cast %325 : i32 to index
    %c0_251 = arith.constant 0 : index
    %c0_252 = arith.constant 0 : index
    %327 = vector.load %arg2[%c3_250, %326, %c0_251, %c0_252] : memref<4x19x19x8xbf16, #tpu.memory_space<vmem>>, vector<1x1x16x8xbf16>
    %328 = vector.shape_cast %327 : vector<1x1x16x8xbf16> to vector<1x16x8xbf16>
    %329 = vector.shape_cast %328 : vector<1x16x8xbf16> to vector<16x8xbf16>
    %c36 = arith.constant 36 : index
    %c0_253 = arith.constant 0 : index
    %c0_254 = arith.constant 0 : index
    %330 = vector.load %arg3[%c36, %c0_253, %c0_254] : memref<49x8x128xbf16, #tpu.memory_space<vmem>>, vector<1x8x128xbf16>
    %331 = vector.shape_cast %330 : vector<1x8x128xbf16> to vector<8x128xbf16>
    %cst_255 = arith.constant dense<0.000000e+00> : vector<16x128xf32>
    %332 = tpu.matmul %329, %331, %cst_255 {dimension_numbers = #tpu.dot_dimension_numbers<[1], [0], [0], [1], [0, 0, 1, 1], [], []>} : vector<16x8xbf16>, vector<8x128xbf16>, vector<16x128xf32> -> vector<16x128xf32>
    %333 = arith.addf %324, %332 : vector<16x128xf32>
    %c2_i32_256 = arith.constant 2 : i32
    %334 = arith.addi %arg1, %c2_i32_256 : i32
    %c2_257 = arith.constant 2 : index
    %335 = arith.index_cast %334 : i32 to index
    %c1_258 = arith.constant 1 : index
    %c0_259 = arith.constant 0 : index
    %336 = vector.load %arg2[%c2_257, %335, %c1_258, %c0_259] : memref<4x19x19x8xbf16, #tpu.memory_space<vmem>>, vector<1x1x16x8xbf16>
    %337 = vector.shape_cast %336 : vector<1x1x16x8xbf16> to vector<1x16x8xbf16>
    %338 = vector.shape_cast %337 : vector<1x16x8xbf16> to vector<16x8xbf16>
    %c37 = arith.constant 37 : index
    %c0_260 = arith.constant 0 : index
    %c0_261 = arith.constant 0 : index
    %339 = vector.load %arg3[%c37, %c0_260, %c0_261] : memref<49x8x128xbf16, #tpu.memory_space<vmem>>, vector<1x8x128xbf16>
    %340 = vector.shape_cast %339 : vector<1x8x128xbf16> to vector<8x128xbf16>
    %cst_262 = arith.constant dense<0.000000e+00> : vector<16x128xf32>
    %341 = tpu.matmul %338, %340, %cst_262 {dimension_numbers = #tpu.dot_dimension_numbers<[1], [0], [0], [1], [0, 0, 1, 1], [], []>} : vector<16x8xbf16>, vector<8x128xbf16>, vector<16x128xf32> -> vector<16x128xf32>
    %342 = arith.addf %333, %341 : vector<16x128xf32>
    %c2_i32_263 = arith.constant 2 : i32
    %343 = arith.addi %arg1, %c2_i32_263 : i32
    %c3_264 = arith.constant 3 : index
    %344 = arith.index_cast %343 : i32 to index
    %c1_265 = arith.constant 1 : index
    %c0_266 = arith.constant 0 : index
    %345 = vector.load %arg2[%c3_264, %344, %c1_265, %c0_266] : memref<4x19x19x8xbf16, #tpu.memory_space<vmem>>, vector<1x1x16x8xbf16>
    %346 = vector.shape_cast %345 : vector<1x1x16x8xbf16> to vector<1x16x8xbf16>
    %347 = vector.shape_cast %346 : vector<1x16x8xbf16> to vector<16x8xbf16>
    %c38 = arith.constant 38 : index
    %c0_267 = arith.constant 0 : index
    %c0_268 = arith.constant 0 : index
    %348 = vector.load %arg3[%c38, %c0_267, %c0_268] : memref<49x8x128xbf16, #tpu.memory_space<vmem>>, vector<1x8x128xbf16>
    %349 = vector.shape_cast %348 : vector<1x8x128xbf16> to vector<8x128xbf16>
    %cst_269 = arith.constant dense<0.000000e+00> : vector<16x128xf32>
    %350 = tpu.matmul %347, %349, %cst_269 {dimension_numbers = #tpu.dot_dimension_numbers<[1], [0], [0], [1], [0, 0, 1, 1], [], []>} : vector<16x8xbf16>, vector<8x128xbf16>, vector<16x128xf32> -> vector<16x128xf32>
    %351 = arith.addf %342, %350 : vector<16x128xf32>
    %c2_i32_270 = arith.constant 2 : i32
    %352 = arith.addi %arg1, %c2_i32_270 : i32
    %c2_271 = arith.constant 2 : index
    %353 = arith.index_cast %352 : i32 to index
    %c2_272 = arith.constant 2 : index
    %c0_273 = arith.constant 0 : index
    %354 = vector.load %arg2[%c2_271, %353, %c2_272, %c0_273] : memref<4x19x19x8xbf16, #tpu.memory_space<vmem>>, vector<1x1x16x8xbf16>
    %355 = vector.shape_cast %354 : vector<1x1x16x8xbf16> to vector<1x16x8xbf16>
    %356 = vector.shape_cast %355 : vector<1x16x8xbf16> to vector<16x8xbf16>
    %c39 = arith.constant 39 : index
    %c0_274 = arith.constant 0 : index
    %c0_275 = arith.constant 0 : index
    %357 = vector.load %arg3[%c39, %c0_274, %c0_275] : memref<49x8x128xbf16, #tpu.memory_space<vmem>>, vector<1x8x128xbf16>
    %358 = vector.shape_cast %357 : vector<1x8x128xbf16> to vector<8x128xbf16>
    %cst_276 = arith.constant dense<0.000000e+00> : vector<16x128xf32>
    %359 = tpu.matmul %356, %358, %cst_276 {dimension_numbers = #tpu.dot_dimension_numbers<[1], [0], [0], [1], [0, 0, 1, 1], [], []>} : vector<16x8xbf16>, vector<8x128xbf16>, vector<16x128xf32> -> vector<16x128xf32>
    %360 = arith.addf %351, %359 : vector<16x128xf32>
    %c2_i32_277 = arith.constant 2 : i32
    %361 = arith.addi %arg1, %c2_i32_277 : i32
    %c3_278 = arith.constant 3 : index
    %362 = arith.index_cast %361 : i32 to index
    %c2_279 = arith.constant 2 : index
    %c0_280 = arith.constant 0 : index
    %363 = vector.load %arg2[%c3_278, %362, %c2_279, %c0_280] : memref<4x19x19x8xbf16, #tpu.memory_space<vmem>>, vector<1x1x16x8xbf16>
    %364 = vector.shape_cast %363 : vector<1x1x16x8xbf16> to vector<1x16x8xbf16>
    %365 = vector.shape_cast %364 : vector<1x16x8xbf16> to vector<16x8xbf16>
    %c40 = arith.constant 40 : index
    %c0_281 = arith.constant 0 : index
    %c0_282 = arith.constant 0 : index
    %366 = vector.load %arg3[%c40, %c0_281, %c0_282] : memref<49x8x128xbf16, #tpu.memory_space<vmem>>, vector<1x8x128xbf16>
    %367 = vector.shape_cast %366 : vector<1x8x128xbf16> to vector<8x128xbf16>
    %cst_283 = arith.constant dense<0.000000e+00> : vector<16x128xf32>
    %368 = tpu.matmul %365, %367, %cst_283 {dimension_numbers = #tpu.dot_dimension_numbers<[1], [0], [0], [1], [0, 0, 1, 1], [], []>} : vector<16x8xbf16>, vector<8x128xbf16>, vector<16x128xf32> -> vector<16x128xf32>
    %369 = arith.addf %360, %368 : vector<16x128xf32>
    %c2_i32_284 = arith.constant 2 : i32
    %370 = arith.addi %arg1, %c2_i32_284 : i32
    %c2_285 = arith.constant 2 : index
    %371 = arith.index_cast %370 : i32 to index
    %c3_286 = arith.constant 3 : index
    %c0_287 = arith.constant 0 : index
    %372 = vector.load %arg2[%c2_285, %371, %c3_286, %c0_287] : memref<4x19x19x8xbf16, #tpu.memory_space<vmem>>, vector<1x1x16x8xbf16>
    %373 = vector.shape_cast %372 : vector<1x1x16x8xbf16> to vector<1x16x8xbf16>
    %374 = vector.shape_cast %373 : vector<1x16x8xbf16> to vector<16x8xbf16>
    %c41 = arith.constant 41 : index
    %c0_288 = arith.constant 0 : index
    %c0_289 = arith.constant 0 : index
    %375 = vector.load %arg3[%c41, %c0_288, %c0_289] : memref<49x8x128xbf16, #tpu.memory_space<vmem>>, vector<1x8x128xbf16>
    %376 = vector.shape_cast %375 : vector<1x8x128xbf16> to vector<8x128xbf16>
    %cst_290 = arith.constant dense<0.000000e+00> : vector<16x128xf32>
    %377 = tpu.matmul %374, %376, %cst_290 {dimension_numbers = #tpu.dot_dimension_numbers<[1], [0], [0], [1], [0, 0, 1, 1], [], []>} : vector<16x8xbf16>, vector<8x128xbf16>, vector<16x128xf32> -> vector<16x128xf32>
    %378 = arith.addf %369, %377 : vector<16x128xf32>
    %c3_i32 = arith.constant 3 : i32
    %379 = arith.addi %arg1, %c3_i32 : i32
    %c0_291 = arith.constant 0 : index
    %380 = arith.index_cast %379 : i32 to index
    %c0_292 = arith.constant 0 : index
    %c0_293 = arith.constant 0 : index
    %381 = vector.load %arg2[%c0_291, %380, %c0_292, %c0_293] : memref<4x19x19x8xbf16, #tpu.memory_space<vmem>>, vector<1x1x16x8xbf16>
    %382 = vector.shape_cast %381 : vector<1x1x16x8xbf16> to vector<1x16x8xbf16>
    %383 = vector.shape_cast %382 : vector<1x16x8xbf16> to vector<16x8xbf16>
    %c42 = arith.constant 42 : index
    %c0_294 = arith.constant 0 : index
    %c0_295 = arith.constant 0 : index
    %384 = vector.load %arg3[%c42, %c0_294, %c0_295] : memref<49x8x128xbf16, #tpu.memory_space<vmem>>, vector<1x8x128xbf16>
    %385 = vector.shape_cast %384 : vector<1x8x128xbf16> to vector<8x128xbf16>
    %cst_296 = arith.constant dense<0.000000e+00> : vector<16x128xf32>
    %386 = tpu.matmul %383, %385, %cst_296 {dimension_numbers = #tpu.dot_dimension_numbers<[1], [0], [0], [1], [0, 0, 1, 1], [], []>} : vector<16x8xbf16>, vector<8x128xbf16>, vector<16x128xf32> -> vector<16x128xf32>
    %387 = arith.addf %378, %386 : vector<16x128xf32>
    %c3_i32_297 = arith.constant 3 : i32
    %388 = arith.addi %arg1, %c3_i32_297 : i32
    %c1_298 = arith.constant 1 : index
    %389 = arith.index_cast %388 : i32 to index
    %c0_299 = arith.constant 0 : index
    %c0_300 = arith.constant 0 : index
    %390 = vector.load %arg2[%c1_298, %389, %c0_299, %c0_300] : memref<4x19x19x8xbf16, #tpu.memory_space<vmem>>, vector<1x1x16x8xbf16>
    %391 = vector.shape_cast %390 : vector<1x1x16x8xbf16> to vector<1x16x8xbf16>
    %392 = vector.shape_cast %391 : vector<1x16x8xbf16> to vector<16x8xbf16>
    %c43 = arith.constant 43 : index
    %c0_301 = arith.constant 0 : index
    %c0_302 = arith.constant 0 : index
    %393 = vector.load %arg3[%c43, %c0_301, %c0_302] : memref<49x8x128xbf16, #tpu.memory_space<vmem>>, vector<1x8x128xbf16>
    %394 = vector.shape_cast %393 : vector<1x8x128xbf16> to vector<8x128xbf16>
    %cst_303 = arith.constant dense<0.000000e+00> : vector<16x128xf32>
    %395 = tpu.matmul %392, %394, %cst_303 {dimension_numbers = #tpu.dot_dimension_numbers<[1], [0], [0], [1], [0, 0, 1, 1], [], []>} : vector<16x8xbf16>, vector<8x128xbf16>, vector<16x128xf32> -> vector<16x128xf32>
    %396 = arith.addf %387, %395 : vector<16x128xf32>
    %c3_i32_304 = arith.constant 3 : i32
    %397 = arith.addi %arg1, %c3_i32_304 : i32
    %c0_305 = arith.constant 0 : index
    %398 = arith.index_cast %397 : i32 to index
    %c1_306 = arith.constant 1 : index
    %c0_307 = arith.constant 0 : index
    %399 = vector.load %arg2[%c0_305, %398, %c1_306, %c0_307] : memref<4x19x19x8xbf16, #tpu.memory_space<vmem>>, vector<1x1x16x8xbf16>
    %400 = vector.shape_cast %399 : vector<1x1x16x8xbf16> to vector<1x16x8xbf16>
    %401 = vector.shape_cast %400 : vector<1x16x8xbf16> to vector<16x8xbf16>
    %c44 = arith.constant 44 : index
    %c0_308 = arith.constant 0 : index
    %c0_309 = arith.constant 0 : index
    %402 = vector.load %arg3[%c44, %c0_308, %c0_309] : memref<49x8x128xbf16, #tpu.memory_space<vmem>>, vector<1x8x128xbf16>
    %403 = vector.shape_cast %402 : vector<1x8x128xbf16> to vector<8x128xbf16>
    %cst_310 = arith.constant dense<0.000000e+00> : vector<16x128xf32>
    %404 = tpu.matmul %401, %403, %cst_310 {dimension_numbers = #tpu.dot_dimension_numbers<[1], [0], [0], [1], [0, 0, 1, 1], [], []>} : vector<16x8xbf16>, vector<8x128xbf16>, vector<16x128xf32> -> vector<16x128xf32>
    %405 = arith.addf %396, %404 : vector<16x128xf32>
    %c3_i32_311 = arith.constant 3 : i32
    %406 = arith.addi %arg1, %c3_i32_311 : i32
    %c1_312 = arith.constant 1 : index
    %407 = arith.index_cast %406 : i32 to index
    %c1_313 = arith.constant 1 : index
    %c0_314 = arith.constant 0 : index
    %408 = vector.load %arg2[%c1_312, %407, %c1_313, %c0_314] : memref<4x19x19x8xbf16, #tpu.memory_space<vmem>>, vector<1x1x16x8xbf16>
    %409 = vector.shape_cast %408 : vector<1x1x16x8xbf16> to vector<1x16x8xbf16>
    %410 = vector.shape_cast %409 : vector<1x16x8xbf16> to vector<16x8xbf16>
    %c45 = arith.constant 45 : index
    %c0_315 = arith.constant 0 : index
    %c0_316 = arith.constant 0 : index
    %411 = vector.load %arg3[%c45, %c0_315, %c0_316] : memref<49x8x128xbf16, #tpu.memory_space<vmem>>, vector<1x8x128xbf16>
    %412 = vector.shape_cast %411 : vector<1x8x128xbf16> to vector<8x128xbf16>
    %cst_317 = arith.constant dense<0.000000e+00> : vector<16x128xf32>
    %413 = tpu.matmul %410, %412, %cst_317 {dimension_numbers = #tpu.dot_dimension_numbers<[1], [0], [0], [1], [0, 0, 1, 1], [], []>} : vector<16x8xbf16>, vector<8x128xbf16>, vector<16x128xf32> -> vector<16x128xf32>
    %414 = arith.addf %405, %413 : vector<16x128xf32>
    %c3_i32_318 = arith.constant 3 : i32
    %415 = arith.addi %arg1, %c3_i32_318 : i32
    %c0_319 = arith.constant 0 : index
    %416 = arith.index_cast %415 : i32 to index
    %c2_320 = arith.constant 2 : index
    %c0_321 = arith.constant 0 : index
    %417 = vector.load %arg2[%c0_319, %416, %c2_320, %c0_321] : memref<4x19x19x8xbf16, #tpu.memory_space<vmem>>, vector<1x1x16x8xbf16>
    %418 = vector.shape_cast %417 : vector<1x1x16x8xbf16> to vector<1x16x8xbf16>
    %419 = vector.shape_cast %418 : vector<1x16x8xbf16> to vector<16x8xbf16>
    %c46 = arith.constant 46 : index
    %c0_322 = arith.constant 0 : index
    %c0_323 = arith.constant 0 : index
    %420 = vector.load %arg3[%c46, %c0_322, %c0_323] : memref<49x8x128xbf16, #tpu.memory_space<vmem>>, vector<1x8x128xbf16>
    %421 = vector.shape_cast %420 : vector<1x8x128xbf16> to vector<8x128xbf16>
    %cst_324 = arith.constant dense<0.000000e+00> : vector<16x128xf32>
    %422 = tpu.matmul %419, %421, %cst_324 {dimension_numbers = #tpu.dot_dimension_numbers<[1], [0], [0], [1], [0, 0, 1, 1], [], []>} : vector<16x8xbf16>, vector<8x128xbf16>, vector<16x128xf32> -> vector<16x128xf32>
    %423 = arith.addf %414, %422 : vector<16x128xf32>
    %c3_i32_325 = arith.constant 3 : i32
    %424 = arith.addi %arg1, %c3_i32_325 : i32
    %c1_326 = arith.constant 1 : index
    %425 = arith.index_cast %424 : i32 to index
    %c2_327 = arith.constant 2 : index
    %c0_328 = arith.constant 0 : index
    %426 = vector.load %arg2[%c1_326, %425, %c2_327, %c0_328] : memref<4x19x19x8xbf16, #tpu.memory_space<vmem>>, vector<1x1x16x8xbf16>
    %427 = vector.shape_cast %426 : vector<1x1x16x8xbf16> to vector<1x16x8xbf16>
    %428 = vector.shape_cast %427 : vector<1x16x8xbf16> to vector<16x8xbf16>
    %c47 = arith.constant 47 : index
    %c0_329 = arith.constant 0 : index
    %c0_330 = arith.constant 0 : index
    %429 = vector.load %arg3[%c47, %c0_329, %c0_330] : memref<49x8x128xbf16, #tpu.memory_space<vmem>>, vector<1x8x128xbf16>
    %430 = vector.shape_cast %429 : vector<1x8x128xbf16> to vector<8x128xbf16>
    %cst_331 = arith.constant dense<0.000000e+00> : vector<16x128xf32>
    %431 = tpu.matmul %428, %430, %cst_331 {dimension_numbers = #tpu.dot_dimension_numbers<[1], [0], [0], [1], [0, 0, 1, 1], [], []>} : vector<16x8xbf16>, vector<8x128xbf16>, vector<16x128xf32> -> vector<16x128xf32>
    %432 = arith.addf %423, %431 : vector<16x128xf32>
    %c3_i32_332 = arith.constant 3 : i32
    %433 = arith.addi %arg1, %c3_i32_332 : i32
    %c0_333 = arith.constant 0 : index
    %434 = arith.index_cast %433 : i32 to index
    %c3_334 = arith.constant 3 : index
    %c0_335 = arith.constant 0 : index
    %435 = vector.load %arg2[%c0_333, %434, %c3_334, %c0_335] : memref<4x19x19x8xbf16, #tpu.memory_space<vmem>>, vector<1x1x16x8xbf16>
    %436 = vector.shape_cast %435 : vector<1x1x16x8xbf16> to vector<1x16x8xbf16>
    %437 = vector.shape_cast %436 : vector<1x16x8xbf16> to vector<16x8xbf16>
    %c48 = arith.constant 48 : index
    %c0_336 = arith.constant 0 : index
    %c0_337 = arith.constant 0 : index
    %438 = vector.load %arg3[%c48, %c0_336, %c0_337] : memref<49x8x128xbf16, #tpu.memory_space<vmem>>, vector<1x8x128xbf16>
    %439 = vector.shape_cast %438 : vector<1x8x128xbf16> to vector<8x128xbf16>
    %cst_338 = arith.constant dense<0.000000e+00> : vector<16x128xf32>
    %440 = tpu.matmul %437, %439, %cst_338 {dimension_numbers = #tpu.dot_dimension_numbers<[1], [0], [0], [1], [0, 0, 1, 1], [], []>} : vector<16x8xbf16>, vector<8x128xbf16>, vector<16x128xf32> -> vector<16x128xf32>
    %441 = arith.addf %432, %440 : vector<16x128xf32>
    %c0_339 = arith.constant 0 : index
    %c0_340 = arith.constant 0 : index
    %442 = vector.load %arg4[%c0_339, %c0_340] : memref<1x128xf32, #tpu.memory_space<vmem>>, vector<1x128xf32>
    %443 = vector.broadcast %442 : vector<1x128xf32> to vector<16x128xf32>
    %444 = arith.addf %441, %443 : vector<16x128xf32>
    %cst_341 = arith.constant 0.000000e+00 : f32
    %445 = vector.broadcast %cst_341 : f32 to vector<16x128xf32>
    %446 = arith.maximumf %444, %445 : vector<16x128xf32>
    %447 = vector.shape_cast %446 : vector<16x128xf32> to vector<1x1x16x128xf32>
    %c0_342 = arith.constant 0 : index
    %c0_343 = arith.constant 0 : index
    %c0_344 = arith.constant 0 : index
    %c0_345 = arith.constant 0 : index
    %448 = vector.load %arg5[%c0_342, %c0_343, %c0_344, %c0_345] : memref<1x1x16x128xf32, #tpu.memory_space<vmem>>, vector<1x1x16x128xf32>
    tpu.vector_store %arg5[%c0_342, %c0_343, %c0_344, %c0_345], %447 {strides = array<i32>} : memref<1x1x16x128xf32, #tpu.memory_space<vmem>>, vector<1x1x16x128xf32>,
    return
  }
  func.func @transform_0(%arg0: i32, %arg1: i32) -> (i32, i32, i32, i32) {
    %c0_i32 = arith.constant 0 : i32
    %c0_i32_0 = arith.constant 0 : i32
    %c0_i32_1 = arith.constant 0 : i32
    %c0_i32_2 = arith.constant 0 : i32
    return %arg0, %c0_i32, %c0_i32_0, %c0_i32_1 : i32, i32, i32, i32
  }
  func.func @transform_1(%arg0: i32, %arg1: i32) -> (i32, i32, i32) {
    %c0_i32 = arith.constant 0 : i32
    %c0_i32_0 = arith.constant 0 : i32
    %c0_i32_1 = arith.constant 0 : i32
    %c0_i32_2 = arith.constant 0 : i32
    return %c0_i32, %c0_i32_0, %c0_i32_1 : i32, i32, i32
  }
  func.func @transform_2(%arg0: i32, %arg1: i32) -> (i32, i32) {
    %c0_i32 = arith.constant 0 : i32
    %c0_i32_0 = arith.constant 0 : i32
    %c0_i32_1 = arith.constant 0 : i32
    return %c0_i32, %c0_i32_0 : i32, i32
  }
  func.func @transform_3(%arg0: i32, %arg1: i32) -> (i32, i32, i32, i32) {
    %c0_i32 = arith.constant 0 : i32
    %c0_i32_0 = arith.constant 0 : i32
    %c0_i32_1 = arith.constant 0 : i32
    return %arg0, %arg1, %c0_i32, %c0_i32_0 : i32, i32, i32, i32
  }
}

module attributes {stable_mosaic.version = 11 : i64} {
  func.func @_maxpool_kernel(%arg0: i32, %arg1: memref<4x9x9x128xf32, #tpu.memory_space<vmem>>, %arg2: memref<1x8x8x128xf32, #tpu.memory_space<vmem>>) attributes {dimension_semantics = [#tpu.dimension_semantics<parallel>], iteration_bounds = array<i64: 2>, scalar_prefetch = 0 : i64, scratch_operands = 0 : i64, tpu.core_type = #tpu.core_type<tc>, window_params = [{transform_indices = @transform_0, window_bounds = array<i64: 4, 9, 9, 128>}, {transform_indices = @transform_1, window_bounds = array<i64: 1, 8, 8, 128>}]} {
    %c0 = arith.constant 0 : index
    %c0_0 = arith.constant 0 : index
    %c0_1 = arith.constant 0 : index
    %c0_2 = arith.constant 0 : index
    %0 = vector.load %arg1[%c0, %c0_0, %c0_1, %c0_2] : memref<4x9x9x128xf32, #tpu.memory_space<vmem>>, vector<1x8x8x128xf32>
    %1 = vector.shape_cast %0 : vector<1x8x8x128xf32> to vector<8x8x128xf32>
    %c1 = arith.constant 1 : index
    %c0_3 = arith.constant 0 : index
    %c0_4 = arith.constant 0 : index
    %c0_5 = arith.constant 0 : index
    %2 = vector.load %arg1[%c1, %c0_3, %c0_4, %c0_5] : memref<4x9x9x128xf32, #tpu.memory_space<vmem>>, vector<1x8x8x128xf32>
    %3 = vector.shape_cast %2 : vector<1x8x8x128xf32> to vector<8x8x128xf32>
    %4 = arith.maximumf %1, %3 : vector<8x8x128xf32>
    %c0_6 = arith.constant 0 : index
    %c0_7 = arith.constant 0 : index
    %c1_8 = arith.constant 1 : index
    %c0_9 = arith.constant 0 : index
    %5 = vector.load %arg1[%c0_6, %c0_7, %c1_8, %c0_9] : memref<4x9x9x128xf32, #tpu.memory_space<vmem>>, vector<1x8x8x128xf32>
    %6 = vector.shape_cast %5 : vector<1x8x8x128xf32> to vector<8x8x128xf32>
    %7 = arith.maximumf %4, %6 : vector<8x8x128xf32>
    %c2 = arith.constant 2 : index
    %c0_10 = arith.constant 0 : index
    %c0_11 = arith.constant 0 : index
    %c0_12 = arith.constant 0 : index
    %8 = vector.load %arg1[%c2, %c0_10, %c0_11, %c0_12] : memref<4x9x9x128xf32, #tpu.memory_space<vmem>>, vector<1x8x8x128xf32>
    %9 = vector.shape_cast %8 : vector<1x8x8x128xf32> to vector<8x8x128xf32>
    %10 = arith.maximumf %7, %9 : vector<8x8x128xf32>
    %c3 = arith.constant 3 : index
    %c0_13 = arith.constant 0 : index
    %c0_14 = arith.constant 0 : index
    %c0_15 = arith.constant 0 : index
    %11 = vector.load %arg1[%c3, %c0_13, %c0_14, %c0_15] : memref<4x9x9x128xf32, #tpu.memory_space<vmem>>, vector<1x8x8x128xf32>
    %12 = vector.shape_cast %11 : vector<1x8x8x128xf32> to vector<8x8x128xf32>
    %13 = arith.maximumf %10, %12 : vector<8x8x128xf32>
    %c2_16 = arith.constant 2 : index
    %c0_17 = arith.constant 0 : index
    %c1_18 = arith.constant 1 : index
    %c0_19 = arith.constant 0 : index
    %14 = vector.load %arg1[%c2_16, %c0_17, %c1_18, %c0_19] : memref<4x9x9x128xf32, #tpu.memory_space<vmem>>, vector<1x8x8x128xf32>
    %15 = vector.shape_cast %14 : vector<1x8x8x128xf32> to vector<8x8x128xf32>
    %16 = arith.maximumf %13, %15 : vector<8x8x128xf32>
    %c0_20 = arith.constant 0 : index
    %c1_21 = arith.constant 1 : index
    %c0_22 = arith.constant 0 : index
    %c0_23 = arith.constant 0 : index
    %17 = vector.load %arg1[%c0_20, %c1_21, %c0_22, %c0_23] : memref<4x9x9x128xf32, #tpu.memory_space<vmem>>, vector<1x8x8x128xf32>
    %18 = vector.shape_cast %17 : vector<1x8x8x128xf32> to vector<8x8x128xf32>
    %19 = arith.maximumf %16, %18 : vector<8x8x128xf32>
    %c1_24 = arith.constant 1 : index
    %c1_25 = arith.constant 1 : index
    %c0_26 = arith.constant 0 : index
    %c0_27 = arith.constant 0 : index
    %20 = vector.load %arg1[%c1_24, %c1_25, %c0_26, %c0_27] : memref<4x9x9x128xf32, #tpu.memory_space<vmem>>, vector<1x8x8x128xf32>
    %21 = vector.shape_cast %20 : vector<1x8x8x128xf32> to vector<8x8x128xf32>
    %22 = arith.maximumf %19, %21 : vector<8x8x128xf32>
    %c0_28 = arith.constant 0 : index
    %c1_29 = arith.constant 1 : index
    %c1_30 = arith.constant 1 : index
    %c0_31 = arith.constant 0 : index
    %23 = vector.load %arg1[%c0_28, %c1_29, %c1_30, %c0_31] : memref<4x9x9x128xf32, #tpu.memory_space<vmem>>, vector<1x8x8x128xf32>
    %24 = vector.shape_cast %23 : vector<1x8x8x128xf32> to vector<8x8x128xf32>
    %25 = arith.maximumf %22, %24 : vector<8x8x128xf32>
    %26 = vector.shape_cast %25 : vector<8x8x128xf32> to vector<1x8x8x128xf32>
    %c0_32 = arith.constant 0 : index
    %c0_33 = arith.constant 0 : index
    %c0_34 = arith.constant 0 : index
    %c0_35 = arith.constant 0 : index
    %27 = vector.load %arg2[%c0_32, %c0_33, %c0_34, %c0_35] : memref<1x8x8x128xf32, #tpu.memory_space<vmem>>, vector<1x8x8x128xf32>
    tpu.vector_store %arg2[%c0_32, %c0_33, %c0_34, %c0_35], %26 {strides = array<i32>} : memref<1x8x8x128xf32, #tpu.memory_space<vmem>>, vector<1x8x8x128xf32>,
    return
  }
  func.func @transform_0(%arg0: i32) -> (i32, i32, i32, i32) {
    %c0_i32 = arith.constant 0 : i32
    %c0_i32_0 = arith.constant 0 : i32
    %c0_i32_1 = arith.constant 0 : i32
    %c0_i32_2 = arith.constant 0 : i32
    return %arg0, %c0_i32, %c0_i32_0, %c0_i32_1 : i32, i32, i32, i32
  }
  func.func @transform_1(%arg0: i32) -> (i32, i32, i32, i32) {
    %c0_i32 = arith.constant 0 : i32
    %c0_i32_0 = arith.constant 0 : i32
    %c0_i32_1 = arith.constant 0 : i32
    %c0_i32_2 = arith.constant 0 : i32
    return %arg0, %c0_i32, %c0_i32_0, %c0_i32_1 : i32, i32, i32, i32
  }
}

module attributes {stable_mosaic.version = 11 : i64} {
  func.func @_conv_row_kernel(%arg0: i32, %arg1: i32, %arg2: memref<4x5x5x128xbf16, #tpu.memory_space<vmem>>, %arg3: memref<9x128x128xbf16, #tpu.memory_space<vmem>>, %arg4: memref<1x128xf32, #tpu.memory_space<vmem>>, %arg5: memref<1x1x4x128xf32, #tpu.memory_space<vmem>>) attributes {dimension_semantics = [#tpu.dimension_semantics<parallel>, #tpu.dimension_semantics<parallel>], iteration_bounds = array<i64: 2, 4>, scalar_prefetch = 0 : i64, scratch_operands = 0 : i64, tpu.core_type = #tpu.core_type<tc>, window_params = [{transform_indices = @transform_0, window_bounds = array<i64: 4, 5, 5, 128>}, {pipeline_mode = #tpu.pipeline_mode<synchronous>, transform_indices = @transform_1, window_bounds = array<i64: 9, 128, 128>}, {pipeline_mode = #tpu.pipeline_mode<synchronous>, transform_indices = @transform_2, window_bounds = array<i64: 1, 128>}, {transform_indices = @transform_3, window_bounds = array<i64: 1, 1, 4, 128>}]} {
    %cst = arith.constant 0.000000e+00 : f32
    %0 = vector.broadcast %cst : f32 to vector<4x128xf32>
    %c0_i32 = arith.constant 0 : i32
    %1 = arith.addi %arg1, %c0_i32 : i32
    %c0 = arith.constant 0 : index
    %2 = arith.index_cast %1 : i32 to index
    %c0_0 = arith.constant 0 : index
    %c0_1 = arith.constant 0 : index
    %3 = vector.load %arg2[%c0, %2, %c0_0, %c0_1] : memref<4x5x5x128xbf16, #tpu.memory_space<vmem>>, vector<1x1x4x128xbf16>
    %4 = vector.shape_cast %3 : vector<1x1x4x128xbf16> to vector<1x4x128xbf16>
    %5 = vector.shape_cast %4 : vector<1x4x128xbf16> to vector<4x128xbf16>
    %c0_2 = arith.constant 0 : index
    %c0_3 = arith.constant 0 : index
    %c0_4 = arith.constant 0 : index
    %6 = vector.load %arg3[%c0_2, %c0_3, %c0_4] : memref<9x128x128xbf16, #tpu.memory_space<vmem>>, vector<1x128x128xbf16>
    %7 = vector.shape_cast %6 : vector<1x128x128xbf16> to vector<128x128xbf16>
    %cst_5 = arith.constant dense<0.000000e+00> : vector<4x128xf32>
    %8 = tpu.matmul %5, %7, %cst_5 {dimension_numbers = #tpu.dot_dimension_numbers<[1], [0], [0], [1], [0, 0, 1, 1], [], []>} : vector<4x128xbf16>, vector<128x128xbf16>, vector<4x128xf32> -> vector<4x128xf32>
    %9 = arith.addf %0, %8 : vector<4x128xf32>
    %c0_i32_6 = arith.constant 0 : i32
    %10 = arith.addi %arg1, %c0_i32_6 : i32
    %c1 = arith.constant 1 : index
    %11 = arith.index_cast %10 : i32 to index
    %c0_7 = arith.constant 0 : index
    %c0_8 = arith.constant 0 : index
    %12 = vector.load %arg2[%c1, %11, %c0_7, %c0_8] : memref<4x5x5x128xbf16, #tpu.memory_space<vmem>>, vector<1x1x4x128xbf16>
    %13 = vector.shape_cast %12 : vector<1x1x4x128xbf16> to vector<1x4x128xbf16>
    %14 = vector.shape_cast %13 : vector<1x4x128xbf16> to vector<4x128xbf16>
    %c1_9 = arith.constant 1 : index
    %c0_10 = arith.constant 0 : index
    %c0_11 = arith.constant 0 : index
    %15 = vector.load %arg3[%c1_9, %c0_10, %c0_11] : memref<9x128x128xbf16, #tpu.memory_space<vmem>>, vector<1x128x128xbf16>
    %16 = vector.shape_cast %15 : vector<1x128x128xbf16> to vector<128x128xbf16>
    %cst_12 = arith.constant dense<0.000000e+00> : vector<4x128xf32>
    %17 = tpu.matmul %14, %16, %cst_12 {dimension_numbers = #tpu.dot_dimension_numbers<[1], [0], [0], [1], [0, 0, 1, 1], [], []>} : vector<4x128xbf16>, vector<128x128xbf16>, vector<4x128xf32> -> vector<4x128xf32>
    %18 = arith.addf %9, %17 : vector<4x128xf32>
    %c0_i32_13 = arith.constant 0 : i32
    %19 = arith.addi %arg1, %c0_i32_13 : i32
    %c0_14 = arith.constant 0 : index
    %20 = arith.index_cast %19 : i32 to index
    %c1_15 = arith.constant 1 : index
    %c0_16 = arith.constant 0 : index
    %21 = vector.load %arg2[%c0_14, %20, %c1_15, %c0_16] : memref<4x5x5x128xbf16, #tpu.memory_space<vmem>>, vector<1x1x4x128xbf16>
    %22 = vector.shape_cast %21 : vector<1x1x4x128xbf16> to vector<1x4x128xbf16>
    %23 = vector.shape_cast %22 : vector<1x4x128xbf16> to vector<4x128xbf16>
    %c2 = arith.constant 2 : index
    %c0_17 = arith.constant 0 : index
    %c0_18 = arith.constant 0 : index
    %24 = vector.load %arg3[%c2, %c0_17, %c0_18] : memref<9x128x128xbf16, #tpu.memory_space<vmem>>, vector<1x128x128xbf16>
    %25 = vector.shape_cast %24 : vector<1x128x128xbf16> to vector<128x128xbf16>
    %cst_19 = arith.constant dense<0.000000e+00> : vector<4x128xf32>
    %26 = tpu.matmul %23, %25, %cst_19 {dimension_numbers = #tpu.dot_dimension_numbers<[1], [0], [0], [1], [0, 0, 1, 1], [], []>} : vector<4x128xbf16>, vector<128x128xbf16>, vector<4x128xf32> -> vector<4x128xf32>
    %27 = arith.addf %18, %26 : vector<4x128xf32>
    %c0_i32_20 = arith.constant 0 : i32
    %28 = arith.addi %arg1, %c0_i32_20 : i32
    %c2_21 = arith.constant 2 : index
    %29 = arith.index_cast %28 : i32 to index
    %c0_22 = arith.constant 0 : index
    %c0_23 = arith.constant 0 : index
    %30 = vector.load %arg2[%c2_21, %29, %c0_22, %c0_23] : memref<4x5x5x128xbf16, #tpu.memory_space<vmem>>, vector<1x1x4x128xbf16>
    %31 = vector.shape_cast %30 : vector<1x1x4x128xbf16> to vector<1x4x128xbf16>
    %32 = vector.shape_cast %31 : vector<1x4x128xbf16> to vector<4x128xbf16>
    %c3 = arith.constant 3 : index
    %c0_24 = arith.constant 0 : index
    %c0_25 = arith.constant 0 : index
    %33 = vector.load %arg3[%c3, %c0_24, %c0_25] : memref<9x128x128xbf16, #tpu.memory_space<vmem>>, vector<1x128x128xbf16>
    %34 = vector.shape_cast %33 : vector<1x128x128xbf16> to vector<128x128xbf16>
    %cst_26 = arith.constant dense<0.000000e+00> : vector<4x128xf32>
    %35 = tpu.matmul %32, %34, %cst_26 {dimension_numbers = #tpu.dot_dimension_numbers<[1], [0], [0], [1], [0, 0, 1, 1], [], []>} : vector<4x128xbf16>, vector<128x128xbf16>, vector<4x128xf32> -> vector<4x128xf32>
    %36 = arith.addf %27, %35 : vector<4x128xf32>
    %c0_i32_27 = arith.constant 0 : i32
    %37 = arith.addi %arg1, %c0_i32_27 : i32
    %c3_28 = arith.constant 3 : index
    %38 = arith.index_cast %37 : i32 to index
    %c0_29 = arith.constant 0 : index
    %c0_30 = arith.constant 0 : index
    %39 = vector.load %arg2[%c3_28, %38, %c0_29, %c0_30] : memref<4x5x5x128xbf16, #tpu.memory_space<vmem>>, vector<1x1x4x128xbf16>
    %40 = vector.shape_cast %39 : vector<1x1x4x128xbf16> to vector<1x4x128xbf16>
    %41 = vector.shape_cast %40 : vector<1x4x128xbf16> to vector<4x128xbf16>
    %c4 = arith.constant 4 : index
    %c0_31 = arith.constant 0 : index
    %c0_32 = arith.constant 0 : index
    %42 = vector.load %arg3[%c4, %c0_31, %c0_32] : memref<9x128x128xbf16, #tpu.memory_space<vmem>>, vector<1x128x128xbf16>
    %43 = vector.shape_cast %42 : vector<1x128x128xbf16> to vector<128x128xbf16>
    %cst_33 = arith.constant dense<0.000000e+00> : vector<4x128xf32>
    %44 = tpu.matmul %41, %43, %cst_33 {dimension_numbers = #tpu.dot_dimension_numbers<[1], [0], [0], [1], [0, 0, 1, 1], [], []>} : vector<4x128xbf16>, vector<128x128xbf16>, vector<4x128xf32> -> vector<4x128xf32>
    %45 = arith.addf %36, %44 : vector<4x128xf32>
    %c0_i32_34 = arith.constant 0 : i32
    %46 = arith.addi %arg1, %c0_i32_34 : i32
    %c2_35 = arith.constant 2 : index
    %47 = arith.index_cast %46 : i32 to index
    %c1_36 = arith.constant 1 : index
    %c0_37 = arith.constant 0 : index
    %48 = vector.load %arg2[%c2_35, %47, %c1_36, %c0_37] : memref<4x5x5x128xbf16, #tpu.memory_space<vmem>>, vector<1x1x4x128xbf16>
    %49 = vector.shape_cast %48 : vector<1x1x4x128xbf16> to vector<1x4x128xbf16>
    %50 = vector.shape_cast %49 : vector<1x4x128xbf16> to vector<4x128xbf16>
    %c5 = arith.constant 5 : index
    %c0_38 = arith.constant 0 : index
    %c0_39 = arith.constant 0 : index
    %51 = vector.load %arg3[%c5, %c0_38, %c0_39] : memref<9x128x128xbf16, #tpu.memory_space<vmem>>, vector<1x128x128xbf16>
    %52 = vector.shape_cast %51 : vector<1x128x128xbf16> to vector<128x128xbf16>
    %cst_40 = arith.constant dense<0.000000e+00> : vector<4x128xf32>
    %53 = tpu.matmul %50, %52, %cst_40 {dimension_numbers = #tpu.dot_dimension_numbers<[1], [0], [0], [1], [0, 0, 1, 1], [], []>} : vector<4x128xbf16>, vector<128x128xbf16>, vector<4x128xf32> -> vector<4x128xf32>
    %54 = arith.addf %45, %53 : vector<4x128xf32>
    %c1_i32 = arith.constant 1 : i32
    %55 = arith.addi %arg1, %c1_i32 : i32
    %c0_41 = arith.constant 0 : index
    %56 = arith.index_cast %55 : i32 to index
    %c0_42 = arith.constant 0 : index
    %c0_43 = arith.constant 0 : index
    %57 = vector.load %arg2[%c0_41, %56, %c0_42, %c0_43] : memref<4x5x5x128xbf16, #tpu.memory_space<vmem>>, vector<1x1x4x128xbf16>
    %58 = vector.shape_cast %57 : vector<1x1x4x128xbf16> to vector<1x4x128xbf16>
    %59 = vector.shape_cast %58 : vector<1x4x128xbf16> to vector<4x128xbf16>
    %c6 = arith.constant 6 : index
    %c0_44 = arith.constant 0 : index
    %c0_45 = arith.constant 0 : index
    %60 = vector.load %arg3[%c6, %c0_44, %c0_45] : memref<9x128x128xbf16, #tpu.memory_space<vmem>>, vector<1x128x128xbf16>
    %61 = vector.shape_cast %60 : vector<1x128x128xbf16> to vector<128x128xbf16>
    %cst_46 = arith.constant dense<0.000000e+00> : vector<4x128xf32>
    %62 = tpu.matmul %59, %61, %cst_46 {dimension_numbers = #tpu.dot_dimension_numbers<[1], [0], [0], [1], [0, 0, 1, 1], [], []>} : vector<4x128xbf16>, vector<128x128xbf16>, vector<4x128xf32> -> vector<4x128xf32>
    %63 = arith.addf %54, %62 : vector<4x128xf32>
    %c1_i32_47 = arith.constant 1 : i32
    %64 = arith.addi %arg1, %c1_i32_47 : i32
    %c1_48 = arith.constant 1 : index
    %65 = arith.index_cast %64 : i32 to index
    %c0_49 = arith.constant 0 : index
    %c0_50 = arith.constant 0 : index
    %66 = vector.load %arg2[%c1_48, %65, %c0_49, %c0_50] : memref<4x5x5x128xbf16, #tpu.memory_space<vmem>>, vector<1x1x4x128xbf16>
    %67 = vector.shape_cast %66 : vector<1x1x4x128xbf16> to vector<1x4x128xbf16>
    %68 = vector.shape_cast %67 : vector<1x4x128xbf16> to vector<4x128xbf16>
    %c7 = arith.constant 7 : index
    %c0_51 = arith.constant 0 : index
    %c0_52 = arith.constant 0 : index
    %69 = vector.load %arg3[%c7, %c0_51, %c0_52] : memref<9x128x128xbf16, #tpu.memory_space<vmem>>, vector<1x128x128xbf16>
    %70 = vector.shape_cast %69 : vector<1x128x128xbf16> to vector<128x128xbf16>
    %cst_53 = arith.constant dense<0.000000e+00> : vector<4x128xf32>
    %71 = tpu.matmul %68, %70, %cst_53 {dimension_numbers = #tpu.dot_dimension_numbers<[1], [0], [0], [1], [0, 0, 1, 1], [], []>} : vector<4x128xbf16>, vector<128x128xbf16>, vector<4x128xf32> -> vector<4x128xf32>
    %72 = arith.addf %63, %71 : vector<4x128xf32>
    %c1_i32_54 = arith.constant 1 : i32
    %73 = arith.addi %arg1, %c1_i32_54 : i32
    %c0_55 = arith.constant 0 : index
    %74 = arith.index_cast %73 : i32 to index
    %c1_56 = arith.constant 1 : index
    %c0_57 = arith.constant 0 : index
    %75 = vector.load %arg2[%c0_55, %74, %c1_56, %c0_57] : memref<4x5x5x128xbf16, #tpu.memory_space<vmem>>, vector<1x1x4x128xbf16>
    %76 = vector.shape_cast %75 : vector<1x1x4x128xbf16> to vector<1x4x128xbf16>
    %77 = vector.shape_cast %76 : vector<1x4x128xbf16> to vector<4x128xbf16>
    %c8 = arith.constant 8 : index
    %c0_58 = arith.constant 0 : index
    %c0_59 = arith.constant 0 : index
    %78 = vector.load %arg3[%c8, %c0_58, %c0_59] : memref<9x128x128xbf16, #tpu.memory_space<vmem>>, vector<1x128x128xbf16>
    %79 = vector.shape_cast %78 : vector<1x128x128xbf16> to vector<128x128xbf16>
    %cst_60 = arith.constant dense<0.000000e+00> : vector<4x128xf32>
    %80 = tpu.matmul %77, %79, %cst_60 {dimension_numbers = #tpu.dot_dimension_numbers<[1], [0], [0], [1], [0, 0, 1, 1], [], []>} : vector<4x128xbf16>, vector<128x128xbf16>, vector<4x128xf32> -> vector<4x128xf32>
    %81 = arith.addf %72, %80 : vector<4x128xf32>
    %c0_61 = arith.constant 0 : index
    %c0_62 = arith.constant 0 : index
    %82 = vector.load %arg4[%c0_61, %c0_62] : memref<1x128xf32, #tpu.memory_space<vmem>>, vector<1x128xf32>
    %83 = vector.broadcast %82 : vector<1x128xf32> to vector<4x128xf32>
    %84 = arith.addf %81, %83 : vector<4x128xf32>
    %cst_63 = arith.constant 0.000000e+00 : f32
    %85 = vector.broadcast %cst_63 : f32 to vector<4x128xf32>
    %86 = arith.maximumf %84, %85 : vector<4x128xf32>
    %87 = vector.shape_cast %86 : vector<4x128xf32> to vector<1x1x4x128xf32>
    %c0_64 = arith.constant 0 : index
    %c0_65 = arith.constant 0 : index
    %c0_66 = arith.constant 0 : index
    %c0_67 = arith.constant 0 : index
    %88 = vector.load %arg5[%c0_64, %c0_65, %c0_66, %c0_67] : memref<1x1x4x128xf32, #tpu.memory_space<vmem>>, vector<1x1x4x128xf32>
    tpu.vector_store %arg5[%c0_64, %c0_65, %c0_66, %c0_67], %87 {strides = array<i32>} : memref<1x1x4x128xf32, #tpu.memory_space<vmem>>, vector<1x1x4x128xf32>,
    return
  }
  func.func @transform_0(%arg0: i32, %arg1: i32) -> (i32, i32, i32, i32) {
    %c0_i32 = arith.constant 0 : i32
    %c0_i32_0 = arith.constant 0 : i32
    %c0_i32_1 = arith.constant 0 : i32
    %c0_i32_2 = arith.constant 0 : i32
    return %arg0, %c0_i32, %c0_i32_0, %c0_i32_1 : i32, i32, i32, i32
  }
  func.func @transform_1(%arg0: i32, %arg1: i32) -> (i32, i32, i32) {
    %c0_i32 = arith.constant 0 : i32
    %c0_i32_0 = arith.constant 0 : i32
    %c0_i32_1 = arith.constant 0 : i32
    %c0_i32_2 = arith.constant 0 : i32
    return %c0_i32, %c0_i32_0, %c0_i32_1 : i32, i32, i32
  }
  func.func @transform_2(%arg0: i32, %arg1: i32) -> (i32, i32) {
    %c0_i32 = arith.constant 0 : i32
    %c0_i32_0 = arith.constant 0 : i32
    %c0_i32_1 = arith.constant 0 : i32
    return %c0_i32, %c0_i32_0 : i32, i32
  }
  func.func @transform_3(%arg0: i32, %arg1: i32) -> (i32, i32, i32, i32) {
    %c0_i32 = arith.constant 0 : i32
    %c0_i32_0 = arith.constant 0 : i32
    %c0_i32_1 = arith.constant 0 : i32
    return %arg0, %arg1, %c0_i32, %c0_i32_0 : i32, i32, i32, i32
  }
}

module attributes {stable_mosaic.version = 11 : i64} {
  func.func @_conv_row_kernel(%arg0: i32, %arg1: i32, %arg2: memref<4x3x3x128xbf16, #tpu.memory_space<vmem>>, %arg3: memref<9x128x128xbf16, #tpu.memory_space<vmem>>, %arg4: memref<1x128xf32, #tpu.memory_space<vmem>>, %arg5: memref<1x1x2x128xf32, #tpu.memory_space<vmem>>) attributes {dimension_semantics = [#tpu.dimension_semantics<parallel>, #tpu.dimension_semantics<parallel>], iteration_bounds = array<i64: 2, 2>, scalar_prefetch = 0 : i64, scratch_operands = 0 : i64, tpu.core_type = #tpu.core_type<tc>, window_params = [{transform_indices = @transform_0, window_bounds = array<i64: 4, 3, 3, 128>}, {pipeline_mode = #tpu.pipeline_mode<synchronous>, transform_indices = @transform_1, window_bounds = array<i64: 9, 128, 128>}, {pipeline_mode = #tpu.pipeline_mode<synchronous>, transform_indices = @transform_2, window_bounds = array<i64: 1, 128>}, {transform_indices = @transform_3, window_bounds = array<i64: 1, 1, 2, 128>}]} {
    %cst = arith.constant 0.000000e+00 : f32
    %0 = vector.broadcast %cst : f32 to vector<2x128xf32>
    %c0_i32 = arith.constant 0 : i32
    %1 = arith.addi %arg1, %c0_i32 : i32
    %c0 = arith.constant 0 : index
    %2 = arith.index_cast %1 : i32 to index
    %c0_0 = arith.constant 0 : index
    %c0_1 = arith.constant 0 : index
    %3 = vector.load %arg2[%c0, %2, %c0_0, %c0_1] : memref<4x3x3x128xbf16, #tpu.memory_space<vmem>>, vector<1x1x2x128xbf16>
    %4 = vector.shape_cast %3 : vector<1x1x2x128xbf16> to vector<1x2x128xbf16>
    %5 = vector.shape_cast %4 : vector<1x2x128xbf16> to vector<2x128xbf16>
    %c0_2 = arith.constant 0 : index
    %c0_3 = arith.constant 0 : index
    %c0_4 = arith.constant 0 : index
    %6 = vector.load %arg3[%c0_2, %c0_3, %c0_4] : memref<9x128x128xbf16, #tpu.memory_space<vmem>>, vector<1x128x128xbf16>
    %7 = vector.shape_cast %6 : vector<1x128x128xbf16> to vector<128x128xbf16>
    %cst_5 = arith.constant dense<0.000000e+00> : vector<2x128xf32>
    %8 = tpu.matmul %5, %7, %cst_5 {dimension_numbers = #tpu.dot_dimension_numbers<[1], [0], [0], [1], [0, 0, 1, 1], [], []>} : vector<2x128xbf16>, vector<128x128xbf16>, vector<2x128xf32> -> vector<2x128xf32>
    %9 = arith.addf %0, %8 : vector<2x128xf32>
    %c0_i32_6 = arith.constant 0 : i32
    %10 = arith.addi %arg1, %c0_i32_6 : i32
    %c1 = arith.constant 1 : index
    %11 = arith.index_cast %10 : i32 to index
    %c0_7 = arith.constant 0 : index
    %c0_8 = arith.constant 0 : index
    %12 = vector.load %arg2[%c1, %11, %c0_7, %c0_8] : memref<4x3x3x128xbf16, #tpu.memory_space<vmem>>, vector<1x1x2x128xbf16>
    %13 = vector.shape_cast %12 : vector<1x1x2x128xbf16> to vector<1x2x128xbf16>
    %14 = vector.shape_cast %13 : vector<1x2x128xbf16> to vector<2x128xbf16>
    %c1_9 = arith.constant 1 : index
    %c0_10 = arith.constant 0 : index
    %c0_11 = arith.constant 0 : index
    %15 = vector.load %arg3[%c1_9, %c0_10, %c0_11] : memref<9x128x128xbf16, #tpu.memory_space<vmem>>, vector<1x128x128xbf16>
    %16 = vector.shape_cast %15 : vector<1x128x128xbf16> to vector<128x128xbf16>
    %cst_12 = arith.constant dense<0.000000e+00> : vector<2x128xf32>
    %17 = tpu.matmul %14, %16, %cst_12 {dimension_numbers = #tpu.dot_dimension_numbers<[1], [0], [0], [1], [0, 0, 1, 1], [], []>} : vector<2x128xbf16>, vector<128x128xbf16>, vector<2x128xf32> -> vector<2x128xf32>
    %18 = arith.addf %9, %17 : vector<2x128xf32>
    %c0_i32_13 = arith.constant 0 : i32
    %19 = arith.addi %arg1, %c0_i32_13 : i32
    %c0_14 = arith.constant 0 : index
    %20 = arith.index_cast %19 : i32 to index
    %c1_15 = arith.constant 1 : index
    %c0_16 = arith.constant 0 : index
    %21 = vector.load %arg2[%c0_14, %20, %c1_15, %c0_16] : memref<4x3x3x128xbf16, #tpu.memory_space<vmem>>, vector<1x1x2x128xbf16>
    %22 = vector.shape_cast %21 : vector<1x1x2x128xbf16> to vector<1x2x128xbf16>
    %23 = vector.shape_cast %22 : vector<1x2x128xbf16> to vector<2x128xbf16>
    %c2 = arith.constant 2 : index
    %c0_17 = arith.constant 0 : index
    %c0_18 = arith.constant 0 : index
    %24 = vector.load %arg3[%c2, %c0_17, %c0_18] : memref<9x128x128xbf16, #tpu.memory_space<vmem>>, vector<1x128x128xbf16>
    %25 = vector.shape_cast %24 : vector<1x128x128xbf16> to vector<128x128xbf16>
    %cst_19 = arith.constant dense<0.000000e+00> : vector<2x128xf32>
    %26 = tpu.matmul %23, %25, %cst_19 {dimension_numbers = #tpu.dot_dimension_numbers<[1], [0], [0], [1], [0, 0, 1, 1], [], []>} : vector<2x128xbf16>, vector<128x128xbf16>, vector<2x128xf32> -> vector<2x128xf32>
    %27 = arith.addf %18, %26 : vector<2x128xf32>
    %c0_i32_20 = arith.constant 0 : i32
    %28 = arith.addi %arg1, %c0_i32_20 : i32
    %c2_21 = arith.constant 2 : index
    %29 = arith.index_cast %28 : i32 to index
    %c0_22 = arith.constant 0 : index
    %c0_23 = arith.constant 0 : index
    %30 = vector.load %arg2[%c2_21, %29, %c0_22, %c0_23] : memref<4x3x3x128xbf16, #tpu.memory_space<vmem>>, vector<1x1x2x128xbf16>
    %31 = vector.shape_cast %30 : vector<1x1x2x128xbf16> to vector<1x2x128xbf16>
    %32 = vector.shape_cast %31 : vector<1x2x128xbf16> to vector<2x128xbf16>
    %c3 = arith.constant 3 : index
    %c0_24 = arith.constant 0 : index
    %c0_25 = arith.constant 0 : index
    %33 = vector.load %arg3[%c3, %c0_24, %c0_25] : memref<9x128x128xbf16, #tpu.memory_space<vmem>>, vector<1x128x128xbf16>
    %34 = vector.shape_cast %33 : vector<1x128x128xbf16> to vector<128x128xbf16>
    %cst_26 = arith.constant dense<0.000000e+00> : vector<2x128xf32>
    %35 = tpu.matmul %32, %34, %cst_26 {dimension_numbers = #tpu.dot_dimension_numbers<[1], [0], [0], [1], [0, 0, 1, 1], [], []>} : vector<2x128xbf16>, vector<128x128xbf16>, vector<2x128xf32> -> vector<2x128xf32>
    %36 = arith.addf %27, %35 : vector<2x128xf32>
    %c0_i32_27 = arith.constant 0 : i32
    %37 = arith.addi %arg1, %c0_i32_27 : i32
    %c3_28 = arith.constant 3 : index
    %38 = arith.index_cast %37 : i32 to index
    %c0_29 = arith.constant 0 : index
    %c0_30 = arith.constant 0 : index
    %39 = vector.load %arg2[%c3_28, %38, %c0_29, %c0_30] : memref<4x3x3x128xbf16, #tpu.memory_space<vmem>>, vector<1x1x2x128xbf16>
    %40 = vector.shape_cast %39 : vector<1x1x2x128xbf16> to vector<1x2x128xbf16>
    %41 = vector.shape_cast %40 : vector<1x2x128xbf16> to vector<2x128xbf16>
    %c4 = arith.constant 4 : index
    %c0_31 = arith.constant 0 : index
    %c0_32 = arith.constant 0 : index
    %42 = vector.load %arg3[%c4, %c0_31, %c0_32] : memref<9x128x128xbf16, #tpu.memory_space<vmem>>, vector<1x128x128xbf16>
    %43 = vector.shape_cast %42 : vector<1x128x128xbf16> to vector<128x128xbf16>
    %cst_33 = arith.constant dense<0.000000e+00> : vector<2x128xf32>
    %44 = tpu.matmul %41, %43, %cst_33 {dimension_numbers = #tpu.dot_dimension_numbers<[1], [0], [0], [1], [0, 0, 1, 1], [], []>} : vector<2x128xbf16>, vector<128x128xbf16>, vector<2x128xf32> -> vector<2x128xf32>
    %45 = arith.addf %36, %44 : vector<2x128xf32>
    %c0_i32_34 = arith.constant 0 : i32
    %46 = arith.addi %arg1, %c0_i32_34 : i32
    %c2_35 = arith.constant 2 : index
    %47 = arith.index_cast %46 : i32 to index
    %c1_36 = arith.constant 1 : index
    %c0_37 = arith.constant 0 : index
    %48 = vector.load %arg2[%c2_35, %47, %c1_36, %c0_37] : memref<4x3x3x128xbf16, #tpu.memory_space<vmem>>, vector<1x1x2x128xbf16>
    %49 = vector.shape_cast %48 : vector<1x1x2x128xbf16> to vector<1x2x128xbf16>
    %50 = vector.shape_cast %49 : vector<1x2x128xbf16> to vector<2x128xbf16>
    %c5 = arith.constant 5 : index
    %c0_38 = arith.constant 0 : index
    %c0_39 = arith.constant 0 : index
    %51 = vector.load %arg3[%c5, %c0_38, %c0_39] : memref<9x128x128xbf16, #tpu.memory_space<vmem>>, vector<1x128x128xbf16>
    %52 = vector.shape_cast %51 : vector<1x128x128xbf16> to vector<128x128xbf16>
    %cst_40 = arith.constant dense<0.000000e+00> : vector<2x128xf32>
    %53 = tpu.matmul %50, %52, %cst_40 {dimension_numbers = #tpu.dot_dimension_numbers<[1], [0], [0], [1], [0, 0, 1, 1], [], []>} : vector<2x128xbf16>, vector<128x128xbf16>, vector<2x128xf32> -> vector<2x128xf32>
    %54 = arith.addf %45, %53 : vector<2x128xf32>
    %c1_i32 = arith.constant 1 : i32
    %55 = arith.addi %arg1, %c1_i32 : i32
    %c0_41 = arith.constant 0 : index
    %56 = arith.index_cast %55 : i32 to index
    %c0_42 = arith.constant 0 : index
    %c0_43 = arith.constant 0 : index
    %57 = vector.load %arg2[%c0_41, %56, %c0_42, %c0_43] : memref<4x3x3x128xbf16, #tpu.memory_space<vmem>>, vector<1x1x2x128xbf16>
    %58 = vector.shape_cast %57 : vector<1x1x2x128xbf16> to vector<1x2x128xbf16>
    %59 = vector.shape_cast %58 : vector<1x2x128xbf16> to vector<2x128xbf16>
    %c6 = arith.constant 6 : index
    %c0_44 = arith.constant 0 : index
    %c0_45 = arith.constant 0 : index
    %60 = vector.load %arg3[%c6, %c0_44, %c0_45] : memref<9x128x128xbf16, #tpu.memory_space<vmem>>, vector<1x128x128xbf16>
    %61 = vector.shape_cast %60 : vector<1x128x128xbf16> to vector<128x128xbf16>
    %cst_46 = arith.constant dense<0.000000e+00> : vector<2x128xf32>
    %62 = tpu.matmul %59, %61, %cst_46 {dimension_numbers = #tpu.dot_dimension_numbers<[1], [0], [0], [1], [0, 0, 1, 1], [], []>} : vector<2x128xbf16>, vector<128x128xbf16>, vector<2x128xf32> -> vector<2x128xf32>
    %63 = arith.addf %54, %62 : vector<2x128xf32>
    %c1_i32_47 = arith.constant 1 : i32
    %64 = arith.addi %arg1, %c1_i32_47 : i32
    %c1_48 = arith.constant 1 : index
    %65 = arith.index_cast %64 : i32 to index
    %c0_49 = arith.constant 0 : index
    %c0_50 = arith.constant 0 : index
    %66 = vector.load %arg2[%c1_48, %65, %c0_49, %c0_50] : memref<4x3x3x128xbf16, #tpu.memory_space<vmem>>, vector<1x1x2x128xbf16>
    %67 = vector.shape_cast %66 : vector<1x1x2x128xbf16> to vector<1x2x128xbf16>
    %68 = vector.shape_cast %67 : vector<1x2x128xbf16> to vector<2x128xbf16>
    %c7 = arith.constant 7 : index
    %c0_51 = arith.constant 0 : index
    %c0_52 = arith.constant 0 : index
    %69 = vector.load %arg3[%c7, %c0_51, %c0_52] : memref<9x128x128xbf16, #tpu.memory_space<vmem>>, vector<1x128x128xbf16>
    %70 = vector.shape_cast %69 : vector<1x128x128xbf16> to vector<128x128xbf16>
    %cst_53 = arith.constant dense<0.000000e+00> : vector<2x128xf32>
    %71 = tpu.matmul %68, %70, %cst_53 {dimension_numbers = #tpu.dot_dimension_numbers<[1], [0], [0], [1], [0, 0, 1, 1], [], []>} : vector<2x128xbf16>, vector<128x128xbf16>, vector<2x128xf32> -> vector<2x128xf32>
    %72 = arith.addf %63, %71 : vector<2x128xf32>
    %c1_i32_54 = arith.constant 1 : i32
    %73 = arith.addi %arg1, %c1_i32_54 : i32
    %c0_55 = arith.constant 0 : index
    %74 = arith.index_cast %73 : i32 to index
    %c1_56 = arith.constant 1 : index
    %c0_57 = arith.constant 0 : index
    %75 = vector.load %arg2[%c0_55, %74, %c1_56, %c0_57] : memref<4x3x3x128xbf16, #tpu.memory_space<vmem>>, vector<1x1x2x128xbf16>
    %76 = vector.shape_cast %75 : vector<1x1x2x128xbf16> to vector<1x2x128xbf16>
    %77 = vector.shape_cast %76 : vector<1x2x128xbf16> to vector<2x128xbf16>
    %c8 = arith.constant 8 : index
    %c0_58 = arith.constant 0 : index
    %c0_59 = arith.constant 0 : index
    %78 = vector.load %arg3[%c8, %c0_58, %c0_59] : memref<9x128x128xbf16, #tpu.memory_space<vmem>>, vector<1x128x128xbf16>
    %79 = vector.shape_cast %78 : vector<1x128x128xbf16> to vector<128x128xbf16>
    %cst_60 = arith.constant dense<0.000000e+00> : vector<2x128xf32>
    %80 = tpu.matmul %77, %79, %cst_60 {dimension_numbers = #tpu.dot_dimension_numbers<[1], [0], [0], [1], [0, 0, 1, 1], [], []>} : vector<2x128xbf16>, vector<128x128xbf16>, vector<2x128xf32> -> vector<2x128xf32>
    %81 = arith.addf %72, %80 : vector<2x128xf32>
    %c0_61 = arith.constant 0 : index
    %c0_62 = arith.constant 0 : index
    %82 = vector.load %arg4[%c0_61, %c0_62] : memref<1x128xf32, #tpu.memory_space<vmem>>, vector<1x128xf32>
    %83 = vector.broadcast %82 : vector<1x128xf32> to vector<2x128xf32>
    %84 = arith.addf %81, %83 : vector<2x128xf32>
    %cst_63 = arith.constant 0.000000e+00 : f32
    %85 = vector.broadcast %cst_63 : f32 to vector<2x128xf32>
    %86 = arith.maximumf %84, %85 : vector<2x128xf32>
    %87 = vector.shape_cast %86 : vector<2x128xf32> to vector<1x1x2x128xf32>
    %c0_64 = arith.constant 0 : index
    %c0_65 = arith.constant 0 : index
    %c0_66 = arith.constant 0 : index
    %c0_67 = arith.constant 0 : index
    %88 = vector.load %arg5[%c0_64, %c0_65, %c0_66, %c0_67] : memref<1x1x2x128xf32, #tpu.memory_space<vmem>>, vector<1x1x2x128xf32>
    tpu.vector_store %arg5[%c0_64, %c0_65, %c0_66, %c0_67], %87 {strides = array<i32>} : memref<1x1x2x128xf32, #tpu.memory_space<vmem>>, vector<1x1x2x128xf32>,
    return
  }
  func.func @transform_0(%arg0: i32, %arg1: i32) -> (i32, i32, i32, i32) {
    %c0_i32 = arith.constant 0 : i32
    %c0_i32_0 = arith.constant 0 : i32
    %c0_i32_1 = arith.constant 0 : i32
    %c0_i32_2 = arith.constant 0 : i32
    return %arg0, %c0_i32, %c0_i32_0, %c0_i32_1 : i32, i32, i32, i32
  }
  func.func @transform_1(%arg0: i32, %arg1: i32) -> (i32, i32, i32) {
    %c0_i32 = arith.constant 0 : i32
    %c0_i32_0 = arith.constant 0 : i32
    %c0_i32_1 = arith.constant 0 : i32
    %c0_i32_2 = arith.constant 0 : i32
    return %c0_i32, %c0_i32_0, %c0_i32_1 : i32, i32, i32
  }
  func.func @transform_2(%arg0: i32, %arg1: i32) -> (i32, i32) {
    %c0_i32 = arith.constant 0 : i32
    %c0_i32_0 = arith.constant 0 : i32
    %c0_i32_1 = arith.constant 0 : i32
    return %c0_i32, %c0_i32_0 : i32, i32
  }
  func.func @transform_3(%arg0: i32, %arg1: i32) -> (i32, i32, i32, i32) {
    %c0_i32 = arith.constant 0 : i32
    %c0_i32_0 = arith.constant 0 : i32
    %c0_i32_1 = arith.constant 0 : i32
    return %arg0, %arg1, %c0_i32, %c0_i32_0 : i32, i32, i32, i32
  }
}

</mosaic_0001>

<bundles_post_ra>
// kernel: msd_init_layer.5
= control target key start
LH: loop header
LB: loop body
LE: loop exit
PB: predicated region body
PF: predicated region fallthrough
CT: control target
= control target key end

     0   :  { %s421_s6 = smov 0   ;;  %s547_s0 = inlined_call_operand.vmem [shape: f32[8,9,9,128], index: 0, kind: input, shape index: {}]   ;;  %s548_s1 = inlined_call_operand.vmem [shape: f32[2,8,8,128], index: 1, kind: output, shape index: {}]  }
   0x1 LB: > { %s427_s7 = sadd.s32 4294967295, %s409_s6   ;;  %p330_p0 = scmp.ge.s32.totalorder %s409_s6, 1  ;;  %s409_s6 = sphi %s421_s6, %s11_s6  }
   0x2   : > { %p89_p1 = scmp.lt.s32.totalorder %s409_s6, 3 }
   0x4   : > { %p90_p2 = pnand %p330_p0, %p89_p1 }
   0x5   : > { %s331_s8 = sshll.u32 (!%p90_p2), %s427_s7, 2  ;;  %p117_p4 = scmp.lt.s32.totalorder (!%p90_p2), %s427_s7, 1 }
   0x6   : > { %93 = sbr.rel (%p90_p2) target bundleno = 52 (0x34), region = 24  ;;  %p111_p3 = scmp.lt.s32.totalorder (!%p90_p2), %s331_s8, 7 }
   0xb   : > { %s550_s8 = smov (!%p111_p3, %s331_s8), 7  ;;  %s552_s7 = smov (!%p117_p4, %s427_s7), 1 }
   0xc   : > { %s394_s9 = smul.u32 144, %s550_s8  ;;  %s393_s13 = sshll.u32 %s552_s7, 6 }
   0xd   : > { %s511_s16 = scalar_lea.vmem %s548_s1, %s393_s13 }
   0xe   : > { %s435_s12 = scalar_lea.vmem %s547_s0, %s394_s9 }
   0xf   : > { %v122_v0 = vld [vmem:[%s435_s12] sm:$0xff]  ;;  %v335_v1 = vld [vmem:[%s435_s12 + $0x90] sm:$0xff] }
  0x10   : > { %v147_v2 = vld [vmem:[%s435_s12 + $0x1] sm:$0xff]  ;;  %v139_v3 = vmax.f32 %v122_v0, %v335_v1  ;;  %v367_v5 = vld [vmem:[%s435_s12 + $0x10] sm:$0xff] }
  0x11   : > { %v343_v4 = vld [vmem:[%s435_s12 + $0x120] sm:$0xff]  ;;  %v446_v7 = vld [vmem:[%s435_s12 + $0x11] sm:$0xff] }
  0x12   : > { %v443_v6 = vld [vmem:[%s435_s12 + $0xa0] sm:$0xff]  ;;  %v155_v8 = vmax.f32 %v139_v3, %v147_v2  ;;  %v351_v9 = vld [vmem:[%s435_s12 + $0x1b0] sm:$0xff] }
  0x13   : > { %v140_v10 = vmax.f32 %v367_v5, %v443_v6  ;;  %v344_v11 = vld [vmem:[%s435_s12 + $0x130] sm:$0xff]  ;;  %v368_v12 = vld [vmem:[%s435_s12 + $0x20] sm:$0xff] }
  0x14   : > { %v454_v13 = vld [vmem:[%s435_s12 + $0xb0] sm:$0xff]  ;;  %v457_v14 = vld [vmem:[%s435_s12 + $0x21] sm:$0xff]  ;;  %v172_v15 = vmax.f32 %v155_v8, %v343_v4 }
  0x15   : > { %v359_v16 = vld [vmem:[%s435_s12 + $0x121] sm:$0xff]  ;;  %v156_v17 = vmax.f32 %v140_v10, %v446_v7  ;;  %v141_v19 = vmax.f32 %v368_v12, %v454_v13  ;;  %v369_v21 = vld [vmem:[%s435_s12 + $0x30] sm:$0xff] }
  0x16   : > { %v352_v18 = vld [vmem:[%s435_s12 + $0x1c0] sm:$0xff]  ;;  %v469_v23 = vld [vmem:[%s435_s12 + $0x31] sm:$0xff]  ;;  %v189_v24 = vmax.f32 %v172_v15, %v351_v9 }
  0x17   : > { %v345_v20 = vld [vmem:[%s435_s12 + $0x140] sm:$0xff]  ;;  %v173_v25 = vmax.f32 %v156_v17, %v344_v11  ;;  %v360_v26 = vld [vmem:[%s435_s12 + $0x131] sm:$0xff]  ;;  %v157_v27 = vmax.f32 %v141_v19, %v457_v14 }
  0x18   : > { %v466_v22 = vld [vmem:[%s435_s12 + $0xc0] sm:$0xff]  ;;  %v353_v28 = vld [vmem:[%s435_s12 + $0x1d0] sm:$0xff]  ;;  %v205_v33 = vmax.f32 %v189_v24, %v359_v16 }
  0x19   : > { %v142_v29 = vmax.f32 %v369_v21, %v466_v22  ;;  %v346_v30 = vld [vmem:[%s435_s12 + $0x150] sm:$0xff]  ;;  %v370_v31 = vld [vmem:[%s435_s12 + $0x40] sm:$0xff]  ;;  %v190_v34 = vmax.f32 %v173_v25, %v352_v18  ;;  %v174_v35 = vmax.f32 %v157_v27, %v345_v20 }
  0x1a   : > { %v483_v32 = vld [vmem:[%s435_s12 + $0xd0] sm:$0xff]  ;;  %v361_v36 = vld [vmem:[%s435_s12 + $0x141] sm:$0xff]  ;;  %v222_v43 = vmax.f32 %v205_v33, %v367_v5 }
  0x1b   : > { %v158_v37 = vmax.f32 %v142_v29, %v469_v23  ;;  %v488_v38 = vld [vmem:[%s435_s12 + $0x41] sm:$0xff]  ;;  %v143_v40 = vmax.f32 %v370_v31, %v483_v32  ;;  %v371_v41 = vld [vmem:[%s435_s12 + $0x50] sm:$0xff]  ;;  %v206_v44 = vmax.f32 %v190_v34, %v360_v26  ;;  %v191_v45 = vmax.f32 %v174_v35, %v353_v28 }
  0x1c   : > { %v354_v39 = vld [vmem:[%s435_s12 + $0x1e0] sm:$0xff]  ;;  %v387_v48 = vld [vmem:[%s435_s12 + $0x51] sm:$0xff]  ;;  %v239_v54 = vmax.f32 %v222_v43, %v443_v6 }
  0x1d   : > { %v494_v42 = vld [vmem:[%s435_s12 + $0xe0] sm:$0xff]  ;;  %v175_v46 = vmax.f32 %v158_v37, %v346_v30  ;;  %v362_v49 = vld [vmem:[%s435_s12 + $0x151] sm:$0xff]  ;;  %v159_v50 = vmax.f32 %v143_v40, %v488_v38  ;;  %v223_v55 = vmax.f32 %v206_v44, %v368_v12  ;;  %v207_v56 = vmax.f32 %v191_v45, %v361_v36 }
  0x1e   : > { %v347_v47 = vld [vmem:[%s435_s12 + $0x160] sm:$0xff]  ;;  %v144_v51 = vmax.f32 %v371_v41, %v494_v42  ;;  %v380_v53 = vld [vmem:[%s435_s12 + $0xf0] sm:$0xff]  ;;  %v255_v3 = vmax.f32 %v239_v54, %v446_v7 }
  0x1f   : > { %v372_v52 = vld [vmem:[%s435_s12 + $0x60] sm:$0xff]  ;;  %v192_v57 = vmax.f32 %v175_v46, %v354_v39  ;;  %v355_v58 = vld [vmem:[%s435_s12 + $0x1f0] sm:$0xff]  ;;  %v176_v61 = vmax.f32 %v159_v50, %v347_v47  ;;  %v240_v4 = vmax.f32 %v223_v55, %v454_v13  ;;  %v224_v5 = vmax.f32 %v207_v56, %v369_v21 }
  0x20   : > { %v348_v59 = vld [vmem:[%s435_s12 + $0x170] sm:$0xff]  ;;  %v388_v60 = vld [vmem:[%s435_s12 + $0x61] sm:$0xff]  ;;  %v160_v63 = vmax.f32 %v144_v51, %v387_v48  ;;  %v145_v0 = vmax.f32 %v372_v52, %v380_v53  ;;  %263 = vst [vmem:[%s511_s16] sm:$0xff] %v255_v3 }
  0x21   : > { %v363_v62 = vld [vmem:[%s435_s12 + $0x161] sm:$0xff]  ;;  %v373_v1 = vld [vmem:[%s435_s12 + $0x70] sm:$0xff]  ;;  %v208_v6 = vmax.f32 %v192_v57, %v362_v49  ;;  %v193_v11 = vmax.f32 %v176_v61, %v355_v58  ;;  %v256_v17 = vmax.f32 %v240_v4, %v457_v14  ;;  %v241_v7 = vmax.f32 %v224_v5, %v466_v22 }
  0x22   : > { %v381_v2 = vld [vmem:[%s435_s12 + $0x100] sm:$0xff]  ;;  %v389_v10 = vld [vmem:[%s435_s12 + $0x71] sm:$0xff]  ;;  %v177_v12 = vmax.f32 %v160_v63, %v348_v59  ;;  %v161_v15 = vmax.f32 %v145_v0, %v388_v60 }
  0x23   : > { %v356_v8 = vld [vmem:[%s435_s12 + $0x200] sm:$0xff]  ;;  %v146_v16 = vmax.f32 %v373_v1, %v381_v2  ;;  %v225_v18 = vmax.f32 %v208_v6, %v370_v31  ;;  %v364_v13 = vld [vmem:[%s435_s12 + $0x171] sm:$0xff]  ;;  %v209_v21 = vmax.f32 %v193_v11, %v363_v62  ;;  %264 = vst [vmem:[%s511_s16 + $0x8] sm:$0xff] %v256_v17  ;;  %v257_v27 = vmax.f32 %v241_v7, %v469_v23 }
  0x24   : > { %v349_v9 = vld [vmem:[%s435_s12 + $0x180] sm:$0xff]  ;;  %v357_v19 = vld [vmem:[%s435_s12 + $0x210] sm:$0xff]  ;;  %v194_v24 = vmax.f32 %v177_v12, %v356_v8 }
  0x25   : > { %v350_v20 = vld [vmem:[%s435_s12 + $0x190] sm:$0xff]  ;;  %v178_v25 = vmax.f32 %v161_v15, %v349_v9  ;;  %v162_v26 = vmax.f32 %v146_v16, %v389_v10  ;;  %v242_v28 = vmax.f32 %v225_v18, %v483_v32  ;;  %v365_v14 = vld [vmem:[%s435_s12 + $0x181] sm:$0xff]  ;;  %v226_v22 = vmax.f32 %v209_v21, %v371_v41  ;;  %265 = vst [vmem:[%s511_s16 + $0x10] sm:$0xff] %v257_v27 }
  0x26   : > { %v358_v29 = vld [vmem:[%s435_s12 + $0x220] sm:$0xff]  ;;  %v210_v30 = vmax.f32 %v194_v24, %v364_v13  ;;  %v366_v35 = vld [vmem:[%s435_s12 + $0x191] sm:$0xff] }
  0x27   : > { %v195_v31 = vmax.f32 %v178_v25, %v357_v19  ;;  %v179_v33 = vmax.f32 %v162_v26, %v350_v20  ;;  %v258_v34 = vmax.f32 %v242_v28, %v488_v38  ;;  %v243_v36 = vmax.f32 %v226_v22, %v494_v42  ;;  %v374_v32 = vld [vmem:[%s435_s12 + $0x80] sm:$0xff]  ;;  %v382_v45 = vld [vmem:[%s435_s12 + $0x110] sm:$0xff] }
  0x28   : > { %v227_v23 = vmax.f32 %v210_v30, %v372_v52  ;;  %v390_v49 = vld [vmem:[%s435_s12 + $0x81] sm:$0xff] }
  0x29   : > { %v211_v37 = vmax.f32 %v195_v31, %v365_v14  ;;  %v196_v39 = vmax.f32 %v179_v33, %v358_v29  ;;  %266 = vst [vmem:[%s511_s16 + $0x18] sm:$0xff] %v258_v34  ;;  %v259_v40 = vmax.f32 %v243_v36, %v387_v48 }
  0x2a   : > { %v244_v41 = vmax.f32 %v227_v23, %v380_v53 }
  0x2b   : > { %v228_v43 = vmax.f32 %v211_v37, %v373_v1  ;;  %v212_v44 = vmax.f32 %v196_v39, %v366_v35  ;;  %267 = vst [vmem:[%s511_s16 + $0x20] sm:$0xff] %v259_v40 }
  0x2c   : > { %v260_v46 = vmax.f32 %v244_v41, %v388_v60 }
  0x2d   : > { %v245_v38 = vmax.f32 %v228_v43, %v381_v2  ;;  %v229_v47 = vmax.f32 %v212_v44, %v374_v32 }
  0x2e   : > { %268 = vst [vmem:[%s511_s16 + $0x28] sm:$0xff] %v260_v46 }
  0x2f   : > { %v261_v42 = vmax.f32 %v245_v38, %v389_v10  ;;  %v246_v50 = vmax.f32 %v229_v47, %v382_v45 }
  0x31   : > { %269 = vst [vmem:[%s511_s16 + $0x30] sm:$0xff] %v261_v42  ;;  %v262_v51 = vmax.f32 %v246_v50, %v390_v49 }
  0x33   : > { %270 = vst [vmem:[%s511_s16 + $0x38] sm:$0xff] %v262_v51 }
  0x34 PF: > { %s11_s6 = sadd.s32 1, %s409_s6  }
  0x35   : > { %p8_p5 = scmp.ge.s32.totalorder %s11_s6, 4  }
  0x37   :  { %10 = sbr.rel (!%p8_p5) target bundleno = 1 (0x1), region = 59 }

// kernel: msd_init_layer.4
= control target key start
LH: loop header
LB: loop body
LE: loop exit
PB: predicated region body
PF: predicated region fallthrough
CT: control target
= control target key end

     0   :  { %s4387_s12 = smov 0   ;;  %s4389_s13 = smov 0   ;;  %s5001_s0 = inlined_call_operand.vmem [shape: bf16[8,19,19,8], index: 0, kind: input, shape index: {}]   ;;  %s5002_s1 = inlined_call_operand.vmem [shape: bf16[49,8,128], index: 1, kind: input, shape index: {}]   ;;  %s5003_s2 = inlined_call_operand.vmem [shape: f32[1,128], index: 2, kind: input, shape index: {}]   ;;  %s5004_s3 = inlined_call_operand.vmem [shape: f32[2,16,16,128], index: 3, kind: output, shape index: {}]  }
   0x1   :  { %s4391_s14 = smov 0   ;;  %s4393_s15 = smov 0  }
   0x2   :  { %s4395_s16 = smov 0  }
   0x3 LB: > { %s22_s17 = sadd.s32 1, %s4355_s14  ;;  %s25_s18 = sadd.s32 1, %s4359_s15  ;;  %s4363_s16 = sphi %s4395_s16, %s13_s16   ;;  %s4359_s15 = sphi %s4393_s15, %s5008_s15   ;;  %s4355_s14 = sphi %s4391_s14, %s5007_s14   ;;  %s4351_s13 = sphi %s4389_s13, %s5006_s13   ;;  %s4347_s12 = sphi %s4387_s12, %s5005_s12  }
   0x4   : > { %p23_p0 = scmp.ge.s32.totalorder %s22_s17, 16  ;;  %p3562_p1 = scmp.ge.s32.totalorder %s4363_s16, 1 }
   0x5   : > { %p153_p2 = scmp.lt.s32.totalorder %s4363_s16, 33 }
   0x6   : > { %s5010_s17 = smov (%p23_p0, %s22_s17), 0  ;;  %s5012_s18 = smov (!%p23_p0, %s25_s18), %s4359_s15 }
   0x7   : > { %p154_p3 = pnand %p3562_p1, %p153_p2  ;;  %p27_p4 = scmp.ge.s32.totalorder %s5012_s18, 2 }
   0x8   : > { %s3563_s23 = sshll.u32 (!%p154_p3), %s4351_s13, 2  ;;  %s3826_s24 = smul.u32 (!%p154_p3), 12, %s4347_s12 }
   0x9   : > { %s5014_s18 = smov (%p27_p4, %s5012_s18), 0  ;;  %157 = sbr.rel (%p154_p3) target bundleno = 420 (0x1a4), region = 32 }
   0xa   : > { %p183_p5 = scmp.lt.s32.totalorder (!%p154_p3), %s3563_s23, 7  ;;  %p189_p6 = scmp.lt.s32.totalorder (!%p154_p3), %s4351_s13, 1 }
   0xb   : > { %p191_p7 = scmp.lt.s32.totalorder (!%p154_p3), %s4347_s12, 15 }
   0xe   : > { %v3572_v0 = vld [vmem:[%s5002_s1 + $0x4] sm:$0xf]  ;;  %vm221_vm0 = vcmask 1043456   ;;  %v204_v1 = vld [vmem:[%s5002_s1] sm:$0xf]  ;;  %v4365_v2 = vmov 0.0  }
   0xf   : > { %3925 = vmatprep.subr.bf16.mxu0 %v4365_v2  ;;  %v223_v3 = vsel %vm221_vm0, %v3572_v0, 0  ;;  %3931 = vmatprep.subr.bf16.mxu1 %v4365_v2  ;;  %v275_v4 = vsel %vm221_vm0, %v204_v1, 0  ;;  %vm4366_vm1 = vmmov 0   ;;  %s5016_s23 = smov (!%p183_p5, %s3563_s23), 7  ;;  %v3577_v5 = vld [vmem:[%s5002_s1 + $0x8] sm:$0xf] }
  0x10   : > { %3926 = vmatpush3.bf16.msra.mxu0 %v223_v3  ;;  %3932 = vmatpush3.bf16.msra.mxu1 %v275_v4  ;;  %s4219_s25 = smul.u32 228, %s5016_s23  ;;  %v3584_v6 = vld [vmem:[%s5002_s1 + $0xc] sm:$0xf]  ;;  %vm217_vm2 = vcmask 64512   ;;  %v348_v8 = vsel %vm221_vm0, %v3577_v5, 0  ;;  %vm473_vm4 = vcmask 1046528  }
  0x11   : > { %3927 = vmatprep.mubr.msk.bf16.mxu0 %vm4366_vm1, %v4365_v2  ;;  %3933 = vmatprep.mubr.msk.bf16.mxu1 %vm4366_vm1, %v4365_v2  ;;  %v422_v10 = vsel %vm221_vm0, %v3584_v6, 0  ;;  %vm331_vm3 = vsmask.f32 7424  ;;  %v3588_v23 = vld [vmem:[%s5002_s1 + $0x10] sm:$0xf]  ;;  %s5018_s13 = smov (!%p189_p6, %s4351_s13), 1 }
  0x12   : > { %3937 = vmatprep.subr.bf16.mxu0 %v4365_v2  ;;  %3943 = vmatprep.subr.bf16.mxu1 %v4365_v2  ;;  %s187_s30 = scalar_lea.vmem %s5001_s0, %s4219_s25  ;;  %v3592_v29 = vld [vmem:[%s5002_s1 + $0x14] sm:$0xf]  ;;  %v481_v36 = vsel %vm221_vm0, %v3588_v23, 0  ;;  %v3595_v50 = vld [vmem:[%s5002_s1 + $0x18] sm:$0xf]  ;;  %s5020_s12 = smov (!%p191_p7, %s4347_s12), 15 }
  0x13   : > { %s4448_s6 = scalar_lea.vmem %s187_s30, %s3826_s24  ;;  %v539_v40 = vsel %vm221_vm0, %v3592_v29, 0  ;;  %v3601_v52 = vld [vmem:[%s5002_s1 + $0x1c] sm:$0xf]  ;;  %v612_v59 = vsel %vm221_vm0, %v3595_v50, 0  ;;  %vm590_vm5 = vsmask.f32 6400 }
  0x14   : > { %v4262_v7 = vld [vmem:[%s4448_s6 + $0xe4] sm:$0xff]   ;;  %v318_v11 = vld [vmem:[%s4448_s6] sm:$0xf]  ;;  %v4267_v22 = vld [vmem:[%s4448_s6 + $0xec] ss:$0 sps:$4 sm:$0x11]  }
  0x15   : > { %v4263_v9 = vld [vmem:[%s4448_s6] sm:$0xff]   ;;  %3928 = vmatmul.mubr.msk.bf16.vlgmr.msra.gmra.mxu0 %vm217_vm2, %v4262_v7  ;;  %v4265_v14 = vld [vmem:[%s4448_s6 + $0x8] ss:$0 sps:$4 sm:$0x11]   ;;  %v414_v28 = vshll.u32 %v4267_v22, 16  ;;  %v533_v49 = vrot.slane %v4267_v22, 1 }
  0x16   : > { %v319_v12 = vld [vmem:[%s4448_s6 + $0x4] sm:$0xf]  ;;  %3934 = vmatmul.mubr.msk.bf16.vlgmr.msra.gmra.mxu1 %vm217_vm2, %v4263_v9  ;;  %3938 = vmatpush3.bf16.msra.mxu0 %v348_v8  ;;  %v3582_v16 = vld [vmem:[%s4448_s6 + $0xe8] sm:$0xf]  ;;  %v467_v17 = vld [vmem:[%s4448_s6] sm:$0xe] }
  0x17   : > { %v3578_v13 = vcombine.low %v318_v11, %v319_v12  ;;  %v3581_v15 = vld [vmem:[%s4448_s6 + $0xe4] sm:$0xf]  ;;  %3944 = vmatpush3.bf16.msra.mxu1 %v422_v10  ;;  %3939 = vmatprep.mubr.msk.bf16.mxu0 %vm4366_vm1, %v4365_v2  ;;  %v340_v20 = vshll.u32 %v4265_v14, 16  ;;  %v3589_v30 = vcombine.low %v467_v17, %v319_v12  ;;  %v4270_v34 = vld [vmem:[%s4448_s6 + $0x8] ss:$0 sps:$4 sm:$0x33]  }
  0x18   : > { %3945 = vmatprep.mubr.msk.bf16.mxu1 %vm4366_vm1, %v4365_v2  ;;  %3949 = vmatprep.subr.bf16.mxu0 %v4365_v2  ;;  %v3585_v21 = vcombine.low %v3581_v15, %v3582_v16  ;;  %v3591_v31 = vld [vmem:[%s4448_s6 + $0xe4] sm:$0xe]  ;;  %v416_v35 = vrot.slane %v414_v28, 1  ;;  %v475_v42 = vrot.slane %v4265_v14, 1  ;;  %v600_v46 = vshrl.u32 %v4270_v34, 16  ;;  %v4271_v10 = vld [vmem:[%s4448_s6 + $0x1c8] sm:$0xff]  }
  0x19   : > { %v333_v18 = vshrl.u32 %v3578_v13, 16  ;;  %v335_v19 = vshll.u32 %v3578_v13, 16  ;;  %3955 = vmatprep.subr.bf16.mxu1 %v4365_v2  ;;  %v342_v25 = vrot.slane %v340_v20, 1  ;;  %v3593_v39 = vcombine.low %v3591_v31, %v3582_v16  ;;  %v3610_v53 = vld [vmem:[%s4448_s6 + $0x1c8] sm:$0xf]  ;;  %v4272_v22 = vld [vmem:[%s4448_s6 + $0x2ac] sm:$0xff]  }
  0x1a   : > { %v407_v26 = vshrl.u32 %v3585_v21, 16  ;;  %v409_v27 = vshll.u32 %v3585_v21, 16  ;;  %v474_v41 = vrot.slane %v3589_v30, 1  ;;  %v592_v43 = vshrl.u32 %v3589_v30, 16  ;;  %v3611_v54 = vld [vmem:[%s4448_s6 + $0x1cc] sm:$0xf] }
  0x1b   : > { %v337_v24 = vrot.slane %v335_v19, 1  ;;  %v595_v45 = vshll.u32 %v3589_v30, 16  ;;  %v603_v47 = vshll.u32 %v4270_v34, 16  ;;  %v532_v48 = vrot.slane %v3593_v39, 1  ;;  %v3607_v1 = vld [vmem:[%s5002_s1 + $0x20] sm:$0xf] }
  0x1c   : > { %v411_v33 = vrot.slane %v409_v27, 1  ;;  %v476_v51 = vsel %vm473_vm4, %v474_v41, %v475_v42  ;;  %v594_v55 = vrot.slane %v592_v43, 1  ;;  %v602_v57 = vrot.slane %v600_v46, 1  ;;  %v3617_v3 = vld [vmem:[%s4448_s6 + $0x2ac] sm:$0xf]  ;;  %s3565_s27 = sshll.u32 %s5020_s12, 1 }
  0x1d   : > { %v338_v32 = vor.u32 %v337_v24, %v333_v18  ;;  %v597_v56 = vrot.slane %v595_v45, 2  ;;  %v605_v58 = vrot.slane %v603_v47, 2  ;;  %v534_v60 = vsel %vm473_vm4, %v532_v48, %v533_v49  ;;  %v4511_v4 = vld [vmem:[%s4448_s6 + $0x2b0] sm:$0xf]  ;;  %v3613_v8 = vld [vmem:[%s5002_s1 + $0x24] sm:$0xf] }
  0x1e   : > { %v412_v38 = vor.u32 %v411_v33, %v407_v26  ;;  %v3614_v61 = vcombine.low %v3610_v53, %v3611_v54  ;;  %v673_v62 = vsel %vm221_vm0, %v3601_v52, 0  ;;  %v4274_v5 = vld [vmem:[%s4448_s6 + $0x1d0] ss:$0 sps:$4 sm:$0x11]   ;;  %v3621_v9 = vcombine.low %v3617_v3, %v4511_v4  ;;  %v3620_v20 = vld [vmem:[%s5002_s1 + $0x28] sm:$0xf] }
  0x1f   : > { %v343_v37 = vsel %vm331_vm3, %v338_v32, %v342_v25  ;;  %v598_v63 = vor.u32 %v597_v56, %v594_v55  ;;  %v606_v0 = vor.u32 %v605_v58, %v602_v57  ;;  %v734_v11 = vsel %vm221_vm0, %v3607_v1, 0  ;;  %v4529_v16 = vld [vmem:[%s4448_s6 + $0x2b4] ss:$0 sps:$4 sm:$0x11]   ;;  %v3624_v21 = vld [vmem:[%s4448_s6 + $0x1c8] sm:$0xe] }
  0x20   : > { %3940 = vmatmul.mubr.msk.bf16.vlgmr.msra.gmra.mxu0 %vm217_vm2, %v343_v37  ;;  %v417_v44 = vsel %vm331_vm3, %v412_v38, %v416_v35  ;;  %v795_v6 = vshll.u32 %v3614_v61, 16  ;;  %v793_v12 = vshrl.u32 %v3614_v61, 16  ;;  %v800_v14 = vshll.u32 %v4274_v5, 16  ;;  %v3625_v23 = vld [vmem:[%s5002_s1 + $0x2c] sm:$0xf]  ;;  %s3566_s28 = sshll.u32 %s5018_s13, 5 }
  0x21   : > { %3950 = vmatpush3.bf16.msra.mxu0 %v481_v36  ;;  %3951 = vmatprep.mubr.msk.bf16.mxu0 %vm4366_vm1, %v4365_v2  ;;  %v607_v7 = vsel %vm590_vm5, %v598_v63, %v606_v0  ;;  %v808_v15 = vsel %vm221_vm0, %v3613_v8, 0  ;;  %v869_v17 = vshll.u32 %v3621_v9, 16  ;;  %v867_v24 = vshrl.u32 %v3621_v9, 16  ;;  %v4279_v29 = vld [vmem:[%s4448_s6 + $0x1d0] ss:$0 sps:$4 sm:$0x33]   ;;  %s195_s29 = sadd.s32 %s3566_s28, %s3565_s27 }
  0x22   : > { %3946 = vmatmul.mubr.msk.bf16.vlgmr.msra.gmra.mxu1 %vm217_vm2, %v417_v44  ;;  %3961 = vmatprep.subr.bf16.mxu0 %v4365_v2  ;;  %v797_v13 = vrot.slane %v795_v6, 1  ;;  %v802_v19 = vrot.slane %v800_v14, 1  ;;  %v874_v26 = vshll.u32 %v4529_v16, 16  ;;  %v882_v27 = vsel %vm221_vm0, %v3620_v20, 0  ;;  %v3628_v36 = vld [vmem:[%s4448_s6 + $0x2ac] sm:$0xe] }
  0x23   : > { %3956 = vmatpush3.bf16.msra.mxu1 %v539_v40  ;;  %3957 = vmatprep.mubr.msk.bf16.mxu1 %vm4366_vm1, %v4365_v2  ;;  %v871_v25 = vrot.slane %v869_v17, 1  ;;  %v3626_v28 = vcombine.low %v3624_v21, %v3611_v54  ;;  %v940_v31 = vsel %vm221_vm0, %v3625_v23, 0  ;;  %v934_v35 = vrot.slane %v4274_v5, 1  ;;  %v3629_v37 = vld [vmem:[%s5002_s1 + $0x30] sm:$0xf]  ;;  %s3567_s5 = sshll.u32 %s195_s29, 3 }
  0x24   : > { %3967 = vmatprep.subr.bf16.mxu1 %v4365_v2  ;;  %v798_v18 = vor.u32 %v797_v13, %v793_v12  ;;  %v876_v33 = vrot.slane %v874_v26, 1  ;;  %v1058_v40 = vshrl.u32 %v4279_v29, 16  ;;  %v1061_v41 = vshll.u32 %v4279_v29, 16  ;;  %v3633_v43 = vld [vmem:[%s5002_s1 + $0x34] sm:$0xf]  ;;  %s197_s7 = scalar_lea.vmem %s5004_s3, %s3567_s5 }
  0x25   : > { %v872_v32 = vor.u32 %v871_v25, %v867_v24  ;;  %v933_v34 = vrot.slane %v3626_v28, 1  ;;  %v1050_v38 = vshrl.u32 %v3626_v28, 16  ;;  %v1053_v39 = vshll.u32 %v3626_v28, 16  ;;  %v3647_v54 = vld [vmem:[%s4448_s6 + $0xc] sm:$0xf] }
  0x26   : > { %v803_v30 = vsel %vm331_vm3, %v798_v18, %v802_v19  ;;  %v3630_v44 = vcombine.low %v3628_v36, %v4511_v4  ;;  %v998_v46 = vsel %vm221_vm0, %v3629_v37, 0  ;;  %v1060_v49 = vrot.slane %v1058_v40, 1  ;;  %v3648_v55 = vld [vmem:[%s4448_s6 + $0x10] sm:$0xf]  ;;  %v3638_v58 = vld [vmem:[%s5002_s1 + $0x38] sm:$0xf] }
  0x27   : > { %v877_v42 = vsel %vm331_vm3, %v872_v32, %v876_v33  ;;  %v935_v45 = vsel %vm473_vm4, %v933_v34, %v934_v35  ;;  %v1052_v47 = vrot.slane %v1050_v38, 1  ;;  %v1055_v48 = vrot.slane %v1053_v39, 2  ;;  %v4283_v5 = vld [vmem:[%s4448_s6 + $0x14] ss:$0 sps:$4 sm:$0x11]  }
  0x28   : > { %3952 = vmatmul.mubr.msk.bf16.vlgmr.msra.gmra.mxu0 %vm217_vm2, %v476_v51  ;;  %v1063_v50 = vrot.slane %v1061_v41, 2  ;;  %v1070_v51 = vsel %vm221_vm0, %v3633_v43, 0  ;;  %v991_v52 = vrot.slane %v3630_v44, 1  ;;  %v992_v53 = vrot.slane %v4529_v16, 1  ;;  %v3661_v23 = vld [vmem:[%s4448_s6 + $0xc] sm:$0xe] }
  0x29   : > { %3962 = vmatpush3.bf16.msra.mxu0 %v612_v59  ;;  %3963 = vmatprep.mubr.msk.bf16.mxu0 %vm4366_vm1, %v4365_v2  ;;  %v1056_v56 = vor.u32 %v1055_v48, %v1052_v47  ;;  %v3654_v59 = vld [vmem:[%s4448_s6 + $0xf0] sm:$0xf]  ;;  %v3651_v63 = vcombine.low %v3647_v54, %v3648_v55  ;;  %v1132_v0 = vsel %vm221_vm0, %v3638_v58, 0  ;;  %v4607_v8 = vld [vmem:[%s4448_s6 + $0xf8] ss:$0 sps:$4 sm:$0x11]   ;;  %v3663_v28 = vcombine.low %v3661_v23, %v3648_v55 }
  0x2a   : > { %3958 = vmatmul.mubr.msk.bf16.vlgmr.msra.gmra.mxu1 %vm217_vm2, %v534_v60  ;;  %3973 = vmatprep.subr.bf16.mxu0 %v4365_v2  ;;  %v1064_v57 = vor.u32 %v1063_v50, %v1060_v49  ;;  %v4585_v60 = vld [vmem:[%s4448_s6 + $0xf4] sm:$0xf]  ;;  %v993_v61 = vsel %vm473_vm4, %v991_v52, %v992_v53  ;;  %v1259_v14 = vshll.u32 %v4283_v5, 16  ;;  %v1333_v19 = vshll.u32 %v4607_v8, 16  ;;  %v3662_v26 = vld [vmem:[%s5002_s1 + $0x48] sm:$0xf] }
  0x2b   : > { %3968 = vmatpush3.bf16.msra.mxu1 %v673_v62  ;;  %3969 = vmatprep.mubr.msk.bf16.mxu1 %vm4366_vm1, %v4365_v2  ;;  %v3644_v62 = vld [vmem:[%s5002_s1 + $0x3c] sm:$0xf]  ;;  %v3658_v3 = vcombine.low %v3654_v59, %v4585_v60  ;;  %v1254_v6 = vshll.u32 %v3651_v63, 16  ;;  %v1252_v12 = vshrl.u32 %v3651_v63, 16  ;;  %v3665_v29 = vld [vmem:[%s4448_s6 + $0xf0] sm:$0xe] }
  0x2c   : > { %3979 = vmatprep.subr.bf16.mxu1 %v4365_v2  ;;  %v1065_v1 = vsel %vm590_vm5, %v1056_v56, %v1064_v57  ;;  %v1193_v4 = vsel %vm221_vm0, %v3644_v62, 0  ;;  %v1335_v25 = vrot.slane %v1333_v19, 1  ;;  %v1399_v32 = vsel %vm221_vm0, %v3662_v26, 0  ;;  %v3670_v44 = vld [vmem:[%s5002_s1 + $0x50] sm:$0xf] }
  0x2d   : > { %v1328_v9 = vshll.u32 %v3658_v3, 16  ;;  %v1256_v13 = vrot.slane %v1254_v6, 1  ;;  %v1326_v17 = vshrl.u32 %v3658_v3, 16  ;;  %v3667_v34 = vcombine.low %v3665_v29, %v4585_v60  ;;  %v3685_v47 = vld [vmem:[%s4448_s6 + $0x1d4] sm:$0xf] }
  0x2e   : > { %v1392_v36 = vrot.slane %v3663_v28, 1  ;;  %v1393_v37 = vrot.slane %v4283_v5, 1  ;;  %v1509_v38 = vshrl.u32 %v3663_v28, 16  ;;  %v1512_v39 = vshll.u32 %v3663_v28, 16  ;;  %v3686_v48 = vld [vmem:[%s4448_s6 + $0x1d8] sm:$0xf] }
  0x2f   : > { %v1330_v18 = vrot.slane %v1328_v9, 1  ;;  %v1257_v21 = vor.u32 %v1256_v13, %v1252_v12  ;;  %v1451_v43 = vrot.slane %v4607_v8, 1  ;;  %v1529_v53 = vsel %vm221_vm0, %v3670_v44, 0  ;;  %v3682_v59 = vld [vmem:[%s5002_s1 + $0x58] sm:$0xf] }
  0x30   : > { %3964 = vmatmul.mubr.msk.bf16.vlgmr.msra.gmra.mxu0 %vm217_vm2, %v607_v7  ;;  %v3650_v7 = vld [vmem:[%s5002_s1 + $0x40] sm:$0xf]  ;;  %v1511_v49 = vrot.slane %v1509_v38, 1  ;;  %v1514_v50 = vrot.slane %v1512_v39, 2  ;;  %v3689_v55 = vcombine.low %v3685_v47, %v3686_v48  ;;  %v3692_v60 = vld [vmem:[%s4448_s6 + $0x2b8] sm:$0xf] }
  0x31   : > { %3974 = vmatpush3.bf16.msra.mxu0 %v734_v11  ;;  %3975 = vmatprep.mubr.msk.bf16.mxu0 %vm4366_vm1, %v4365_v2  ;;  %v3657_v11 = vld [vmem:[%s5002_s1 + $0x44] sm:$0xf]  ;;  %v1267_v16 = vsel %vm221_vm0, %v3650_v7, 0  ;;  %v1331_v24 = vor.u32 %v1330_v18, %v1326_v17  ;;  %v4292_v62 = vld [vmem:[%s4448_s6 + $0x1dc] ss:$0 sps:$4 sm:$0x11]  }
  0x32   : > { %3970 = vmatmul.mubr.msk.bf16.vlgmr.msra.gmra.mxu1 %vm217_vm2, %v4271_v10  ;;  %3985 = vmatprep.subr.bf16.mxu0 %v4365_v2  ;;  %v4280_v10 = vld [vmem:[%s4448_s6 + $0xc] sm:$0xff]   ;;  %v1341_v20 = vsel %vm221_vm0, %v3657_v11, 0  ;;  %v1515_v57 = vor.u32 %v1514_v50, %v1511_v49  ;;  %v1712_v63 = vshll.u32 %v3689_v55, 16  ;;  %v1651_v5 = vsel %vm221_vm0, %v3682_v59, 0  ;;  %v3700_v17 = vld [vmem:[%s5002_s1 + $0x64] sm:$0xf] }
  0x33   : > { %3980 = vmatpush3.bf16.msra.mxu1 %v808_v15  ;;  %3981 = vmatprep.mubr.msk.bf16.mxu1 %vm4366_vm1, %v4365_v2  ;;  %v4281_v15 = vld [vmem:[%s4448_s6 + $0xf0] sm:$0xff]   ;;  %v1336_v33 = vsel %vm331_vm3, %v1331_v24, %v1335_v25  ;;  %v1710_v6 = vshrl.u32 %v3689_v55, 16  ;;  %v1717_v8 = vshll.u32 %v4292_v62, 16  ;;  %v4297_v24 = vld [vmem:[%s4448_s6 + $0x1dc] ss:$0 sps:$4 sm:$0x33]  }
  0x34   : > { %3991 = vmatprep.subr.bf16.mxu1 %v4365_v2  ;;  %v1714_v7 = vrot.slane %v1712_v63, 1  ;;  %v1857_v25 = vsel %vm221_vm0, %v3700_v17, 0  ;;  %v1851_v29 = vrot.slane %v4292_v62, 1  ;;  %v3723_v49 = vld [vmem:[%s4448_s6 + $0x1c] sm:$0xf] }
  0x35   : > { %v1719_v13 = vrot.slane %v1717_v8, 1  ;;  %v4301_v62 = vld [vmem:[%s4448_s6 + $0x20] ss:$0 sps:$4 sm:$0x11]   ;;  %v3736_v17 = vld [vmem:[%s4448_s6 + $0x18] sm:$0xe] }
  0x36   : > { %v1715_v12 = vor.u32 %v1714_v7, %v1710_v6  ;;  %v2176_v8 = vshll.u32 %v4301_v62, 16 }
  0x38   : > { %3976 = vmatmul.mubr.msk.bf16.vlgmr.msra.gmra.mxu0 %vm217_vm2, %v4272_v22  ;;  %v1261_v22 = vrot.slane %v1259_v14, 1  ;;  %v3695_v14 = vld [vmem:[%s5002_s1 + $0x60] sm:$0xf]  ;;  %v1720_v23 = vsel %vm331_vm3, %v1715_v12, %v1719_v13 }
  0x39   : > { %3986 = vmatpush3.bf16.msra.mxu0 %v882_v27  ;;  %3987 = vmatprep.mubr.msk.bf16.mxu0 %vm4366_vm1, %v4365_v2  ;;  %v3666_v27 = vld [vmem:[%s5002_s1 + $0x4c] sm:$0xf] }
  0x3a   : > { %3982 = vmatmul.mubr.msk.bf16.vlgmr.msra.gmra.mxu1 %vm217_vm2, %v803_v30  ;;  %3997 = vmatprep.subr.bf16.mxu0 %v4365_v2  ;;  %v1262_v30 = vsel %vm331_vm3, %v1257_v21, %v1261_v22  ;;  %v1457_v35 = vsel %vm221_vm0, %v3666_v27, 0  ;;  %v1799_v21 = vsel %vm221_vm0, %v3695_v14, 0 }
  0x3b   : > { %3992 = vmatpush3.bf16.msra.mxu1 %v940_v31  ;;  %3993 = vmatprep.mubr.msk.bf16.mxu1 %vm4366_vm1, %v4365_v2  ;;  %v4288_v31 = vld [vmem:[%s4448_s6 + $0x14] ss:$0 sps:$4 sm:$0x33]  }
  0x3c   : > { %4003 = vmatprep.subr.bf16.mxu1 %v4365_v2  ;;  %v1517_v40 = vshrl.u32 %v4288_v31, 16  ;;  %v1520_v41 = vshll.u32 %v4288_v31, 16  ;;  %v3704_v31 = vld [vmem:[%s5002_s1 + $0x68] sm:$0xf] }
  0x3e   : > { %v1522_v52 = vrot.slane %v1520_v41, 2 }
  0x40   : > { %3988 = vmatmul.mubr.msk.bf16.vlgmr.msra.gmra.mxu0 %vm217_vm2, %v877_v42  ;;  %v1450_v42 = vrot.slane %v3667_v34, 1  ;;  %v1975_v34 = vshrl.u32 %v4297_v24, 16 }
  0x41   : > { %3998 = vmatpush3.bf16.msra.mxu0 %v998_v46  ;;  %3999 = vmatprep.mubr.msk.bf16.mxu0 %vm4366_vm1, %v4365_v2  ;;  %v3676_v46 = vld [vmem:[%s5002_s1 + $0x54] sm:$0xf] }
  0x42   : > { %3994 = vmatmul.mubr.msk.bf16.vlgmr.msra.gmra.mxu1 %vm217_vm2, %v935_v45  ;;  %4009 = vmatprep.subr.bf16.mxu0 %v4365_v2  ;;  %v1394_v45 = vsel %vm473_vm4, %v1392_v36, %v1393_v37  ;;  %v1452_v54 = vsel %vm473_vm4, %v1450_v42, %v1451_v43  ;;  %v1590_v56 = vsel %vm221_vm0, %v3676_v46, 0  ;;  %v3708_v37 = vld [vmem:[%s5002_s1 + $0x6c] sm:$0xf]  ;;  %v1977_v43 = vrot.slane %v1975_v34, 1 }
  0x43   : > { %4004 = vmatpush3.bf16.msra.mxu1 %v1070_v51  ;;  %4005 = vmatprep.mubr.msk.bf16.mxu1 %vm4366_vm1, %v4365_v2  ;;  %v1519_v51 = vrot.slane %v1517_v40, 1  ;;  %v1915_v40 = vsel %vm221_vm0, %v3704_v31, 0  ;;  %v2310_v31 = vrot.slane %v4301_v62, 1 }
  0x44   : > { %4015 = vmatprep.subr.bf16.mxu1 %v4365_v2 }
  0x45   : > { %v1523_v58 = vor.u32 %v1522_v52, %v1519_v51  ;;  %v3713_v52 = vld [vmem:[%s5002_s1 + $0x70] sm:$0xf] }
  0x48   : > { %4000 = vmatmul.mubr.msk.bf16.vlgmr.msra.gmra.mxu0 %vm217_vm2, %v993_v61  ;;  %v4671_v61 = vld [vmem:[%s4448_s6 + $0x2bc] sm:$0xf] }
  0x49   : > { %4010 = vmatpush3.bf16.msra.mxu0 %v1132_v0  ;;  %4011 = vmatprep.mubr.msk.bf16.mxu0 %vm4366_vm1, %v4365_v2  ;;  %v1524_v0 = vsel %vm590_vm5, %v1515_v57, %v1523_v58  ;;  %v3696_v3 = vcombine.low %v3692_v60, %v4671_v61  ;;  %v2049_v58 = vsel %vm221_vm0, %v3713_v52, 0 }
  0x4a   : > { %4006 = vmatmul.mubr.msk.bf16.vlgmr.msra.gmra.mxu1 %vm217_vm2, %v1065_v1  ;;  %4021 = vmatprep.subr.bf16.mxu0 %v4365_v2  ;;  %v3688_v1 = vld [vmem:[%s5002_s1 + $0x5c] sm:$0xf] }
  0x4b   : > { %4016 = vmatpush3.bf16.msra.mxu1 %v1193_v4  ;;  %4017 = vmatprep.mubr.msk.bf16.mxu1 %vm4366_vm1, %v4365_v2  ;;  %v4289_v4 = vld [vmem:[%s4448_s6 + $0x1d4] sm:$0xff]   ;;  %v1725_v9 = vsel %vm221_vm0, %v3688_v1, 0  ;;  %v1786_v11 = vshll.u32 %v3696_v3, 16  ;;  %v1784_v18 = vshrl.u32 %v3696_v3, 16 }
  0x4c   : > { %4027 = vmatprep.subr.bf16.mxu1 %v4365_v2  ;;  %v4767_v1 = vld [vmem:[%s4448_s6 + $0x104] ss:$0 sps:$4 sm:$0x11]  }
  0x4d   : > { %v1788_v19 = vrot.slane %v1786_v11, 1  ;;  %v2250_v13 = vshll.u32 %v4767_v1, 16 }
  0x4f   : > { %v1789_v26 = vor.u32 %v1788_v19, %v1784_v18  ;;  %v2252_v19 = vrot.slane %v2250_v13, 1 }
  0x50   : > { %4012 = vmatmul.mubr.msk.bf16.vlgmr.msra.gmra.mxu0 %vm217_vm2, %v4280_v10  ;;  %v4689_v10 = vld [vmem:[%s4448_s6 + $0x2c0] ss:$0 sps:$4 sm:$0x11]  }
  0x51   : > { %4022 = vmatpush3.bf16.msra.mxu0 %v1267_v16  ;;  %4023 = vmatprep.mubr.msk.bf16.mxu0 %vm4366_vm1, %v4365_v2  ;;  %v4290_v16 = vld [vmem:[%s4448_s6 + $0x2b8] sm:$0xff]   ;;  %v1909_v47 = vrot.slane %v4689_v10, 1 }
  0x52   : > { %4018 = vmatmul.mubr.msk.bf16.vlgmr.msra.gmra.mxu1 %vm217_vm2, %v4281_v15  ;;  %4033 = vmatprep.subr.bf16.mxu0 %v4365_v2  ;;  %v3699_v15 = vld [vmem:[%s4448_s6 + $0x1d4] sm:$0xe] }
  0x53   : > { %4028 = vmatpush3.bf16.msra.mxu1 %v1341_v20  ;;  %4029 = vmatprep.mubr.msk.bf16.mxu1 %vm4366_vm1, %v4365_v2  ;;  %v1791_v20 = vshll.u32 %v4689_v10, 16  ;;  %v3701_v22 = vcombine.low %v3699_v15, %v3686_v48  ;;  %v3722_v48 = vld [vmem:[%s4448_s6 + $0x18] sm:$0xf] }
  0x54   : > { %4039 = vmatprep.subr.bf16.mxu1 %v4365_v2  ;;  %v3726_v57 = vcombine.low %v3722_v48, %v3723_v49 }
  0x55   : > { %v1793_v27 = vrot.slane %v1791_v20, 1  ;;  %v1850_v28 = vrot.slane %v3701_v22, 1  ;;  %v3737_v20 = vld [vmem:[%s5002_s1 + $0x80] sm:$0xf] }
  0x56   : > { %v2171_v63 = vshll.u32 %v3726_v57, 16  ;;  %v2169_v6 = vshrl.u32 %v3726_v57, 16 }
  0x57   : > { %v1794_v36 = vsel %vm331_vm3, %v1789_v26, %v1793_v27  ;;  %v1852_v39 = vsel %vm473_vm4, %v1850_v28, %v1851_v29  ;;  %v2316_v26 = vsel %vm221_vm0, %v3737_v20, 0 }
  0x58   : > { %4024 = vmatmul.mubr.msk.bf16.vlgmr.msra.gmra.mxu0 %vm217_vm2, %v1262_v30  ;;  %v3703_v30 = vld [vmem:[%s4448_s6 + $0x2b8] sm:$0xe]  ;;  %v2173_v7 = vrot.slane %v2171_v63, 1 }
  0x59   : > { %4034 = vmatpush3.bf16.msra.mxu0 %v1399_v32  ;;  %4035 = vmatprep.mubr.msk.bf16.mxu0 %vm4366_vm1, %v4365_v2  ;;  %v1967_v32 = vshrl.u32 %v3701_v22, 16  ;;  %v3705_v38 = vcombine.low %v3703_v30, %v4671_v61 }
  0x5a   : > { %4030 = vmatmul.mubr.msk.bf16.vlgmr.msra.gmra.mxu1 %vm217_vm2, %v1336_v33  ;;  %4045 = vmatprep.subr.bf16.mxu0 %v4365_v2  ;;  %v1970_v33 = vshll.u32 %v3701_v22, 16  ;;  %v2174_v15 = vor.u32 %v2173_v7, %v2169_v6  ;;  %v3740_v22 = vld [vmem:[%s4448_s6 + $0xfc] sm:$0xe] }
  0x5b   : > { %4040 = vmatpush3.bf16.msra.mxu1 %v1457_v35  ;;  %4041 = vmatprep.mubr.msk.bf16.mxu1 %vm4366_vm1, %v4365_v2  ;;  %v1978_v35 = vshll.u32 %v4297_v24, 16  ;;  %v1969_v41 = vrot.slane %v1967_v32, 1  ;;  %v1908_v46 = vrot.slane %v3705_v38, 1  ;;  %v3741_v24 = vld [vmem:[%s5002_s1 + $0x84] sm:$0xf] }
  0x5c   : > { %4051 = vmatprep.subr.bf16.mxu1 %v4365_v2  ;;  %v1972_v42 = vrot.slane %v1970_v33, 2  ;;  %v2374_v29 = vsel %vm221_vm0, %v3741_v24, 0  ;;  %v3745_v38 = vld [vmem:[%s5002_s1 + $0x88] sm:$0xf]  ;;  %v3778_v24 = vld [vmem:[%s4448_s6 + $0x2c4] sm:$0xe] }
  0x5d   : > { %v1980_v44 = vrot.slane %v1978_v35, 2  ;;  %v1910_v55 = vsel %vm473_vm4, %v1908_v46, %v1909_v47  ;;  %v2446_v47 = vsel %vm221_vm0, %v3745_v38, 0 }
  0x5e   : > { %v1973_v50 = vor.u32 %v1972_v42, %v1969_v41  ;;  %v3761_v41 = vld [vmem:[%s4448_s6 + $0x1e4] sm:$0xf]  ;;  %v3751_v42 = vld [vmem:[%s5002_s1 + $0x8c] sm:$0xf] }
  0x5f   : > { %v1981_v51 = vor.u32 %v1980_v44, %v1977_v43 }
  0x60   : > { %4036 = vmatmul.mubr.msk.bf16.vlgmr.msra.gmra.mxu0 %vm217_vm2, %v1394_v45  ;;  %v1987_v45 = vsel %vm221_vm0, %v3708_v37, 0  ;;  %v2368_v37 = vrot.slane %v4767_v1, 1 }
  0x61   : > { %4046 = vmatpush3.bf16.msra.mxu0 %v1529_v53  ;;  %4047 = vmatprep.mubr.msk.bf16.mxu0 %vm4366_vm1, %v4365_v2  ;;  %v3729_v53 = vld [vmem:[%s4448_s6 + $0xfc] sm:$0xf]  ;;  %v1982_v59 = vsel %vm590_vm5, %v1973_v50, %v1981_v51  ;;  %v2507_v50 = vsel %vm221_vm0, %v3751_v42, 0  ;;  %v3797_v42 = vld [vmem:[%s4448_s6 + $0x24] sm:$0xf] }
  0x62   : > { %4042 = vmatmul.mubr.msk.bf16.vlgmr.msra.gmra.mxu1 %vm217_vm2, %v1452_v54  ;;  %4057 = vmatprep.subr.bf16.mxu0 %v4365_v2  ;;  %v4745_v54 = vld [vmem:[%s4448_s6 + $0x100] sm:$0xf] }
  0x63   : > { %4052 = vmatpush3.bf16.msra.mxu1 %v1590_v56  ;;  %4053 = vmatprep.mubr.msk.bf16.mxu1 %vm4366_vm1, %v4365_v2  ;;  %v3719_v56 = vld [vmem:[%s5002_s1 + $0x74] sm:$0xf]  ;;  %v3733_v60 = vcombine.low %v3729_v53, %v4745_v54  ;;  %v3742_v28 = vcombine.low %v3740_v22, %v4745_v54  ;;  %v3767_v53 = vld [vmem:[%s4448_s6 + $0x2c4] sm:$0xf]  ;;  %v4828_v54 = vld [vmem:[%s4448_s6 + $0x2c8] sm:$0xf] }
  0x64   : > { %4063 = vmatprep.subr.bf16.mxu1 %v4365_v2  ;;  %v2110_v61 = vsel %vm221_vm0, %v3719_v56, 0  ;;  %v4310_v56 = vld [vmem:[%s4448_s6 + $0x1e8] ss:$0 sps:$4 sm:$0x11]  }
  0x65   : > { %v2245_v3 = vshll.u32 %v3733_v60, 16  ;;  %v2243_v11 = vshrl.u32 %v3733_v60, 16  ;;  %v3771_v60 = vcombine.low %v3767_v53, %v4828_v54  ;;  %v2634_v1 = vshll.u32 %v4310_v56, 16 }
  0x67   : > { %v2247_v12 = vrot.slane %v2245_v3, 1  ;;  %v2636_v7 = vrot.slane %v2634_v1, 1 }
  0x68   : > { %4048 = vmatmul.mubr.msk.bf16.vlgmr.msra.gmra.mxu0 %vm217_vm2, %v1524_v0  ;;  %v3725_v0 = vld [vmem:[%s5002_s1 + $0x78] sm:$0xf] }
  0x69   : > { %4058 = vmatpush3.bf16.msra.mxu0 %v1651_v5  ;;  %4059 = vmatprep.mubr.msk.bf16.mxu0 %vm4366_vm1, %v4365_v2  ;;  %v3732_v5 = vld [vmem:[%s5002_s1 + $0x7c] sm:$0xf]  ;;  %v2184_v10 = vsel %vm221_vm0, %v3725_v0, 0  ;;  %v2248_v18 = vor.u32 %v2247_v12, %v2243_v11  ;;  %v2701_v12 = vshrl.u32 %v3771_v60, 16 }
  0x6a   : > { %4054 = vmatmul.mubr.msk.bf16.vlgmr.msra.gmra.mxu1 %vm217_vm2, %v4289_v4  ;;  %4069 = vmatprep.subr.bf16.mxu0 %v4365_v2  ;;  %v4298_v4 = vld [vmem:[%s4448_s6 + $0x18] sm:$0xff]   ;;  %v2258_v14 = vsel %vm221_vm0, %v3732_v5, 0  ;;  %v2703_v5 = vshll.u32 %v3771_v60, 16 }
  0x6b   : > { %4064 = vmatpush3.bf16.msra.mxu1 %v1725_v9  ;;  %4065 = vmatprep.mubr.msk.bf16.mxu1 %vm4366_vm1, %v4365_v2  ;;  %v4299_v9 = vld [vmem:[%s4448_s6 + $0xfc] sm:$0xff]   ;;  %v2253_v27 = vsel %vm331_vm3, %v2248_v18, %v2252_v19  ;;  %v4315_v18 = vld [vmem:[%s4448_s6 + $0x1e8] ss:$0 sps:$4 sm:$0x33]  }
  0x6c   : > { %4075 = vmatprep.subr.bf16.mxu1 %v4365_v2  ;;  %v3775_v11 = vld [vmem:[%s5002_s1 + $0x9c] sm:$0xf]  ;;  %v2705_v13 = vrot.slane %v2703_v5, 1 }
  0x6d   : > { %v2774_v19 = vsel %vm221_vm0, %v3775_v11, 0  ;;  %v3811_v11 = vld [vmem:[%s4448_s6 + $0x24] sm:$0xe] }
  0x6e   : > { %v2706_v20 = vor.u32 %v2705_v13, %v2701_v12 }
  0x70   : > { %4060 = vmatmul.mubr.msk.bf16.vlgmr.msra.gmra.mxu0 %vm217_vm2, %v4290_v16  ;;  %v2178_v16 = vrot.slane %v2176_v8, 1  ;;  %v3770_v8 = vld [vmem:[%s5002_s1 + $0x98] sm:$0xf] }
  0x71   : > { %4070 = vmatpush3.bf16.msra.mxu0 %v1799_v21  ;;  %4071 = vmatprep.mubr.msk.bf16.mxu0 %vm4366_vm1, %v4365_v2  ;;  %v3738_v21 = vcombine.low %v3736_v17, %v3723_v49 }
  0x72   : > { %4066 = vmatmul.mubr.msk.bf16.vlgmr.msra.gmra.mxu1 %vm217_vm2, %v1720_v23  ;;  %4081 = vmatprep.subr.bf16.mxu0 %v4365_v2  ;;  %v2179_v23 = vsel %vm331_vm3, %v2174_v15, %v2178_v16  ;;  %v2716_v15 = vsel %vm221_vm0, %v3770_v8, 0 }
  0x73   : > { %4076 = vmatpush3.bf16.msra.mxu1 %v1857_v25  ;;  %4077 = vmatprep.mubr.msk.bf16.mxu1 %vm4366_vm1, %v4365_v2  ;;  %v4306_v25 = vld [vmem:[%s4448_s6 + $0x20] ss:$0 sps:$4 sm:$0x33]   ;;  %v2309_v30 = vrot.slane %v3738_v21, 1  ;;  %v2426_v32 = vshrl.u32 %v3738_v21, 16  ;;  %v2429_v33 = vshll.u32 %v3738_v21, 16 }
  0x74   : > { %4087 = vmatprep.subr.bf16.mxu1 %v4365_v2  ;;  %v2434_v34 = vshrl.u32 %v4306_v25, 16  ;;  %v2437_v35 = vshll.u32 %v4306_v25, 16  ;;  %v3779_v25 = vld [vmem:[%s5002_s1 + $0xa0] sm:$0xf] }
  0x75   : > { %v2428_v43 = vrot.slane %v2426_v32, 1  ;;  %v2431_v44 = vrot.slane %v2429_v33, 2  ;;  %v3780_v32 = vcombine.low %v3778_v24, %v4828_v54 }
  0x76   : > { %v2439_v46 = vrot.slane %v2437_v35, 2 }
  0x77   : > { %v2432_v51 = vor.u32 %v2431_v44, %v2428_v43  ;;  %v3798_v43 = vld [vmem:[%s4448_s6 + $0x28] sm:$0xf] }
  0x78   : > { %4072 = vmatmul.mubr.msk.bf16.vlgmr.msra.gmra.mxu0 %vm217_vm2, %v1794_v36  ;;  %v2367_v36 = vrot.slane %v3742_v28, 1  ;;  %v2892_v28 = vshrl.u32 %v4315_v18, 16 }
  0x79   : > { %4082 = vmatpush3.bf16.msra.mxu0 %v1915_v40  ;;  %4083 = vmatprep.mubr.msk.bf16.mxu0 %vm4366_vm1, %v4365_v2  ;;  %v3760_v40 = vld [vmem:[%s4448_s6 + $0x1e0] sm:$0xf] }
  0x7a   : > { %4078 = vmatmul.mubr.msk.bf16.vlgmr.msra.gmra.mxu1 %vm217_vm2, %v1852_v39  ;;  %4093 = vmatprep.subr.bf16.mxu0 %v4365_v2  ;;  %v2311_v39 = vsel %vm473_vm4, %v2309_v30, %v2310_v31  ;;  %v2369_v48 = vsel %vm473_vm4, %v2367_v36, %v2368_v37  ;;  %v3764_v49 = vcombine.low %v3760_v40, %v3761_v41  ;;  %v3783_v31 = vld [vmem:[%s5002_s1 + $0xa4] sm:$0xf]  ;;  %v2894_v37 = vrot.slane %v2892_v28, 1 }
  0x7b   : > { %4088 = vmatpush3.bf16.msra.mxu1 %v1987_v45  ;;  %4089 = vmatprep.mubr.msk.bf16.mxu1 %vm4366_vm1, %v4365_v2  ;;  %v2436_v45 = vrot.slane %v2434_v34, 1  ;;  %v2832_v34 = vsel %vm221_vm0, %v3779_v25, 0  ;;  %v2825_v40 = vrot.slane %v3780_v32, 1  ;;  %v3820_v32 = vld [vmem:[%s5002_s1 + $0xc0] sm:$0xf] }
  0x7c   : > { %4099 = vmatprep.subr.bf16.mxu1 %v4365_v2  ;;  %v2629_v57 = vshll.u32 %v3764_v49, 16  ;;  %v2627_v63 = vshrl.u32 %v3764_v49, 16 }
  0x7d   : > { %v2440_v52 = vor.u32 %v2439_v46, %v2436_v45  ;;  %v3788_v46 = vld [vmem:[%s5002_s1 + $0xa8] sm:$0xf] }
  0x7e   : > { %v2631_v0 = vrot.slane %v2629_v57, 1 }
  0x80   : > { %4084 = vmatmul.mubr.msk.bf16.vlgmr.msra.gmra.mxu0 %vm217_vm2, %v1910_v55  ;;  %v3757_v55 = vld [vmem:[%s5002_s1 + $0x90] sm:$0xf]  ;;  %v2632_v6 = vor.u32 %v2631_v0, %v2627_v63 }
  0x81   : > { %4094 = vmatpush3.bf16.msra.mxu0 %v2049_v58  ;;  %4095 = vmatprep.mubr.msk.bf16.mxu0 %vm4366_vm1, %v4365_v2  ;;  %v2441_v58 = vsel %vm590_vm5, %v2432_v51, %v2440_v52  ;;  %v2568_v62 = vsel %vm221_vm0, %v3757_v55, 0  ;;  %v3801_v51 = vcombine.low %v3797_v42, %v3798_v43  ;;  %v2966_v52 = vsel %vm221_vm0, %v3788_v46, 0 }
  0x82   : > { %4090 = vmatmul.mubr.msk.bf16.vlgmr.msra.gmra.mxu1 %vm217_vm2, %v1982_v59  ;;  %4105 = vmatprep.subr.bf16.mxu0 %v4365_v2  ;;  %v3763_v59 = vld [vmem:[%s5002_s1 + $0x94] sm:$0xf]  ;;  %v2637_v17 = vsel %vm331_vm3, %v2632_v6, %v2636_v7 }
  0x83   : > { %4100 = vmatpush3.bf16.msra.mxu1 %v2110_v61  ;;  %4101 = vmatprep.mubr.msk.bf16.mxu1 %vm4366_vm1, %v4365_v2  ;;  %v4307_v61 = vld [vmem:[%s4448_s6 + $0x1e0] sm:$0xff]   ;;  %v2642_v3 = vsel %vm221_vm0, %v3763_v59, 0  ;;  %v3088_v57 = vshll.u32 %v3801_v51, 16  ;;  %v4321_v59 = vld [vmem:[%s4448_s6 + $0x110] ss:$0 sps:$4 sm:$0x11]  }
  0x84   : > { %4111 = vmatprep.subr.bf16.mxu1 %v4365_v2  ;;  %v3086_v63 = vshrl.u32 %v3801_v51, 16  ;;  %v3167_v7 = vshll.u32 %v4321_v59, 16 }
  0x85   : > { %v3090_v0 = vrot.slane %v3088_v57, 1 }
  0x86   : > { %v3169_v13 = vrot.slane %v3167_v7, 1 }
  0x88   : > { %4096 = vmatmul.mubr.msk.bf16.vlgmr.msra.gmra.mxu0 %vm217_vm2, %v4298_v4  ;;  %v4849_v4 = vld [vmem:[%s4448_s6 + $0x2cc] ss:$0 sps:$4 sm:$0x11]  }
  0x89   : > { %4106 = vmatpush3.bf16.msra.mxu0 %v2184_v10  ;;  %4107 = vmatprep.mubr.msk.bf16.mxu0 %vm4366_vm1, %v4365_v2  ;;  %v4308_v10 = vld [vmem:[%s4448_s6 + $0x2c4] sm:$0xff]  }
  0x8a   : > { %4102 = vmatmul.mubr.msk.bf16.vlgmr.msra.gmra.mxu1 %vm217_vm2, %v4299_v9  ;;  %4117 = vmatprep.subr.bf16.mxu0 %v4365_v2  ;;  %v3774_v9 = vld [vmem:[%s4448_s6 + $0x1e0] sm:$0xe] }
  0x8b   : > { %4112 = vmatpush3.bf16.msra.mxu1 %v2258_v14  ;;  %4113 = vmatprep.mubr.msk.bf16.mxu1 %vm4366_vm1, %v4365_v2  ;;  %v2708_v14 = vshll.u32 %v4849_v4, 16  ;;  %v3776_v16 = vcombine.low %v3774_v9, %v3761_v41  ;;  %v2826_v41 = vrot.slane %v4849_v4, 1  ;;  %v3091_v9 = vor.u32 %v3090_v0, %v3086_v63 }
  0x8c   : > { %4123 = vmatprep.subr.bf16.mxu1 %v4365_v2 }
  0x8d   : > { %v2710_v21 = vrot.slane %v2708_v14, 1  ;;  %v2767_v22 = vrot.slane %v3776_v16, 1  ;;  %v2827_v49 = vsel %vm473_vm4, %v2825_v40, %v2826_v41  ;;  %v3812_v14 = vld [vmem:[%s5002_s1 + $0xb8] sm:$0xf] }
  0x8f   : > { %v2711_v30 = vsel %vm331_vm3, %v2706_v20, %v2710_v21  ;;  %v3233_v20 = vsel %vm221_vm0, %v3812_v14, 0 }
  0x90   : > { %4108 = vmatmul.mubr.msk.bf16.vlgmr.msra.gmra.mxu0 %vm217_vm2, %v2179_v23  ;;  %v2768_v23 = vrot.slane %v4310_v56, 1  ;;  %v4319_v56 = vld [vmem:[%s4448_s6 + $0x2c] ss:$0 sps:$4 sm:$0x11]  }
  0x91   : > { %4118 = vmatpush3.bf16.msra.mxu0 %v2316_v26  ;;  %4119 = vmatprep.mubr.msk.bf16.mxu0 %vm4366_vm1, %v4365_v2  ;;  %v2884_v26 = vshrl.u32 %v3776_v16, 16  ;;  %v3093_v1 = vshll.u32 %v4319_v56, 16  ;;  %v3227_v25 = vrot.slane %v4319_v56, 1 }
  0x92   : > { %4114 = vmatmul.mubr.msk.bf16.vlgmr.msra.gmra.mxu1 %vm217_vm2, %v2253_v27  ;;  %4129 = vmatprep.subr.bf16.mxu0 %v4365_v2  ;;  %v2887_v27 = vshll.u32 %v3776_v16, 16  ;;  %v2769_v33 = vsel %vm473_vm4, %v2767_v22, %v2768_v23  ;;  %v3815_v16 = vld [vmem:[%s4448_s6 + $0x108] sm:$0xe] }
  0x93   : > { %4124 = vmatpush3.bf16.msra.mxu1 %v2374_v29  ;;  %4125 = vmatprep.mubr.msk.bf16.mxu1 %vm4366_vm1, %v4365_v2  ;;  %v2895_v29 = vshll.u32 %v4315_v18, 16  ;;  %v2886_v35 = vrot.slane %v2884_v26, 1  ;;  %v3816_v18 = vld [vmem:[%s5002_s1 + $0xbc] sm:$0xf] }
  0x94   : > { %4135 = vmatprep.subr.bf16.mxu1 %v4365_v2  ;;  %v2889_v36 = vrot.slane %v2887_v27, 2  ;;  %v3291_v23 = vsel %vm221_vm0, %v3816_v18, 0 }
  0x95   : > { %v2897_v38 = vrot.slane %v2895_v29, 2 }
  0x96   : > { %v2890_v44 = vor.u32 %v2889_v36, %v2886_v35 }
  0x97   : > { %v2898_v45 = vor.u32 %v2897_v38, %v2894_v37  ;;  %v3363_v38 = vsel %vm221_vm0, %v3820_v32, 0 }
  0x98   : > { %4120 = vmatmul.mubr.msk.bf16.vlgmr.msra.gmra.mxu0 %vm217_vm2, %v2311_v39  ;;  %v2904_v39 = vsel %vm221_vm0, %v3783_v31, 0  ;;  %v3285_v31 = vrot.slane %v4321_v59, 1 }
  0x99   : > { %4130 = vmatpush3.bf16.msra.mxu0 %v2446_v47  ;;  %4131 = vmatprep.mubr.msk.bf16.mxu0 %vm4366_vm1, %v4365_v2  ;;  %v3804_v47 = vld [vmem:[%s4448_s6 + $0x108] sm:$0xf]  ;;  %v2899_v53 = vsel %vm590_vm5, %v2890_v44, %v2898_v45 }
  0x9a   : > { %4126 = vmatmul.mubr.msk.bf16.vlgmr.msra.gmra.mxu1 %vm217_vm2, %v2369_v48  ;;  %4141 = vmatprep.subr.bf16.mxu0 %v4365_v2  ;;  %v4905_v48 = vld [vmem:[%s4448_s6 + $0x10c] sm:$0xf] }
  0x9b   : > { %4136 = vmatpush3.bf16.msra.mxu1 %v2507_v50  ;;  %4137 = vmatprep.mubr.msk.bf16.mxu1 %vm4366_vm1, %v4365_v2  ;;  %v3794_v50 = vld [vmem:[%s5002_s1 + $0xac] sm:$0xf]  ;;  %v3808_v54 = vcombine.low %v3804_v47, %v4905_v48  ;;  %v3817_v22 = vcombine.low %v3815_v16, %v4905_v48 }
  0x9c   : > { %4147 = vmatprep.subr.bf16.mxu1 %v4365_v2  ;;  %v3027_v55 = vsel %vm221_vm0, %v3794_v50, 0 }
  0x9d   : > { %v3162_v60 = vshll.u32 %v3808_v54, 16  ;;  %v3160_v5 = vshrl.u32 %v3808_v54, 16 }
  0x9f   : > { %v3164_v6 = vrot.slane %v3162_v60, 1 }
  0xa0   : > { %4132 = vmatmul.mubr.msk.bf16.vlgmr.msra.gmra.mxu0 %vm217_vm2, %v2441_v58  ;;  %v3800_v58 = vld [vmem:[%s5002_s1 + $0xb0] sm:$0xf] }
  0xa1   : > { %4142 = vmatpush3.bf16.msra.mxu0 %v2568_v62  ;;  %4143 = vmatprep.mubr.msk.bf16.mxu0 %vm4366_vm1, %v4365_v2  ;;  %v3807_v62 = vld [vmem:[%s5002_s1 + $0xb4] sm:$0xf]  ;;  %v3101_v4 = vsel %vm221_vm0, %v3800_v58, 0  ;;  %v3165_v12 = vor.u32 %v3164_v6, %v3160_v5 }
  0xa2   : > { %4138 = vmatmul.mubr.msk.bf16.vlgmr.msra.gmra.mxu1 %vm217_vm2, %v4307_v61  ;;  %4153 = vmatprep.subr.bf16.mxu0 %v4365_v2  ;;  %v4316_v61 = vld [vmem:[%s4448_s6 + $0x24] sm:$0xff]   ;;  %v3175_v8 = vsel %vm221_vm0, %v3807_v62, 0 }
  0xa3   : > { %4148 = vmatpush3.bf16.msra.mxu1 %v2642_v3  ;;  %4149 = vmatprep.mubr.msk.bf16.mxu1 %vm4366_vm1, %v4365_v2  ;;  %v4317_v3 = vld [vmem:[%s4448_s6 + $0x108] sm:$0xff]   ;;  %v3170_v21 = vsel %vm331_vm3, %v3165_v12, %v3169_v13 }
  0xa4   : > { %4159 = vmatprep.subr.bf16.mxu1 %v4365_v2 }
  0xa8   : > { %4144 = vmatmul.mubr.msk.bf16.vlgmr.msra.gmra.mxu0 %vm217_vm2, %v4308_v10  ;;  %v3095_v10 = vrot.slane %v3093_v1, 1 }
  0xa9   : > { %4154 = vmatpush3.bf16.msra.mxu0 %v2716_v15  ;;  %4155 = vmatprep.mubr.msk.bf16.mxu0 %vm4366_vm1, %v4365_v2  ;;  %v3813_v15 = vcombine.low %v3811_v11, %v3798_v43 }
  0xaa   : > { %4150 = vmatmul.mubr.msk.bf16.vlgmr.msra.gmra.mxu1 %vm217_vm2, %v2637_v17  ;;  %4165 = vmatprep.subr.bf16.mxu0 %v4365_v2  ;;  %v3096_v17 = vsel %vm331_vm3, %v3091_v9, %v3095_v10 }
  0xab   : > { %4160 = vmatpush3.bf16.msra.mxu1 %v2774_v19  ;;  %4161 = vmatprep.mubr.msk.bf16.mxu1 %vm4366_vm1, %v4365_v2  ;;  %v4324_v19 = vld [vmem:[%s4448_s6 + $0x2c] ss:$0 sps:$4 sm:$0x33]   ;;  %v3226_v24 = vrot.slane %v3813_v15, 1  ;;  %v3343_v26 = vshrl.u32 %v3813_v15, 16  ;;  %v3346_v27 = vshll.u32 %v3813_v15, 16 }
  0xac   : > { %4171 = vmatprep.subr.bf16.mxu1 %v4365_v2  ;;  %v3351_v28 = vshrl.u32 %v4324_v19, 16  ;;  %v3354_v29 = vshll.u32 %v4324_v19, 16 }
  0xad   : > { %v3348_v35 = vrot.slane %v3346_v27, 2 }
  0xae   : > { %v3353_v36 = vrot.slane %v3351_v28, 1  ;;  %v3356_v37 = vrot.slane %v3354_v29, 2 }
  0xb0   : > { %4156 = vmatmul.mubr.msk.bf16.vlgmr.msra.gmra.mxu0 %vm217_vm2, %v2711_v30  ;;  %v3284_v30 = vrot.slane %v3817_v22, 1  ;;  %v3357_v41 = vor.u32 %v3356_v37, %v3353_v36 }
  0xb1   : > { %4166 = vmatpush3.bf16.msra.mxu0 %v2832_v34  ;;  %4167 = vmatprep.mubr.msk.bf16.mxu0 %vm4366_vm1, %v4365_v2  ;;  %v3345_v34 = vrot.slane %v3343_v26, 1 }
  0xb2   : > { %4162 = vmatmul.mubr.msk.bf16.vlgmr.msra.gmra.mxu1 %vm217_vm2, %v2769_v33  ;;  %4177 = vmatprep.subr.bf16.mxu0 %v4365_v2  ;;  %v3228_v33 = vsel %vm473_vm4, %v3226_v24, %v3227_v25 }
  0xb3   : > { %4172 = vmatpush3.bf16.msra.mxu1 %v2904_v39  ;;  %4173 = vmatprep.mubr.msk.bf16.mxu1 %vm4366_vm1, %v4365_v2  ;;  %v3286_v39 = vsel %vm473_vm4, %v3284_v30, %v3285_v31  ;;  %v3349_v40 = vor.u32 %v3348_v35, %v3345_v34 }
  0xb4   : > { %4183 = vmatprep.subr.bf16.mxu1 %v4365_v2 }
  0xb5   : > { %v3358_v42 = vsel %vm590_vm5, %v3349_v40, %v3357_v41 }
  0xb8   : > { %4168 = vmatmul.mubr.msk.bf16.vlgmr.msra.gmra.mxu0 %vm217_vm2, %v2827_v49 }
  0xb9   : > { %4178 = vmatpush3.bf16.msra.mxu0 %v2966_v52  ;;  %4179 = vmatprep.mubr.msk.bf16.mxu0 %vm4366_vm1, %v4365_v2 }
  0xba   : > { %4174 = vmatmul.mubr.msk.bf16.vlgmr.msra.gmra.mxu1 %vm217_vm2, %v2899_v53  ;;  %4189 = vmatprep.subr.bf16.mxu0 %v4365_v2 }
  0xbb   : > { %4184 = vmatpush3.bf16.msra.mxu1 %v3027_v55  ;;  %4185 = vmatprep.mubr.msk.bf16.mxu1 %vm4366_vm1, %v4365_v2 }
  0xbc   : > { %4195 = vmatprep.subr.bf16.mxu1 %v4365_v2 }
  0xc0   : > { %4180 = vmatmul.mubr.msk.bf16.vlgmr.msra.gmra.mxu0 %vm217_vm2, %v4316_v61 }
  0xc1   : > { %4190 = vmatpush3.bf16.msra.mxu0 %v3101_v4  ;;  %4191 = vmatprep.mubr.msk.bf16.mxu0 %vm4366_vm1, %v4365_v2 }
  0xc2   : > { %4186 = vmatmul.mubr.msk.bf16.vlgmr.msra.gmra.mxu1 %vm217_vm2, %v4317_v3  ;;  %4201 = vmatprep.subr.bf16.mxu0 %v4365_v2 }
  0xc3   : > { %4196 = vmatpush3.bf16.msra.mxu1 %v3175_v8  ;;  %4197 = vmatprep.mubr.msk.bf16.mxu1 %vm4366_vm1, %v4365_v2 }
  0xc4   : > { %4207 = vmatprep.subr.bf16.mxu1 %v4365_v2 }
  0xc8   : > { %4192 = vmatmul.mubr.msk.bf16.vlgmr.msra.gmra.mxu0 %vm217_vm2, %v3096_v17 }
  0xc9   : > { %4202 = vmatpush3.bf16.msra.mxu0 %v3233_v20  ;;  %4203 = vmatprep.mubr.msk.bf16.mxu0 %vm4366_vm1, %v4365_v2 }
  0xca   : > { %4198 = vmatmul.mubr.msk.bf16.vlgmr.msra.gmra.mxu1 %vm217_vm2, %v3170_v21  ;;  %4213 = vmatprep.subr.bf16.mxu0 %v4365_v2 }
  0xcb   : > { %4208 = vmatpush3.bf16.msra.mxu1 %v3291_v23  ;;  %4209 = vmatprep.mubr.msk.bf16.mxu1 %vm4366_vm1, %v4365_v2 }
  0xd0   : > { %4204 = vmatmul.mubr.msk.bf16.vlgmr.msra.gmra.mxu0 %vm217_vm2, %v3228_v33 }
  0xd1   : > { %4214 = vmatpush3.bf16.msra.mxu0 %v3363_v38  ;;  %4215 = vmatprep.mubr.msk.bf16.mxu0 %vm4366_vm1, %v4365_v2 }
  0xd2   : > { %4210 = vmatmul.mubr.msk.bf16.vlgmr.msra.gmra.mxu1 %vm217_vm2, %v3286_v39 }
  0xd5   : > { %v259_v43 = vpop.f32.mrf.mxu0 }
  0xd6   : > { %v311_v44 = vpop.f32.mrf.mxu1 }
  0xd7   : > { %v312_v45 = vadd.f32 %v311_v44, %v259_v43  ;;  %v3929_v46 = vpop.f32.mrf.mxu0 }
  0xd8   : > { %4216 = vmatmul.mubr.msk.bf16.vlgmr.msra.gmra.mxu0 %vm217_vm2, %v3358_v42  ;;  %v3935_v47 = vpop.f32.mrf.mxu1 }
  0xd9   : > { %v262_v48 = vpop.f32.mrf.mxu0 }
  0xda   : > { %v314_v49 = vpop.f32.mrf.mxu1 }
  0xdb   : > { %v315_v50 = vadd.f32 %v314_v49, %v262_v48  ;;  %v3930_v51 = vpop.f32.mrf.mxu0 }
  0xdc   : > { %v3936_v52 = vpop.f32.mrf.mxu1 }
  0xe0   : > { %v384_v53 = vpop.f32.mrf.mxu0 }
  0xe1   : > { %v391_v2 = vadd.f32 %v384_v53, %v312_v45 }
  0xe2   : > { %v458_v54 = vpop.f32.mrf.mxu1  ;;  %v3941_v55 = vpop.f32.mrf.mxu0 }
  0xe3   : > { %v465_v56 = vadd.f32 %v458_v54, %v391_v2 }
  0xe4   : > { %v3947_v57 = vpop.f32.mrf.mxu1  ;;  %v387_v58 = vpop.f32.mrf.mxu0 }
  0xe5   : > { %v392_v59 = vadd.f32 %v387_v58, %v315_v50 }
  0xe6   : > { %v461_v60 = vpop.f32.mrf.mxu1  ;;  %v3942_v61 = vpop.f32.mrf.mxu0 }
  0xe7   : > { %v466_v62 = vadd.f32 %v461_v60, %v392_v59 }
  0xe8   : > { %v3948_v63 = vpop.f32.mrf.mxu1  ;;  %v517_v0 = vpop.f32.mrf.mxu0 }
  0xe9   : > { %v524_v1 = vadd.f32 %v517_v0, %v465_v56 }
  0xea   : > { %v575_v3 = vpop.f32.mrf.mxu1  ;;  %v3953_v4 = vpop.f32.mrf.mxu0 }
  0xeb   : > { %v582_v5 = vadd.f32 %v575_v3, %v524_v1 }
  0xec   : > { %v3959_v6 = vpop.f32.mrf.mxu1  ;;  %v520_v7 = vpop.f32.mrf.mxu0 }
  0xed   : > { %v525_v8 = vadd.f32 %v520_v7, %v466_v62 }
  0xee   : > { %v578_v9 = vpop.f32.mrf.mxu1  ;;  %v3954_v10 = vpop.f32.mrf.mxu0 }
  0xef   : > { %v583_v11 = vadd.f32 %v578_v9, %v525_v8 }
  0xf0   : > { %v3960_v12 = vpop.f32.mrf.mxu1  ;;  %v648_v13 = vpop.f32.mrf.mxu0 }
  0xf1   : > { %v655_v14 = vadd.f32 %v648_v13, %v582_v5 }
  0xf2   : > { %v709_v15 = vpop.f32.mrf.mxu1  ;;  %v3965_v16 = vpop.f32.mrf.mxu0 }
  0xf3   : > { %v716_v17 = vadd.f32 %v709_v15, %v655_v14 }
  0xf4   : > { %v3971_v18 = vpop.f32.mrf.mxu1  ;;  %v651_v19 = vpop.f32.mrf.mxu0 }
  0xf5   : > { %v656_v20 = vadd.f32 %v651_v19, %v583_v11 }
  0xf6   : > { %v712_v21 = vpop.f32.mrf.mxu1  ;;  %v3966_v22 = vpop.f32.mrf.mxu0 }
  0xf7   : > { %v717_v23 = vadd.f32 %v712_v21, %v656_v20 }
  0xf8   : > { %v3972_v24 = vpop.f32.mrf.mxu1  ;;  %v770_v25 = vpop.f32.mrf.mxu0 }
  0xf9   : > { %v777_v26 = vadd.f32 %v770_v25, %v716_v17 }
  0xfa   : > { %v844_v27 = vpop.f32.mrf.mxu1  ;;  %v3977_v28 = vpop.f32.mrf.mxu0 }
  0xfb   : > { %v851_v29 = vadd.f32 %v844_v27, %v777_v26 }
  0xfc   : > { %v3983_v30 = vpop.f32.mrf.mxu1  ;;  %v773_v31 = vpop.f32.mrf.mxu0 }
  0xfd   : > { %v778_v32 = vadd.f32 %v773_v31, %v717_v23 }
  0xfe   : > { %v847_v33 = vpop.f32.mrf.mxu1  ;;  %v3978_v34 = vpop.f32.mrf.mxu0 }
  0xff   : > { %v852_v35 = vadd.f32 %v847_v33, %v778_v32 }
 0x100   : > { %v3984_v36 = vpop.f32.mrf.mxu1  ;;  %v918_v37 = vpop.f32.mrf.mxu0 }
 0x101   : > { %v925_v38 = vadd.f32 %v918_v37, %v851_v29 }
 0x102   : > { %v976_v39 = vpop.f32.mrf.mxu1  ;;  %v3989_v40 = vpop.f32.mrf.mxu0 }
 0x103   : > { %v983_v41 = vadd.f32 %v976_v39, %v925_v38 }
 0x104   : > { %v3995_v42 = vpop.f32.mrf.mxu1  ;;  %v921_v43 = vpop.f32.mrf.mxu0 }
 0x105   : > { %v926_v44 = vadd.f32 %v921_v43, %v852_v35 }
 0x106   : > { %v979_v45 = vpop.f32.mrf.mxu1  ;;  %v3990_v46 = vpop.f32.mrf.mxu0 }
 0x107   : > { %v984_v47 = vadd.f32 %v979_v45, %v926_v44 }
 0x108   : > { %v3996_v48 = vpop.f32.mrf.mxu1  ;;  %v1034_v49 = vpop.f32.mrf.mxu0 }
 0x109   : > { %v1041_v50 = vadd.f32 %v1034_v49, %v983_v41 }
 0x10a   : > { %v1106_v51 = vpop.f32.mrf.mxu1  ;;  %v4001_v52 = vpop.f32.mrf.mxu0 }
 0x10b   : > { %v1113_v53 = vadd.f32 %v1106_v51, %v1041_v50 }
 0x10c   : > { %v4007_v2 = vpop.f32.mrf.mxu1  ;;  %v1037_v54 = vpop.f32.mrf.mxu0 }
 0x10d   : > { %v1042_v55 = vadd.f32 %v1037_v54, %v984_v47 }
 0x10e   : > { %v1109_v56 = vpop.f32.mrf.mxu1  ;;  %v4002_v57 = vpop.f32.mrf.mxu0 }
 0x10f   : > { %v1114_v58 = vadd.f32 %v1109_v56, %v1042_v55 }
 0x110   : > { %v4008_v59 = vpop.f32.mrf.mxu1  ;;  %v1168_v60 = vpop.f32.mrf.mxu0 }
 0x111   : > { %v1175_v61 = vadd.f32 %v1168_v60, %v1113_v53 }
 0x112   : > { %v1229_v62 = vpop.f32.mrf.mxu1  ;;  %v4013_v63 = vpop.f32.mrf.mxu0 }
 0x113   : > { %v1236_v0 = vadd.f32 %v1229_v62, %v1175_v61 }
 0x114   : > { %v4019_v1 = vpop.f32.mrf.mxu1  ;;  %v1171_v3 = vpop.f32.mrf.mxu0 }
 0x115   : > { %v1176_v4 = vadd.f32 %v1171_v3, %v1114_v58 }
 0x116   : > { %v1232_v5 = vpop.f32.mrf.mxu1  ;;  %v4014_v6 = vpop.f32.mrf.mxu0 }
 0x117   : > { %v1237_v7 = vadd.f32 %v1232_v5, %v1176_v4 }
 0x118   : > { %v4020_v8 = vpop.f32.mrf.mxu1  ;;  %v1303_v9 = vpop.f32.mrf.mxu0 }
 0x119   : > { %v1310_v10 = vadd.f32 %v1303_v9, %v1236_v0 }
 0x11a   : > { %v1377_v11 = vpop.f32.mrf.mxu1  ;;  %v4025_v12 = vpop.f32.mrf.mxu0 }
 0x11b   : > { %v1384_v13 = vadd.f32 %v1377_v11, %v1310_v10 }
 0x11c   : > { %v4031_v14 = vpop.f32.mrf.mxu1  ;;  %v1306_v15 = vpop.f32.mrf.mxu0 }
 0x11d   : > { %v1311_v16 = vadd.f32 %v1306_v15, %v1237_v7 }
 0x11e   : > { %v1380_v17 = vpop.f32.mrf.mxu1  ;;  %v4026_v18 = vpop.f32.mrf.mxu0 }
 0x11f   : > { %v1385_v19 = vadd.f32 %v1380_v17, %v1311_v16 }
 0x120   : > { %v4032_v20 = vpop.f32.mrf.mxu1  ;;  %v1435_v21 = vpop.f32.mrf.mxu0 }
 0x121   : > { %v1442_v52 = vadd.f32 %v1435_v21, %v1384_v13 }
 0x122   : > { %v1493_v22 = vpop.f32.mrf.mxu1  ;;  %v4037_v23 = vpop.f32.mrf.mxu0 }
 0x123   : > { %v1500_v56 = vadd.f32 %v1493_v22, %v1442_v52 }
 0x124   : > { %v4043_v24 = vpop.f32.mrf.mxu1  ;;  %v1438_v25 = vpop.f32.mrf.mxu0 }
 0x125   : > { %v1443_v57 = vadd.f32 %v1438_v25, %v1385_v19 }
 0x126   : > { %v1496_v26 = vpop.f32.mrf.mxu1  ;;  %v4038_v27 = vpop.f32.mrf.mxu0 }
 0x127   : > { %v1501_v63 = vadd.f32 %v1496_v26, %v1443_v57 }
 0x128   : > { %v4044_v28 = vpop.f32.mrf.mxu1  ;;  %v1565_v29 = vpop.f32.mrf.mxu0 }
 0x129   : > { %v1572_v60 = vadd.f32 %v1565_v29, %v1500_v56 }
 0x12a   : > { %v1626_v30 = vpop.f32.mrf.mxu1  ;;  %v4049_v31 = vpop.f32.mrf.mxu0 }
 0x12b   : > { %v1633_v3 = vadd.f32 %v1626_v30, %v1572_v60 }
 0x12c   : > { %v4055_v32 = vpop.f32.mrf.mxu1  ;;  %v1568_v33 = vpop.f32.mrf.mxu0 }
 0x12d   : > { %v1573_v4 = vadd.f32 %v1568_v33, %v1501_v63 }
 0x12e   : > { %v1629_v34 = vpop.f32.mrf.mxu1  ;;  %v4050_v35 = vpop.f32.mrf.mxu0 }
 0x12f   : > { %v1634_v10 = vadd.f32 %v1629_v34, %v1573_v4 }
 0x130   : > { %v4056_v36 = vpop.f32.mrf.mxu1  ;;  %v1687_v37 = vpop.f32.mrf.mxu0 }
 0x131   : > { %v1694_v7 = vadd.f32 %v1687_v37, %v1633_v3 }
 0x132   : > { %v1761_v38 = vpop.f32.mrf.mxu1  ;;  %v4061_v39 = vpop.f32.mrf.mxu0 }
 0x133   : > { %v1768_v13 = vadd.f32 %v1761_v38, %v1694_v7 }
 0x134   : > { %v4067_v40 = vpop.f32.mrf.mxu1  ;;  %v1690_v41 = vpop.f32.mrf.mxu0 }
 0x135   : > { %v1695_v14 = vadd.f32 %v1690_v41, %v1634_v10 }
 0x136   : > { %v1764_v42 = vpop.f32.mrf.mxu1  ;;  %v4062_v43 = vpop.f32.mrf.mxu0 }
 0x137   : > { %v1769_v20 = vadd.f32 %v1764_v42, %v1695_v14 }
 0x138   : > { %v4068_v44 = vpop.f32.mrf.mxu1  ;;  %v1835_v45 = vpop.f32.mrf.mxu0 }
 0x139   : > { %v1842_v17 = vadd.f32 %v1835_v45, %v1768_v13 }
 0x13a   : > { %v1893_v46 = vpop.f32.mrf.mxu1  ;;  %v4073_v47 = vpop.f32.mrf.mxu0 }
 0x13b   : > { %v1900_v23 = vadd.f32 %v1893_v46, %v1842_v17 }
 0x13c   : > { %v4079_v48 = vpop.f32.mrf.mxu1  ;;  %v1838_v49 = vpop.f32.mrf.mxu0 }
 0x13d   : > { %v1843_v24 = vadd.f32 %v1838_v49, %v1769_v20 }
 0x13e   : > { %v1896_v50 = vpop.f32.mrf.mxu1  ;;  %v4074_v51 = vpop.f32.mrf.mxu0 }
 0x13f   : > { %v1901_v30 = vadd.f32 %v1896_v50, %v1843_v24 }
 0x140   : > { %v4080_v53 = vpop.f32.mrf.mxu1  ;;  %v1951_v2 = vpop.f32.mrf.mxu0 }
 0x141   : > { %v1958_v27 = vadd.f32 %v1951_v2, %v1900_v23 }
 0x142   : > { %v2023_v54 = vpop.f32.mrf.mxu1  ;;  %v4085_v55 = vpop.f32.mrf.mxu0 }
 0x143   : > { %v2030_v33 = vadd.f32 %v2023_v54, %v1958_v27 }
 0x144   : > { %v4091_v58 = vpop.f32.mrf.mxu1  ;;  %v1954_v59 = vpop.f32.mrf.mxu0 }
 0x145   : > { %v1959_v34 = vadd.f32 %v1954_v59, %v1901_v30 }
 0x146   : > { %v2026_v61 = vpop.f32.mrf.mxu1  ;;  %v4086_v62 = vpop.f32.mrf.mxu0 }
 0x147   : > { %v2031_v40 = vadd.f32 %v2026_v61, %v1959_v34 }
 0x148   : > { %v4092_v0 = vpop.f32.mrf.mxu1  ;;  %v2085_v1 = vpop.f32.mrf.mxu0 }
 0x149   : > { %v2092_v37 = vadd.f32 %v2085_v1, %v2030_v33 }
 0x14a   : > { %v2146_v5 = vpop.f32.mrf.mxu1  ;;  %v4097_v6 = vpop.f32.mrf.mxu0 }
 0x14b   : > { %v2153_v43 = vadd.f32 %v2146_v5, %v2092_v37 }
 0x14c   : > { %v4103_v8 = vpop.f32.mrf.mxu1  ;;  %v2088_v9 = vpop.f32.mrf.mxu0 }
 0x14d   : > { %v2093_v44 = vadd.f32 %v2088_v9, %v2031_v40 }
 0x14e   : > { %v2149_v11 = vpop.f32.mrf.mxu1  ;;  %v4098_v12 = vpop.f32.mrf.mxu0 }
 0x14f   : > { %v2154_v50 = vadd.f32 %v2149_v11, %v2093_v44 }
 0x150   : > { %v4104_v15 = vpop.f32.mrf.mxu1  ;;  %v2220_v16 = vpop.f32.mrf.mxu0 }
 0x151   : > { %v2227_v47 = vadd.f32 %v2220_v16, %v2153_v43 }
 0x152   : > { %v2294_v18 = vpop.f32.mrf.mxu1  ;;  %v4109_v19 = vpop.f32.mrf.mxu0 }
 0x153   : > { %v2301_v53 = vadd.f32 %v2294_v18, %v2227_v47 }
 0x154   : > { %v4115_v21 = vpop.f32.mrf.mxu1  ;;  %v2223_v22 = vpop.f32.mrf.mxu0 }
 0x155   : > { %v2228_v2 = vadd.f32 %v2223_v22, %v2154_v50 }
 0x156   : > { %v2297_v25 = vpop.f32.mrf.mxu1  ;;  %v4110_v26 = vpop.f32.mrf.mxu0 }
 0x157   : > { %v2302_v59 = vadd.f32 %v2297_v25, %v2228_v2 }
 0x158   : > { %v4116_v28 = vpop.f32.mrf.mxu1  ;;  %v2352_v29 = vpop.f32.mrf.mxu0 }
 0x159   : > { %v2359_v56 = vadd.f32 %v2352_v29, %v2301_v53 }
 0x15a   : > { %v2410_v31 = vpop.f32.mrf.mxu1  ;;  %v4121_v32 = vpop.f32.mrf.mxu0 }
 0x15b   : > { %v2417_v62 = vadd.f32 %v2410_v31, %v2359_v56 }
 0x15c   : > { %v4127_v35 = vpop.f32.mrf.mxu1  ;;  %v2355_v36 = vpop.f32.mrf.mxu0 }
 0x15d   : > { %v2360_v63 = vadd.f32 %v2355_v36, %v2302_v59 }
 0x15e   : > { %v2413_v38 = vpop.f32.mrf.mxu1  ;;  %v4122_v39 = vpop.f32.mrf.mxu0 }
 0x15f   : > { %v2418_v6 = vadd.f32 %v2413_v38, %v2360_v63 }
 0x160   : > { %v4128_v41 = vpop.f32.mrf.mxu1  ;;  %v2482_v42 = vpop.f32.mrf.mxu0 }
 0x161   : > { %v2489_v3 = vadd.f32 %v2482_v42, %v2417_v62 }
 0x162   : > { %v2543_v45 = vpop.f32.mrf.mxu1  ;;  %v4133_v46 = vpop.f32.mrf.mxu0 }
 0x163   : > { %v2550_v9 = vadd.f32 %v2543_v45, %v2489_v3 }
 0x164   : > { %v4139_v48 = vpop.f32.mrf.mxu1  ;;  %v2485_v49 = vpop.f32.mrf.mxu0 }
 0x165   : > { %v2490_v10 = vadd.f32 %v2485_v49, %v2418_v6 }
 0x166   : > { %v2546_v51 = vpop.f32.mrf.mxu1  ;;  %v4134_v52 = vpop.f32.mrf.mxu0 }
 0x167   : > { %v2551_v16 = vadd.f32 %v2546_v51, %v2490_v10 }
 0x168   : > { %v4140_v54 = vpop.f32.mrf.mxu1  ;;  %v2604_v55 = vpop.f32.mrf.mxu0 }
 0x169   : > { %v2611_v13 = vadd.f32 %v2604_v55, %v2550_v9  ;;  %v3823_v9 = vld [vmem:[%s5003_s2] ss:$0 sm:$0xff] }
 0x16a   : > { %v2678_v57 = vpop.f32.mrf.mxu1  ;;  %v4145_v58 = vpop.f32.mrf.mxu0 }
 0x16b   : > { %v2685_v19 = vadd.f32 %v2678_v57, %v2611_v13 }
 0x16c   : > { %v4151_v60 = vpop.f32.mrf.mxu1  ;;  %v2607_v61 = vpop.f32.mrf.mxu0 }
 0x16d   : > { %v2612_v20 = vadd.f32 %v2607_v61, %v2551_v16 }
 0x16e   : > { %v2681_v0 = vpop.f32.mrf.mxu1  ;;  %v4146_v1 = vpop.f32.mrf.mxu0 }
 0x16f   : > { %v2686_v26 = vadd.f32 %v2681_v0, %v2612_v20 }
 0x170   : > { %v4152_v4 = vpop.f32.mrf.mxu1  ;;  %v2752_v5 = vpop.f32.mrf.mxu0 }
 0x171   : > { %v2759_v23 = vadd.f32 %v2752_v5, %v2685_v19 }
 0x172   : > { %v2810_v7 = vpop.f32.mrf.mxu1  ;;  %v4157_v8 = vpop.f32.mrf.mxu0 }
 0x173   : > { %v2817_v29 = vadd.f32 %v2810_v7, %v2759_v23 }
 0x174   : > { %v4163_v11 = vpop.f32.mrf.mxu1  ;;  %v2755_v12 = vpop.f32.mrf.mxu0 }
 0x175   : > { %v2760_v30 = vadd.f32 %v2755_v12, %v2686_v26 }
 0x176   : > { %v2813_v14 = vpop.f32.mrf.mxu1  ;;  %v4158_v15 = vpop.f32.mrf.mxu0 }
 0x177   : > { %v2818_v36 = vadd.f32 %v2813_v14, %v2760_v30 }
 0x178   : > { %v4164_v17 = vpop.f32.mrf.mxu1  ;;  %v2868_v18 = vpop.f32.mrf.mxu0 }
 0x179   : > { %v2875_v33 = vadd.f32 %v2868_v18, %v2817_v29 }
 0x17a   : > { %v2940_v21 = vpop.f32.mrf.mxu1  ;;  %v4169_v22 = vpop.f32.mrf.mxu0 }
 0x17b   : > { %v2947_v39 = vadd.f32 %v2940_v21, %v2875_v33 }
 0x17c   : > { %v4175_v24 = vpop.f32.mrf.mxu1  ;;  %v2871_v25 = vpop.f32.mrf.mxu0 }
 0x17d   : > { %v2876_v40 = vadd.f32 %v2871_v25, %v2818_v36 }
 0x17e   : > { %v2943_v27 = vpop.f32.mrf.mxu1  ;;  %v4170_v28 = vpop.f32.mrf.mxu0 }
 0x17f   : > { %v2948_v46 = vadd.f32 %v2943_v27, %v2876_v40 }
 0x180   : > { %v4176_v31 = vpop.f32.mrf.mxu1  ;;  %v3002_v32 = vpop.f32.mrf.mxu0 }
 0x181   : > { %v3009_v43 = vadd.f32 %v3002_v32, %v2947_v39 }
 0x182   : > { %v3063_v34 = vpop.f32.mrf.mxu1  ;;  %v4181_v35 = vpop.f32.mrf.mxu0 }
 0x183   : > { %v3070_v49 = vadd.f32 %v3063_v34, %v3009_v43 }
 0x184   : > { %v4187_v37 = vpop.f32.mrf.mxu1  ;;  %v3005_v38 = vpop.f32.mrf.mxu0 }
 0x185   : > { %v3010_v50 = vadd.f32 %v3005_v38, %v2948_v46 }
 0x186   : > { %v3066_v41 = vpop.f32.mrf.mxu1  ;;  %v4182_v42 = vpop.f32.mrf.mxu0 }
 0x187   : > { %v3071_v55 = vadd.f32 %v3066_v41, %v3010_v50 }
 0x188   : > { %v4188_v44 = vpop.f32.mrf.mxu1  ;;  %v3137_v45 = vpop.f32.mrf.mxu0 }
 0x189   : > { %v3144_v53 = vadd.f32 %v3137_v45, %v3070_v49 }
 0x18a   : > { %v3211_v47 = vpop.f32.mrf.mxu1  ;;  %v4193_v48 = vpop.f32.mrf.mxu0 }
 0x18b   : > { %v3218_v58 = vadd.f32 %v3211_v47, %v3144_v53 }
 0x18c   : > { %v4199_v51 = vpop.f32.mrf.mxu1  ;;  %v3140_v52 = vpop.f32.mrf.mxu0 }
 0x18d   : > { %v3145_v59 = vadd.f32 %v3140_v52, %v3071_v55 }
 0x18e   : > { %v3214_v2 = vpop.f32.mrf.mxu1  ;;  %v4194_v54 = vpop.f32.mrf.mxu0 }
 0x18f   : > { %v3219_v1 = vadd.f32 %v3214_v2, %v3145_v59 }
 0x190   : > { %v4200_v56 = vpop.f32.mrf.mxu1  ;;  %v3269_v57 = vpop.f32.mrf.mxu0 }
 0x191   : > { %v3276_v62 = vadd.f32 %v3269_v57, %v3218_v58 }
 0x192   : > { %v3327_v60 = vpop.f32.mrf.mxu1  ;;  %v4205_v61 = vpop.f32.mrf.mxu0 }
 0x193   : > { %v3334_v5 = vadd.f32 %v3327_v60, %v3276_v62 }
 0x194   : > { %v4211_v63 = vpop.f32.mrf.mxu1  ;;  %v3272_v0 = vpop.f32.mrf.mxu0 }
 0x195   : > { %v3277_v6 = vadd.f32 %v3272_v0, %v3219_v1 }
 0x196   : > { %v3330_v3 = vpop.f32.mrf.mxu1  ;;  %v4206_v4 = vpop.f32.mrf.mxu0 }
 0x197   : > { %v3335_v12 = vadd.f32 %v3330_v3, %v3277_v6 }
 0x198   : > { %v4212_v7 = vpop.f32.mrf.mxu1  ;;  %v3399_v8 = vpop.f32.mrf.mxu0 }
 0x199   : > { %v3406_v10 = vadd.f32 %v3399_v8, %v3334_v5 }
 0x19a   : > { %v4217_v11 = vpop.f32.mrf.mxu0 }
 0x19b   : > { %v3415_v13 = vadd.f32 %v3823_v9, %v3406_v10 }
 0x19c   : > { %v3402_v14 = vpop.f32.mrf.mxu0 }
 0x19d   : > { %v3417_v15 = vmax.f32 %v3415_v13, 0.0  ;;  %v3407_v16 = vadd.f32 %v3402_v14, %v3335_v12 }
 0x19e   : > { %v4218_v17 = vpop.f32.mrf.mxu0 }
 0x19f   : > { %3419 = vst [vmem:[%s197_s7] sm:$0xff] %v3417_v15  ;;  %v3416_v18 = vadd.f32 %v3823_v9, %v3407_v16 }
 0x1a1   : > { %v3418_v19 = vmax.f32 %v3416_v18, 0.0 }
 0x1a3   : > { %3420 = vst [vmem:[%s197_s7 + $0x8] sm:$0xff] %v3418_v19 }
 0x1a4 PF: > { %s13_s16 = sadd.s32 1, %s4363_s16   ;;  %s5005_s12 = smov %s4355_s14 }
 0x1a5   : > { %p10_p8 = scmp.ge.s32.totalorder %s13_s16, 34   ;;  %s5006_s13 = smov %s4359_s15 }
 0x1a6   : > { %s5007_s14 = smov %s5010_s17  ;;  %s5008_s15 = smov %s5014_s18 }
 0x1a7   :  { %12 = sbr.rel (!%p10_p8) target bundleno = 3 (0x3), region = 124 }

// kernel: msd_init_layer.6
= control target key start
LH: loop header
LB: loop body
LE: loop exit
PB: predicated region body
PF: predicated region fallthrough
CT: control target
= control target key end

     0   :  { %s1983_s12 = smov 0   ;;  %s1985_s13 = smov 0   ;;  %s2364_s0 = inlined_call_operand.vmem [shape: bf16[8,5,5,128], index: 0, kind: input, shape index: {}]   ;;  %s2365_s1 = inlined_call_operand.vmem [shape: bf16[9,128,128], index: 1, kind: input, shape index: {}]   ;;  %s2366_s2 = inlined_call_operand.vmem [shape: f32[1,128], index: 2, kind: input, shape index: {}]   ;;  %s2367_s3 = inlined_call_operand.vmem [shape: f32[2,4,4,128], index: 3, kind: output, shape index: {}]  }
   0x1   :  { %s1987_s14 = smov 0   ;;  %s1989_s15 = smov 0  }
   0x2   :  { %s1991_s16 = smov 0  }
   0x3 LB: > { %s22_s17 = sadd.s32 1, %s1951_s14  ;;  %s25_s18 = sadd.s32 1, %s1955_s15  ;;  %s1959_s16 = sphi %s1991_s16, %s13_s16   ;;  %s1955_s15 = sphi %s1989_s15, %s2371_s15   ;;  %s1951_s14 = sphi %s1987_s14, %s2370_s14   ;;  %s1947_s13 = sphi %s1985_s13, %s2369_s13   ;;  %s1943_s12 = sphi %s1983_s12, %s2368_s12  }
   0x4   : > { %p23_p0 = scmp.ge.s32.totalorder %s22_s17, 4  ;;  %p1318_p1 = scmp.ge.s32.totalorder %s1959_s16, 1 }
   0x5   : > { %p153_p2 = scmp.lt.s32.totalorder %s1959_s16, 9 }
   0x6   : > { %s2373_s17 = smov (%p23_p0, %s22_s17), 0  ;;  %s2375_s18 = smov (!%p23_p0, %s25_s18), %s1955_s15 }
   0x7   : > { %p154_p3 = pnand %p1318_p1, %p153_p2  ;;  %p27_p4 = scmp.ge.s32.totalorder %s2375_s18, 2 }
   0x8   : > { %s1319_s4 = sshll.u32 (!%p154_p3), %s1947_s13, 2  ;;  %s1323_s30 = sshll.u32 (!%p154_p3), %s1943_s12, 2 }
   0x9   : > { %s2377_s18 = smov (%p27_p4, %s2375_s18), 0  ;;  %157 = sbr.rel (%p154_p3) target bundleno = 375 (0x177), region = 32 }
   0xa   : > { %p182_p5 = scmp.lt.s32.totalorder (!%p154_p3), %s1319_s4, 7  ;;  %p188_p6 = scmp.lt.s32.totalorder (!%p154_p3), %s1947_s13, 1 }
   0xb   : > { %p190_p7 = scmp.lt.s32.totalorder (!%p154_p3), %s1943_s12, 3 }
   0xe   : > { %v1846_v0 = vld [vmem:[%s2365_s1 + $0x78] sm:$0xff]   ;;  %v1961_v1 = vmov 0.0   ;;  %v1848_v3 = vld [vmem:[%s2365_s1 + $0x70] sm:$0xff]   ;;  %vm1962_vm0 = vmmov 0   ;;  %v1850_v5 = vld [vmem:[%s2365_s1 + $0x68] sm:$0xff]   ;;  %s2379_s4 = smov (!%p182_p5, %s1319_s4), 7 }
   0xf   : > { %1623 = vmatprep.subr.bf16.mxu0 %v1961_v1  ;;  %1643 = vmatprep.subr.bf16.mxu1 %v1961_v1  ;;  %v1847_v2 = vld [vmem:[%s2365_s1 + $0x38] sm:$0xff]   ;;  %v1849_v4 = vld [vmem:[%s2365_s1 + $0x30] sm:$0xff]   ;;  %v1851_v6 = vld [vmem:[%s2365_s1 + $0x28] sm:$0xff]   ;;  %s1803_s22 = smul.u32 20, %s2379_s4  ;;  %s2381_s13 = smov (!%p188_p6, %s1947_s13), 1 }
  0x10   : > { %1624 = vmatpush3.bf16.msra.mxu0 %v1846_v0  ;;  %1639 = vmatprep.mubr.msk.bf16.mxu0 %vm1962_vm0, %v1961_v1  ;;  %v1852_v7 = vld [vmem:[%s2365_s1 + $0x60] sm:$0xff]   ;;  %v1854_v9 = vld [vmem:[%s2365_s1 + $0x58] sm:$0xff]   ;;  %v1856_v11 = vld [vmem:[%s2365_s1 + $0x50] sm:$0xff]   ;;  %s2383_s12 = smov (!%p190_p7, %s1943_s12), 3  ;;  %s1321_s8 = sshll.u32 %s2381_s13, 2 }
  0x11   : > { %1644 = vmatpush3.bf16.msra.mxu1 %v1847_v2  ;;  %1625 = vmatprep.subr.bf16.mxu0 %v1961_v1  ;;  %v1853_v8 = vld [vmem:[%s2365_s1 + $0x20] sm:$0xff]   ;;  %v1855_v10 = vld [vmem:[%s2365_s1 + $0x18] sm:$0xff]   ;;  %v1857_v12 = vld [vmem:[%s2365_s1 + $0x10] sm:$0xff]   ;;  %s186_s29 = scalar_lea.vmem %s2364_s0, %s1803_s22  ;;  %s193_s9 = sadd.s32 %s1321_s8, %s2383_s12 }
  0x12   : > { %1645 = vmatprep.subr.bf16.mxu1 %v1961_v1  ;;  %1659 = vmatprep.mubr.msk.bf16.mxu1 %vm1962_vm0, %v1961_v1  ;;  %v1858_v13 = vld [vmem:[%s2365_s1 + $0x48] sm:$0xff]   ;;  %s2082_s6 = scalar_lea.vmem %s186_s29, %s1323_s30  ;;  %v1860_v15 = vld [vmem:[%s2365_s1 + $0x40] sm:$0xff]   ;;  %v1862_v19 = vld [vmem:[%s2365_s1 + $0xb8] sm:$0xff]   ;;  %s1322_s19 = sshll.u32 %s193_s9, 2 }
  0x13   : > { %v1859_v14 = vld [vmem:[%s2365_s1 + $0x8] sm:$0xff]   ;;  %v1861_v16 = vld [vmem:[%s2365_s1] sm:$0xff]   ;;  %v1325_v17 = vld [vmem:[%s2082_s6 + $0x14] sm:$0x3]  ;;  %s195_s22 = scalar_lea.vmem %s2367_s3, %s1322_s19 }
  0x14   : > { %1626 = vmatpush3.bf16.msra.mxu0 %v1848_v3  ;;  %v199_v18 = vld [vmem:[%s2082_s6] sm:$0x3]  ;;  %v1863_v20 = vld [vmem:[%s2365_s1 + $0xf8] sm:$0xff]   ;;  %v1864_v21 = vld [vmem:[%s2365_s1 + $0xb0] sm:$0xff]  }
  0x15   : > { %1646 = vmatpush3.bf16.msra.mxu1 %v1849_v4  ;;  %1627 = vmatprep.subr.bf16.mxu0 %v1961_v1  ;;  %v1865_v22 = vld [vmem:[%s2365_s1 + $0xf0] sm:$0xff]   ;;  %v1866_v23 = vld [vmem:[%s2365_s1 + $0xa8] sm:$0xff]   ;;  %v1868_v25 = vld [vmem:[%s2365_s1 + $0xa0] sm:$0xff]  }
  0x16   : > { %1647 = vmatprep.subr.bf16.mxu1 %v1961_v1  ;;  %v1867_v24 = vld [vmem:[%s2365_s1 + $0xe8] sm:$0xff]   ;;  %v1869_v26 = vld [vmem:[%s2365_s1 + $0xe0] sm:$0xff]   ;;  %v1870_v27 = vld [vmem:[%s2365_s1 + $0x98] sm:$0xff]  }
  0x17   : > { %v1871_v28 = vld [vmem:[%s2365_s1 + $0xd8] sm:$0xff]   ;;  %v1878_v29 = vld [vmem:[%s2082_s6] ss:$0 sps:$4 sm:$0x77]   ;;  %v1872_v30 = vld [vmem:[%s2365_s1 + $0x90] sm:$0xff]  }
  0x18   : > { %1628 = vmatpush3.bf16.msra.mxu0 %v1850_v5  ;;  %v1873_v31 = vld [vmem:[%s2365_s1 + $0xd0] sm:$0xff]   ;;  %v1874_v32 = vld [vmem:[%s2365_s1 + $0x88] sm:$0xff]   ;;  %v437_v33 = vshll.u32 %v1878_v29, 16  ;;  %v435_v35 = vshrl.u32 %v1878_v29, 16  ;;  %v1876_v37 = vld [vmem:[%s2365_s1 + $0x80] sm:$0xff]  }
  0x19   : > { %1648 = vmatpush3.bf16.msra.mxu1 %v1851_v6  ;;  %1629 = vmatprep.subr.bf16.mxu0 %v1961_v1  ;;  %v1875_v34 = vld [vmem:[%s2365_s1 + $0xc8] sm:$0xff]   ;;  %v1877_v38 = vld [vmem:[%s2365_s1 + $0xc0] sm:$0xff]   ;;  %v1879_v40 = vld [vmem:[%s2365_s1 + $0x138] sm:$0xff]  }
  0x1a   : > { %1649 = vmatprep.subr.bf16.mxu1 %v1961_v1  ;;  %v439_v36 = vrot.slane %v437_v33, 1  ;;  %v1384_v41 = vld [vmem:[%s2082_s6 + $0x28] sm:$0x3]  ;;  %v1880_v42 = vld [vmem:[%s2365_s1 + $0x178] sm:$0xff]   ;;  %v1881_v43 = vld [vmem:[%s2365_s1 + $0x130] sm:$0xff]  }
  0x1b   : > { %v1882_v44 = vld [vmem:[%s2365_s1 + $0x170] sm:$0xff]   ;;  %v1883_v45 = vld [vmem:[%s2365_s1 + $0x128] sm:$0xff]   ;;  %v1885_v47 = vld [vmem:[%s2365_s1 + $0x120] sm:$0xff]  }
  0x1c   : > { %1630 = vmatpush3.bf16.msra.mxu0 %v1852_v7  ;;  %v440_v39 = vor.u32 %v439_v36, %v435_v35  ;;  %v1884_v46 = vld [vmem:[%s2365_s1 + $0x168] sm:$0xff]   ;;  %v1886_v48 = vld [vmem:[%s2365_s1 + $0x160] sm:$0xff]   ;;  %v1887_v49 = vld [vmem:[%s2365_s1 + $0x118] sm:$0xff]  }
  0x1d   : > { %1650 = vmatpush3.bf16.msra.mxu1 %v1853_v8  ;;  %1631 = vmatprep.subr.bf16.mxu0 %v1961_v1  ;;  %v1888_v50 = vld [vmem:[%s2365_s1 + $0x158] sm:$0xff]   ;;  %v1889_v51 = vld [vmem:[%s2365_s1 + $0x110] sm:$0xff]   ;;  %v1896_v52 = vld [vmem:[%s2082_s6 + $0x28] ss:$0 sps:$4 sm:$0x77]  }
  0x1e   : > { %1651 = vmatprep.subr.bf16.mxu1 %v1961_v1  ;;  %v1890_v53 = vld [vmem:[%s2365_s1 + $0x150] sm:$0xff]   ;;  %v1891_v54 = vld [vmem:[%s2365_s1 + $0x108] sm:$0xff]   ;;  %v775_v55 = vshll.u32 %v1896_v52, 16  ;;  %v1893_v57 = vld [vmem:[%s2365_s1 + $0x100] sm:$0xff]   ;;  %v773_v58 = vshrl.u32 %v1896_v52, 16 }
  0x1f   : > { %v1892_v56 = vld [vmem:[%s2365_s1 + $0x148] sm:$0xff]   ;;  %v1894_v60 = vld [vmem:[%s2365_s1 + $0x140] sm:$0xff]   ;;  %v1410_v61 = vld [vmem:[%s2082_s6 + $0x3c] sm:$0x3] }
  0x20   : > { %1632 = vmatpush3.bf16.msra.mxu0 %v1854_v9  ;;  %v777_v59 = vrot.slane %v775_v55, 1  ;;  %v1895_v62 = vld [vmem:[%s2365_s1 + $0x1b8] sm:$0xff]   ;;  %v1898_v2 = vld [vmem:[%s2365_s1 + $0x1b0] sm:$0xff]   ;;  %v1900_v4 = vld [vmem:[%s2365_s1 + $0x1a8] sm:$0xff]  }
  0x21   : > { %1652 = vmatpush3.bf16.msra.mxu1 %v1855_v10  ;;  %1633 = vmatprep.subr.bf16.mxu0 %v1961_v1  ;;  %v1897_v0 = vld [vmem:[%s2365_s1 + $0x1f8] sm:$0xff]   ;;  %v1899_v3 = vld [vmem:[%s2365_s1 + $0x1f0] sm:$0xff]   ;;  %v1901_v5 = vld [vmem:[%s2365_s1 + $0x1e8] sm:$0xff]  }
  0x22   : > { %1653 = vmatprep.subr.bf16.mxu1 %v1961_v1  ;;  %v778_v63 = vor.u32 %v777_v59, %v773_v58  ;;  %v1902_v6 = vld [vmem:[%s2365_s1 + $0x1a0] sm:$0xff]   ;;  %v1904_v8 = vld [vmem:[%s2365_s1 + $0x198] sm:$0xff]   ;;  %v1906_v10 = vld [vmem:[%s2365_s1 + $0x190] sm:$0xff]  }
  0x23   : > { %v1903_v7 = vld [vmem:[%s2365_s1 + $0x1e0] sm:$0xff]   ;;  %v1905_v9 = vld [vmem:[%s2365_s1 + $0x1d8] sm:$0xff]  }
  0x24   : > { %1634 = vmatpush3.bf16.msra.mxu0 %v1856_v11  ;;  %v1907_v11 = vld [vmem:[%s2365_s1 + $0x1d0] sm:$0xff]   ;;  %v1919_v29 = vld [vmem:[%s2365_s1 + $0x200] sm:$0xff]  }
  0x25   : > { %1654 = vmatpush3.bf16.msra.mxu1 %v1857_v12  ;;  %1635 = vmatprep.subr.bf16.mxu0 %v1961_v1  ;;  %v1908_v12 = vld [vmem:[%s2365_s1 + $0x188] sm:$0xff]  }
  0x26   : > { %1655 = vmatprep.subr.bf16.mxu1 %v1961_v1 }
  0x28   : > { %1636 = vmatpush3.bf16.msra.mxu0 %v1858_v13  ;;  %v1909_v13 = vld [vmem:[%s2365_s1 + $0x1c8] sm:$0xff]  }
  0x29   : > { %1656 = vmatpush3.bf16.msra.mxu1 %v1859_v14  ;;  %1637 = vmatprep.subr.bf16.mxu0 %v1961_v1  ;;  %v1910_v14 = vld [vmem:[%s2365_s1 + $0x180] sm:$0xff]  }
  0x2a   : > { %1657 = vmatprep.subr.bf16.mxu1 %v1961_v1 }
  0x2c   : > { %1638 = vmatpush3.bf16.msra.mxu0 %v1860_v15  ;;  %v1911_v15 = vld [vmem:[%s2365_s1 + $0x1c0] sm:$0xff]  }
  0x2d   : > { %1658 = vmatpush3.bf16.msra.mxu1 %v1861_v16  ;;  %1663 = vmatprep.subr.bf16.mxu0 %v1961_v1  ;;  %v1462_v16 = vld [vmem:[%s2082_s6 + $0x4] sm:$0x3] }
  0x2e   : > { %1683 = vmatprep.subr.bf16.mxu1 %v1961_v1 }
  0x2f   : > { %1640 = vmatmul.mubr.bf16.vlgmr.msra.gmra.mxu0 %v1325_v17  ;;  %v1912_v17 = vld [vmem:[%s2365_s1 + $0x238] sm:$0xff]  }
  0x30   : > { %1660 = vmatmul.mubr.bf16.vlgmr.msra.gmra.mxu1 %v199_v18  ;;  %1664 = vmatpush3.bf16.msra.mxu0 %v1862_v19  ;;  %v1488_v18 = vld [vmem:[%s2082_s6 + $0x18] sm:$0x3]  ;;  %v1913_v19 = vld [vmem:[%s2365_s1 + $0x230] sm:$0xff]  }
  0x31   : > { %1684 = vmatpush3.bf16.msra.mxu1 %v1863_v20  ;;  %1665 = vmatprep.subr.bf16.mxu0 %v1961_v1  ;;  %v1914_v20 = vld [vmem:[%s2365_s1 + $0x228] sm:$0xff]  }
  0x32   : > { %1685 = vmatprep.subr.bf16.mxu1 %v1961_v1  ;;  %1679 = vmatprep.mubr.msk.bf16.mxu0 %vm1962_vm0, %v1961_v1 }
  0x33   : > { %1699 = vmatprep.mubr.msk.bf16.mxu1 %vm1962_vm0, %v1961_v1 }
  0x34   : > { %1666 = vmatpush3.bf16.msra.mxu0 %v1864_v21  ;;  %v1915_v21 = vld [vmem:[%s2365_s1 + $0x220] sm:$0xff]  }
  0x35   : > { %1686 = vmatpush3.bf16.msra.mxu1 %v1865_v22  ;;  %1667 = vmatprep.subr.bf16.mxu0 %v1961_v1  ;;  %v1916_v22 = vld [vmem:[%s2365_s1 + $0x218] sm:$0xff]  }
  0x36   : > { %1687 = vmatprep.subr.bf16.mxu1 %v1961_v1 }
  0x38   : > { %1668 = vmatpush3.bf16.msra.mxu0 %v1866_v23  ;;  %v1920_v23 = vld [vmem:[%s2082_s6 + $0x4] ss:$0 sps:$4 sm:$0x77]  }
  0x39   : > { %1688 = vmatpush3.bf16.msra.mxu1 %v1867_v24  ;;  %1669 = vmatprep.subr.bf16.mxu0 %v1961_v1  ;;  %v1917_v24 = vld [vmem:[%s2365_s1 + $0x210] sm:$0xff]  }
  0x3a   : > { %1689 = vmatprep.subr.bf16.mxu1 %v1961_v1 }
  0x3c   : > { %1670 = vmatpush3.bf16.msra.mxu0 %v1868_v25  ;;  %v1113_v25 = vshll.u32 %v1920_v23, 16 }
  0x3d   : > { %1690 = vmatpush3.bf16.msra.mxu1 %v1869_v26  ;;  %1671 = vmatprep.subr.bf16.mxu0 %v1961_v1  ;;  %v1918_v26 = vld [vmem:[%s2365_s1 + $0x208] sm:$0xff]  }
  0x3e   : > { %1691 = vmatprep.subr.bf16.mxu1 %v1961_v1 }
  0x40   : > { %1672 = vmatpush3.bf16.msra.mxu0 %v1870_v27  ;;  %v1111_v27 = vshrl.u32 %v1920_v23, 16 }
  0x41   : > { %1692 = vmatpush3.bf16.msra.mxu1 %v1871_v28  ;;  %1673 = vmatprep.subr.bf16.mxu0 %v1961_v1  ;;  %v1115_v28 = vrot.slane %v1113_v25, 1 }
  0x42   : > { %1693 = vmatprep.subr.bf16.mxu1 %v1961_v1 }
  0x44   : > { %1674 = vmatpush3.bf16.msra.mxu0 %v1872_v30  ;;  %v1116_v30 = vor.u32 %v1115_v28, %v1111_v27 }
  0x45   : > { %1694 = vmatpush3.bf16.msra.mxu1 %v1873_v31  ;;  %1675 = vmatprep.subr.bf16.mxu0 %v1961_v1 }
  0x46   : > { %1695 = vmatprep.subr.bf16.mxu1 %v1961_v1 }
  0x48   : > { %1676 = vmatpush3.bf16.msra.mxu0 %v1874_v32 }
  0x49   : > { %1696 = vmatpush3.bf16.msra.mxu1 %v1875_v34  ;;  %1677 = vmatprep.subr.bf16.mxu0 %v1961_v1 }
  0x4a   : > { %1697 = vmatprep.subr.bf16.mxu1 %v1961_v1 }
  0x4c   : > { %1678 = vmatpush3.bf16.msra.mxu0 %v1876_v37 }
  0x4d   : > { %1698 = vmatpush3.bf16.msra.mxu1 %v1877_v38  ;;  %1703 = vmatprep.subr.bf16.mxu0 %v1961_v1 }
  0x4e   : > { %1723 = vmatprep.subr.bf16.mxu1 %v1961_v1 }
  0x4f   : > { %1680 = vmatmul.mubr.bf16.vlgmr.msra.gmra.mxu0 %v440_v39 }
  0x50   : > { %1704 = vmatpush3.bf16.msra.mxu0 %v1879_v40  ;;  %1700 = vmatmul.mubr.bf16.vlgmr.msra.gmra.mxu1 %v1384_v41 }
  0x51   : > { %1724 = vmatpush3.bf16.msra.mxu1 %v1880_v42  ;;  %1705 = vmatprep.subr.bf16.mxu0 %v1961_v1 }
  0x52   : > { %1725 = vmatprep.subr.bf16.mxu1 %v1961_v1  ;;  %1719 = vmatprep.mubr.msk.bf16.mxu0 %vm1962_vm0, %v1961_v1 }
  0x53   : > { %1739 = vmatprep.mubr.msk.bf16.mxu1 %vm1962_vm0, %v1961_v1 }
  0x54   : > { %1706 = vmatpush3.bf16.msra.mxu0 %v1881_v43 }
  0x55   : > { %1726 = vmatpush3.bf16.msra.mxu1 %v1882_v44  ;;  %1707 = vmatprep.subr.bf16.mxu0 %v1961_v1 }
  0x56   : > { %1727 = vmatprep.subr.bf16.mxu1 %v1961_v1 }
  0x58   : > { %1708 = vmatpush3.bf16.msra.mxu0 %v1883_v45 }
  0x59   : > { %1728 = vmatpush3.bf16.msra.mxu1 %v1884_v46  ;;  %1709 = vmatprep.subr.bf16.mxu0 %v1961_v1 }
  0x5a   : > { %1729 = vmatprep.subr.bf16.mxu1 %v1961_v1 }
  0x5c   : > { %1710 = vmatpush3.bf16.msra.mxu0 %v1885_v47 }
  0x5d   : > { %1730 = vmatpush3.bf16.msra.mxu1 %v1886_v48  ;;  %1711 = vmatprep.subr.bf16.mxu0 %v1961_v1 }
  0x5e   : > { %1731 = vmatprep.subr.bf16.mxu1 %v1961_v1 }
  0x60   : > { %1712 = vmatpush3.bf16.msra.mxu0 %v1887_v49 }
  0x61   : > { %1732 = vmatpush3.bf16.msra.mxu1 %v1888_v50  ;;  %1713 = vmatprep.subr.bf16.mxu0 %v1961_v1 }
  0x62   : > { %1733 = vmatprep.subr.bf16.mxu1 %v1961_v1 }
  0x64   : > { %1714 = vmatpush3.bf16.msra.mxu0 %v1889_v51 }
  0x65   : > { %1734 = vmatpush3.bf16.msra.mxu1 %v1890_v53  ;;  %1715 = vmatprep.subr.bf16.mxu0 %v1961_v1 }
  0x66   : > { %1735 = vmatprep.subr.bf16.mxu1 %v1961_v1 }
  0x68   : > { %1716 = vmatpush3.bf16.msra.mxu0 %v1891_v54 }
  0x69   : > { %1736 = vmatpush3.bf16.msra.mxu1 %v1892_v56  ;;  %1717 = vmatprep.subr.bf16.mxu0 %v1961_v1 }
  0x6a   : > { %1737 = vmatprep.subr.bf16.mxu1 %v1961_v1 }
  0x6c   : > { %1718 = vmatpush3.bf16.msra.mxu0 %v1893_v57 }
  0x6d   : > { %1738 = vmatpush3.bf16.msra.mxu1 %v1894_v60  ;;  %1743 = vmatprep.subr.bf16.mxu0 %v1961_v1 }
  0x6e   : > { %1763 = vmatprep.subr.bf16.mxu1 %v1961_v1 }
  0x6f   : > { %1720 = vmatmul.mubr.bf16.vlgmr.msra.gmra.mxu0 %v1410_v61 }
  0x70   : > { %1744 = vmatpush3.bf16.msra.mxu0 %v1895_v62  ;;  %1740 = vmatmul.mubr.bf16.vlgmr.msra.gmra.mxu1 %v778_v63 }
  0x71   : > { %1764 = vmatpush3.bf16.msra.mxu1 %v1897_v0  ;;  %1745 = vmatprep.subr.bf16.mxu0 %v1961_v1 }
  0x72   : > { %1765 = vmatprep.subr.bf16.mxu1 %v1961_v1  ;;  %1759 = vmatprep.mubr.msk.bf16.mxu0 %vm1962_vm0, %v1961_v1 }
  0x73   : > { %1779 = vmatprep.mubr.msk.bf16.mxu1 %vm1962_vm0, %v1961_v1 }
  0x74   : > { %1746 = vmatpush3.bf16.msra.mxu0 %v1898_v2 }
  0x75   : > { %1766 = vmatpush3.bf16.msra.mxu1 %v1899_v3  ;;  %1747 = vmatprep.subr.bf16.mxu0 %v1961_v1 }
  0x76   : > { %1767 = vmatprep.subr.bf16.mxu1 %v1961_v1 }
  0x78   : > { %1748 = vmatpush3.bf16.msra.mxu0 %v1900_v4 }
  0x79   : > { %1768 = vmatpush3.bf16.msra.mxu1 %v1901_v5  ;;  %1749 = vmatprep.subr.bf16.mxu0 %v1961_v1 }
  0x7a   : > { %1769 = vmatprep.subr.bf16.mxu1 %v1961_v1 }
  0x7c   : > { %1750 = vmatpush3.bf16.msra.mxu0 %v1902_v6 }
  0x7d   : > { %1770 = vmatpush3.bf16.msra.mxu1 %v1903_v7  ;;  %1751 = vmatprep.subr.bf16.mxu0 %v1961_v1  ;;  %v1539_v7 = vld [vmem:[%s2366_s2] ss:$0 sm:$0xff] }
  0x7e   : > { %1771 = vmatprep.subr.bf16.mxu1 %v1961_v1 }
  0x80   : > { %1752 = vmatpush3.bf16.msra.mxu0 %v1904_v8 }
  0x81   : > { %1772 = vmatpush3.bf16.msra.mxu1 %v1905_v9  ;;  %1753 = vmatprep.subr.bf16.mxu0 %v1961_v1 }
  0x82   : > { %1773 = vmatprep.subr.bf16.mxu1 %v1961_v1 }
  0x84   : > { %1754 = vmatpush3.bf16.msra.mxu0 %v1906_v10 }
  0x85   : > { %1774 = vmatpush3.bf16.msra.mxu1 %v1907_v11  ;;  %1755 = vmatprep.subr.bf16.mxu0 %v1961_v1 }
  0x86   : > { %1775 = vmatprep.subr.bf16.mxu1 %v1961_v1 }
  0x88   : > { %1756 = vmatpush3.bf16.msra.mxu0 %v1908_v12 }
  0x89   : > { %1776 = vmatpush3.bf16.msra.mxu1 %v1909_v13  ;;  %1757 = vmatprep.subr.bf16.mxu0 %v1961_v1 }
  0x8a   : > { %1777 = vmatprep.subr.bf16.mxu1 %v1961_v1 }
  0x8c   : > { %1758 = vmatpush3.bf16.msra.mxu0 %v1910_v14 }
  0x8d   : > { %1778 = vmatpush3.bf16.msra.mxu1 %v1911_v15  ;;  %1783 = vmatprep.subr.bf16.mxu0 %v1961_v1 }
  0x8f   : > { %1760 = vmatmul.mubr.bf16.vlgmr.msra.gmra.mxu0 %v1462_v16 }
  0x90   : > { %1784 = vmatpush3.bf16.msra.mxu0 %v1912_v17  ;;  %1780 = vmatmul.mubr.bf16.vlgmr.msra.gmra.mxu1 %v1488_v18 }
  0x91   : > { %1785 = vmatprep.subr.bf16.mxu0 %v1961_v1  ;;  %1799 = vmatprep.mubr.msk.bf16.mxu0 %vm1962_vm0, %v1961_v1 }
  0x94   : > { %1786 = vmatpush3.bf16.msra.mxu0 %v1913_v19 }
  0x95   : > { %1787 = vmatprep.subr.bf16.mxu0 %v1961_v1 }
  0x98   : > { %1788 = vmatpush3.bf16.msra.mxu0 %v1914_v20 }
  0x99   : > { %1789 = vmatprep.subr.bf16.mxu0 %v1961_v1 }
  0x9c   : > { %1790 = vmatpush3.bf16.msra.mxu0 %v1915_v21 }
  0x9d   : > { %1791 = vmatprep.subr.bf16.mxu0 %v1961_v1 }
  0xa0   : > { %1792 = vmatpush3.bf16.msra.mxu0 %v1916_v22 }
  0xa1   : > { %1793 = vmatprep.subr.bf16.mxu0 %v1961_v1 }
  0xa4   : > { %1794 = vmatpush3.bf16.msra.mxu0 %v1917_v24 }
  0xa5   : > { %1795 = vmatprep.subr.bf16.mxu0 %v1961_v1 }
  0xa8   : > { %1796 = vmatpush3.bf16.msra.mxu0 %v1918_v26 }
  0xa9   : > { %1797 = vmatprep.subr.bf16.mxu0 %v1961_v1 }
  0xac   : > { %1798 = vmatpush3.bf16.msra.mxu0 %v1919_v29 }
  0xaf   : > { %1800 = vmatmul.mubr.bf16.vlgmr.msra.gmra.mxu0 %v1116_v30 }
  0xef   : > { %v319_v31 = vpop.f32.mrf.mxu0 }
  0xf0   : > { %v407_v32 = vpop.f32.mrf.mxu1 }
  0xf1   : > { %v408_v33 = vadd.f32 %v407_v32, %v319_v31  ;;  %v1641_v34 = vpop.f32.mrf.mxu0 }
  0xf2   : > { %v1661_v35 = vpop.f32.mrf.mxu1 }
  0xf3   : > { %v322_v36 = vpop.f32.mrf.mxu0 }
  0xf4   : > { %v410_v37 = vpop.f32.mrf.mxu1 }
  0xf5   : > { %v1642_v38 = vpop.f32.mrf.mxu0 }
  0xf6   : > { %v1662_v39 = vpop.f32.mrf.mxu1 }
 0x10f   : > { %v524_v40 = vpop.f32.mrf.mxu0 }
 0x110   : > { %v530_v41 = vadd.f32 %v524_v40, %v408_v33  ;;  %v634_v42 = vpop.f32.mrf.mxu1 }
 0x111   : > { %v1681_v43 = vpop.f32.mrf.mxu0 }
 0x112   : > { %v640_v44 = vadd.f32 %v634_v42, %v530_v41  ;;  %v1701_v45 = vpop.f32.mrf.mxu1 }
 0x113   : > { %v527_v46 = vpop.f32.mrf.mxu0 }
 0x114   : > { %v637_v1 = vpop.f32.mrf.mxu1 }
 0x115   : > { %v1682_v47 = vpop.f32.mrf.mxu0 }
 0x116   : > { %v1702_v48 = vpop.f32.mrf.mxu1 }
 0x12f   : > { %v744_v49 = vpop.f32.mrf.mxu0 }
 0x130   : > { %v862_v50 = vpop.f32.mrf.mxu1  ;;  %v750_v2 = vadd.f32 %v744_v49, %v640_v44 }
 0x131   : > { %v1721_v51 = vpop.f32.mrf.mxu0 }
 0x132   : > { %v1741_v52 = vpop.f32.mrf.mxu1  ;;  %v868_v3 = vadd.f32 %v862_v50, %v750_v2 }
 0x133   : > { %v747_v53 = vpop.f32.mrf.mxu0 }
 0x134   : > { %v865_v54 = vpop.f32.mrf.mxu1 }
 0x135   : > { %v1722_v55 = vpop.f32.mrf.mxu0 }
 0x136   : > { %v1742_v56 = vpop.f32.mrf.mxu1 }
 0x14f   : > { %v972_v57 = vpop.f32.mrf.mxu0 }
 0x150   : > { %v1082_v58 = vpop.f32.mrf.mxu1  ;;  %v978_v4 = vadd.f32 %v972_v57, %v868_v3 }
 0x151   : > { %v1761_v59 = vpop.f32.mrf.mxu0 }
 0x152   : > { %v1781_v60 = vpop.f32.mrf.mxu1  ;;  %v1088_v5 = vadd.f32 %v1082_v58, %v978_v4 }
 0x153   : > { %v975_v61 = vpop.f32.mrf.mxu0 }
 0x154   : > { %v1085_v62 = vpop.f32.mrf.mxu1 }
 0x155   : > { %v1762_v63 = vpop.f32.mrf.mxu0 }
 0x156   : > { %v1782_v0 = vpop.f32.mrf.mxu1 }
 0x16f   : > { %v1200_v6 = vpop.f32.mrf.mxu0 }
 0x170   : > { %v1206_v8 = vadd.f32 %v1200_v6, %v1088_v5 }
 0x171   : > { %v1801_v9 = vpop.f32.mrf.mxu0 }
 0x172   : > { %v1214_v10 = vadd.f32 %v1539_v7, %v1206_v8 }
 0x173   : > { %v1203_v11 = vpop.f32.mrf.mxu0 }
 0x174   : > { %v1215_v12 = vmax.f32 %v1214_v10, 0.0 }
 0x175   : > { %v1802_v13 = vpop.f32.mrf.mxu0 }
 0x176   : > { %1216 = vst [vmem:[%s195_s22] sm:$0xf] %v1215_v12 }
 0x177 PF: > { %s13_s16 = sadd.s32 1, %s1959_s16   ;;  %s2368_s12 = smov %s1951_s14 }
 0x178   : > { %p10_p8 = scmp.ge.s32.totalorder %s13_s16, 10   ;;  %s2369_s13 = smov %s1955_s15 }
 0x179   : > { %s2370_s14 = smov %s2373_s17  ;;  %s2371_s15 = smov %s2377_s18 }
 0x17a   :  { %12 = sbr.rel (!%p10_p8) target bundleno = 3 (0x3), region = 76 }

// kernel: msd_init_layer.7
= control target key start
LH: loop header
LB: loop body
LE: loop exit
PB: predicated region body
PF: predicated region fallthrough
CT: control target
= control target key end

     0   :  { %s1995_s12 = smov 0   ;;  %s1997_s13 = smov 0   ;;  %s2376_s0 = inlined_call_operand.vmem [shape: bf16[8,3,3,128], index: 0, kind: input, shape index: {}]   ;;  %s2377_s1 = inlined_call_operand.vmem [shape: bf16[9,128,128], index: 1, kind: input, shape index: {}]   ;;  %s2378_s2 = inlined_call_operand.vmem [shape: f32[1,128], index: 2, kind: input, shape index: {}]   ;;  %s2379_s3 = inlined_call_operand.vmem [shape: f32[2,2,2,128], index: 3, kind: output, shape index: {}]  }
   0x1   :  { %s1999_s14 = smov 0   ;;  %s2001_s15 = smov 0  }
   0x2   :  { %s2003_s16 = smov 0  }
   0x3 LB: > { %s22_s17 = sadd.s32 1, %s1963_s14  ;;  %s25_s18 = sadd.s32 1, %s1967_s15  ;;  %s1971_s16 = sphi %s2003_s16, %s13_s16   ;;  %s1967_s15 = sphi %s2001_s15, %s2383_s15   ;;  %s1963_s14 = sphi %s1999_s14, %s2382_s14   ;;  %s1959_s13 = sphi %s1997_s13, %s2381_s13   ;;  %s1955_s12 = sphi %s1995_s12, %s2380_s12  }
   0x4   : > { %p23_p0 = scmp.ge.s32.totalorder %s22_s17, 2  ;;  %p1333_p1 = scmp.ge.s32.totalorder %s1971_s16, 1 }
   0x5   : > { %p153_p2 = scmp.lt.s32.totalorder %s1971_s16, 5 }
   0x6   : > { %s2385_s17 = smov (%p23_p0, %s22_s17), 0  ;;  %s2387_s18 = smov (!%p23_p0, %s25_s18), %s1967_s15 }
   0x7   : > { %p154_p3 = pnand %p1333_p1, %p153_p2  ;;  %p27_p4 = scmp.ge.s32.totalorder %s2387_s18, 2 }
   0x8   : > { %s1334_s4 = sshll.u32 (!%p154_p3), %s1959_s13, 2  ;;  %s1338_s30 = sshll.u32 (!%p154_p3), %s1955_s12, 1 }
   0x9   : > { %s2389_s18 = smov (%p27_p4, %s2387_s18), 0  ;;  %157 = sbr.rel (%p154_p3) target bundleno = 375 (0x177), region = 32 }
   0xa   : > { %p182_p5 = scmp.lt.s32.totalorder (!%p154_p3), %s1334_s4, 7  ;;  %p188_p6 = scmp.lt.s32.totalorder (!%p154_p3), %s1959_s13, 1 }
   0xb   : > { %p190_p7 = scmp.lt.s32.totalorder (!%p154_p3), %s1955_s12, 1 }
   0xe   : > { %v1861_v0 = vld [vmem:[%s2377_s1 + $0x78] sm:$0xff]   ;;  %v1973_v1 = vmov 0.0   ;;  %v1863_v3 = vld [vmem:[%s2377_s1 + $0x70] sm:$0xff]   ;;  %vm1974_vm0 = vmmov 0   ;;  %v1865_v5 = vld [vmem:[%s2377_s1 + $0x68] sm:$0xff]   ;;  %s2391_s4 = smov (!%p182_p5, %s1334_s4), 7 }
   0xf   : > { %1638 = vmatprep.subr.bf16.mxu0 %v1973_v1  ;;  %1658 = vmatprep.subr.bf16.mxu1 %v1973_v1  ;;  %v1862_v2 = vld [vmem:[%s2377_s1 + $0x38] sm:$0xff]   ;;  %v1864_v4 = vld [vmem:[%s2377_s1 + $0x30] sm:$0xff]   ;;  %v1866_v6 = vld [vmem:[%s2377_s1 + $0x28] sm:$0xff]   ;;  %s1818_s22 = smul.u32 6, %s2391_s4  ;;  %s2393_s13 = smov (!%p188_p6, %s1959_s13), 1 }
  0x10   : > { %1639 = vmatpush3.bf16.msra.mxu0 %v1861_v0  ;;  %1654 = vmatprep.mubr.msk.bf16.mxu0 %vm1974_vm0, %v1973_v1  ;;  %v1867_v7 = vld [vmem:[%s2377_s1 + $0x60] sm:$0xff]   ;;  %v1869_v9 = vld [vmem:[%s2377_s1 + $0x58] sm:$0xff]   ;;  %v1871_v11 = vld [vmem:[%s2377_s1 + $0x50] sm:$0xff]   ;;  %s2395_s12 = smov (!%p190_p7, %s1955_s12), 1 }
  0x11   : > { %1659 = vmatpush3.bf16.msra.mxu1 %v1862_v2  ;;  %1640 = vmatprep.subr.bf16.mxu0 %v1973_v1  ;;  %v1868_v8 = vld [vmem:[%s2377_s1 + $0x20] sm:$0xff]   ;;  %v1870_v10 = vld [vmem:[%s2377_s1 + $0x18] sm:$0xff]   ;;  %v1872_v12 = vld [vmem:[%s2377_s1 + $0x10] sm:$0xff]   ;;  %s186_s29 = scalar_lea.vmem %s2376_s0, %s1818_s22 }
  0x12   : > { %1660 = vmatprep.subr.bf16.mxu1 %v1973_v1  ;;  %1674 = vmatprep.mubr.msk.bf16.mxu1 %vm1974_vm0, %v1973_v1  ;;  %v1873_v13 = vld [vmem:[%s2377_s1 + $0x48] sm:$0xff]   ;;  %s2094_s6 = scalar_lea.vmem %s186_s29, %s1338_s30  ;;  %v1875_v15 = vld [vmem:[%s2377_s1 + $0x40] sm:$0xff]   ;;  %v1877_v19 = vld [vmem:[%s2377_s1 + $0xb8] sm:$0xff]  }
  0x13   : > { %v1874_v14 = vld [vmem:[%s2377_s1 + $0x8] sm:$0xff]   ;;  %v1876_v16 = vld [vmem:[%s2377_s1] sm:$0xff]   ;;  %v1878_v20 = vld [vmem:[%s2377_s1 + $0xf8] sm:$0xff]  }
  0x14   : > { %1641 = vmatpush3.bf16.msra.mxu0 %v1863_v3  ;;  %v1340_v17 = vld [vmem:[%s2094_s6 + $0x6] sm:$0x1]  ;;  %v199_v18 = vld [vmem:[%s2094_s6] sm:$0x1]  ;;  %v1879_v21 = vld [vmem:[%s2377_s1 + $0xb0] sm:$0xff]  }
  0x15   : > { %1661 = vmatpush3.bf16.msra.mxu1 %v1864_v4  ;;  %1642 = vmatprep.subr.bf16.mxu0 %v1973_v1  ;;  %v1880_v22 = vld [vmem:[%s2377_s1 + $0xf0] sm:$0xff]   ;;  %v1881_v23 = vld [vmem:[%s2377_s1 + $0xa8] sm:$0xff]   ;;  %v1883_v25 = vld [vmem:[%s2377_s1 + $0xa0] sm:$0xff]  }
  0x16   : > { %1662 = vmatprep.subr.bf16.mxu1 %v1973_v1  ;;  %v1882_v24 = vld [vmem:[%s2377_s1 + $0xe8] sm:$0xff]   ;;  %v1884_v26 = vld [vmem:[%s2377_s1 + $0xe0] sm:$0xff]   ;;  %v1885_v27 = vld [vmem:[%s2377_s1 + $0x98] sm:$0xff]  }
  0x17   : > { %v1886_v28 = vld [vmem:[%s2377_s1 + $0xd8] sm:$0xff]   ;;  %v1389_v29 = vld.sshfl [vmem:[%s2094_s6] sm:$0x3 pattern:$0x76325410]  ;;  %v1887_v30 = vld [vmem:[%s2377_s1 + $0x90] sm:$0xff]  }
  0x18   : > { %1643 = vmatpush3.bf16.msra.mxu0 %v1865_v5  ;;  %v1888_v31 = vld [vmem:[%s2377_s1 + $0xd0] sm:$0xff]   ;;  %v442_v32 = vshll.u32 %v1389_v29, 16  ;;  %v1889_v33 = vld [vmem:[%s2377_s1 + $0x88] sm:$0xff]   ;;  %v440_v35 = vshrl.u32 %v1389_v29, 16  ;;  %v1891_v37 = vld [vmem:[%s2377_s1 + $0x80] sm:$0xff]  }
  0x19   : > { %1663 = vmatpush3.bf16.msra.mxu1 %v1866_v6  ;;  %1644 = vmatprep.subr.bf16.mxu0 %v1973_v1  ;;  %v1890_v34 = vld [vmem:[%s2377_s1 + $0xc8] sm:$0xff]   ;;  %v1892_v38 = vld [vmem:[%s2377_s1 + $0xc0] sm:$0xff]   ;;  %v1893_v40 = vld [vmem:[%s2377_s1 + $0x138] sm:$0xff]  }
  0x1a   : > { %1664 = vmatprep.subr.bf16.mxu1 %v1973_v1  ;;  %v444_v36 = vrot.slane %v442_v32, 1  ;;  %v1399_v41 = vld [vmem:[%s2094_s6 + $0xc] sm:$0x1]  ;;  %v1894_v42 = vld [vmem:[%s2377_s1 + $0x178] sm:$0xff]   ;;  %v1895_v43 = vld [vmem:[%s2377_s1 + $0x130] sm:$0xff]  }
  0x1b   : > { %v1896_v44 = vld [vmem:[%s2377_s1 + $0x170] sm:$0xff]   ;;  %v1897_v45 = vld [vmem:[%s2377_s1 + $0x128] sm:$0xff]   ;;  %v1899_v47 = vld [vmem:[%s2377_s1 + $0x120] sm:$0xff]  }
  0x1c   : > { %1645 = vmatpush3.bf16.msra.mxu0 %v1867_v7  ;;  %v445_v39 = vor.u32 %v444_v36, %v440_v35  ;;  %v1898_v46 = vld [vmem:[%s2377_s1 + $0x168] sm:$0xff]   ;;  %v1900_v48 = vld [vmem:[%s2377_s1 + $0x160] sm:$0xff]   ;;  %v1901_v49 = vld [vmem:[%s2377_s1 + $0x118] sm:$0xff]  }
  0x1d   : > { %1665 = vmatpush3.bf16.msra.mxu1 %v1868_v8  ;;  %1646 = vmatprep.subr.bf16.mxu0 %v1973_v1  ;;  %v1902_v50 = vld [vmem:[%s2377_s1 + $0x158] sm:$0xff]   ;;  %v1903_v51 = vld [vmem:[%s2377_s1 + $0x110] sm:$0xff]   ;;  %v1467_v53 = vld.sshfl [vmem:[%s2094_s6 + $0xc] sm:$0x3 pattern:$0x76325410] }
  0x1e   : > { %1666 = vmatprep.subr.bf16.mxu1 %v1973_v1  ;;  %v1904_v52 = vld [vmem:[%s2377_s1 + $0x150] sm:$0xff]   ;;  %v1905_v54 = vld [vmem:[%s2377_s1 + $0x108] sm:$0xff]   ;;  %v785_v55 = vshll.u32 %v1467_v53, 16  ;;  %v1907_v57 = vld [vmem:[%s2377_s1 + $0x100] sm:$0xff]   ;;  %v783_v58 = vshrl.u32 %v1467_v53, 16 }
  0x1f   : > { %v1906_v56 = vld [vmem:[%s2377_s1 + $0x148] sm:$0xff]   ;;  %v1908_v60 = vld [vmem:[%s2377_s1 + $0x140] sm:$0xff]   ;;  %v1425_v61 = vld [vmem:[%s2094_s6 + $0x12] sm:$0x1] }
  0x20   : > { %1647 = vmatpush3.bf16.msra.mxu0 %v1869_v9  ;;  %v787_v59 = vrot.slane %v785_v55, 1  ;;  %v1909_v62 = vld [vmem:[%s2377_s1 + $0x1b8] sm:$0xff]   ;;  %v1911_v2 = vld [vmem:[%s2377_s1 + $0x1b0] sm:$0xff]   ;;  %v1913_v4 = vld [vmem:[%s2377_s1 + $0x1a8] sm:$0xff]  }
  0x21   : > { %1667 = vmatpush3.bf16.msra.mxu1 %v1870_v10  ;;  %1648 = vmatprep.subr.bf16.mxu0 %v1973_v1  ;;  %v1910_v0 = vld [vmem:[%s2377_s1 + $0x1f8] sm:$0xff]   ;;  %v1912_v3 = vld [vmem:[%s2377_s1 + $0x1f0] sm:$0xff]   ;;  %v1914_v5 = vld [vmem:[%s2377_s1 + $0x1e8] sm:$0xff]  }
  0x22   : > { %1668 = vmatprep.subr.bf16.mxu1 %v1973_v1  ;;  %v788_v63 = vor.u32 %v787_v59, %v783_v58  ;;  %v1915_v6 = vld [vmem:[%s2377_s1 + $0x1a0] sm:$0xff]   ;;  %v1917_v8 = vld [vmem:[%s2377_s1 + $0x198] sm:$0xff]   ;;  %v1919_v10 = vld [vmem:[%s2377_s1 + $0x190] sm:$0xff]  }
  0x23   : > { %v1916_v7 = vld [vmem:[%s2377_s1 + $0x1e0] sm:$0xff]   ;;  %v1918_v9 = vld [vmem:[%s2377_s1 + $0x1d8] sm:$0xff]  }
  0x24   : > { %1649 = vmatpush3.bf16.msra.mxu0 %v1871_v11  ;;  %v1920_v11 = vld [vmem:[%s2377_s1 + $0x1d0] sm:$0xff]   ;;  %v1932_v29 = vld [vmem:[%s2377_s1 + $0x200] sm:$0xff]  }
  0x25   : > { %1669 = vmatpush3.bf16.msra.mxu1 %v1872_v12  ;;  %1650 = vmatprep.subr.bf16.mxu0 %v1973_v1  ;;  %v1921_v12 = vld [vmem:[%s2377_s1 + $0x188] sm:$0xff]  }
  0x26   : > { %1670 = vmatprep.subr.bf16.mxu1 %v1973_v1 }
  0x28   : > { %1651 = vmatpush3.bf16.msra.mxu0 %v1873_v13  ;;  %v1922_v13 = vld [vmem:[%s2377_s1 + $0x1c8] sm:$0xff]  }
  0x29   : > { %1671 = vmatpush3.bf16.msra.mxu1 %v1874_v14  ;;  %1652 = vmatprep.subr.bf16.mxu0 %v1973_v1  ;;  %v1923_v14 = vld [vmem:[%s2377_s1 + $0x180] sm:$0xff]  }
  0x2a   : > { %1672 = vmatprep.subr.bf16.mxu1 %v1973_v1 }
  0x2c   : > { %1653 = vmatpush3.bf16.msra.mxu0 %v1875_v15  ;;  %v1924_v15 = vld [vmem:[%s2377_s1 + $0x1c0] sm:$0xff]  }
  0x2d   : > { %1673 = vmatpush3.bf16.msra.mxu1 %v1876_v16  ;;  %1678 = vmatprep.subr.bf16.mxu0 %v1973_v1  ;;  %v1477_v16 = vld [vmem:[%s2094_s6 + $0x2] sm:$0x1] }
  0x2e   : > { %1698 = vmatprep.subr.bf16.mxu1 %v1973_v1 }
  0x2f   : > { %1655 = vmatmul.mubr.bf16.vlgmr.msra.gmra.mxu0 %v1340_v17  ;;  %v1925_v17 = vld [vmem:[%s2377_s1 + $0x238] sm:$0xff]  }
  0x30   : > { %1675 = vmatmul.mubr.bf16.vlgmr.msra.gmra.mxu1 %v199_v18  ;;  %1679 = vmatpush3.bf16.msra.mxu0 %v1877_v19  ;;  %v1503_v18 = vld [vmem:[%s2094_s6 + $0x8] sm:$0x1]  ;;  %v1926_v19 = vld [vmem:[%s2377_s1 + $0x230] sm:$0xff]  }
  0x31   : > { %1699 = vmatpush3.bf16.msra.mxu1 %v1878_v20  ;;  %1680 = vmatprep.subr.bf16.mxu0 %v1973_v1  ;;  %v1927_v20 = vld [vmem:[%s2377_s1 + $0x228] sm:$0xff]  }
  0x32   : > { %1700 = vmatprep.subr.bf16.mxu1 %v1973_v1  ;;  %1694 = vmatprep.mubr.msk.bf16.mxu0 %vm1974_vm0, %v1973_v1 }
  0x33   : > { %1714 = vmatprep.mubr.msk.bf16.mxu1 %vm1974_vm0, %v1973_v1 }
  0x34   : > { %1681 = vmatpush3.bf16.msra.mxu0 %v1879_v21  ;;  %v1928_v21 = vld [vmem:[%s2377_s1 + $0x220] sm:$0xff]  }
  0x35   : > { %1701 = vmatpush3.bf16.msra.mxu1 %v1880_v22  ;;  %1682 = vmatprep.subr.bf16.mxu0 %v1973_v1  ;;  %v1929_v22 = vld [vmem:[%s2377_s1 + $0x218] sm:$0xff]  }
  0x36   : > { %1702 = vmatprep.subr.bf16.mxu1 %v1973_v1 }
  0x38   : > { %1683 = vmatpush3.bf16.msra.mxu0 %v1881_v23  ;;  %v1930_v23 = vld [vmem:[%s2377_s1 + $0x210] sm:$0xff]  }
  0x39   : > { %1703 = vmatpush3.bf16.msra.mxu1 %v1882_v24  ;;  %1684 = vmatprep.subr.bf16.mxu0 %v1973_v1  ;;  %v1545_v24 = vld.sshfl [vmem:[%s2094_s6 + $0x2] sm:$0x3 pattern:$0x76325410]  ;;  %s1336_s6 = sshll.u32 %s2393_s13, 1 }
  0x3a   : > { %1704 = vmatprep.subr.bf16.mxu1 %v1973_v1  ;;  %s193_s9 = sadd.s32 %s1336_s6, %s2395_s12 }
  0x3b   : > { %s1337_s19 = sshll.u32 %s193_s9, 1 }
  0x3c   : > { %1685 = vmatpush3.bf16.msra.mxu0 %v1883_v25  ;;  %v1128_v25 = vshll.u32 %v1545_v24, 16  ;;  %s195_s22 = scalar_lea.vmem %s2379_s3, %s1337_s19 }
  0x3d   : > { %1705 = vmatpush3.bf16.msra.mxu1 %v1884_v26  ;;  %1686 = vmatprep.subr.bf16.mxu0 %v1973_v1  ;;  %v1931_v26 = vld [vmem:[%s2377_s1 + $0x208] sm:$0xff]  }
  0x3e   : > { %1706 = vmatprep.subr.bf16.mxu1 %v1973_v1 }
  0x40   : > { %1687 = vmatpush3.bf16.msra.mxu0 %v1885_v27  ;;  %v1126_v27 = vshrl.u32 %v1545_v24, 16 }
  0x41   : > { %1707 = vmatpush3.bf16.msra.mxu1 %v1886_v28  ;;  %1688 = vmatprep.subr.bf16.mxu0 %v1973_v1  ;;  %v1130_v28 = vrot.slane %v1128_v25, 1 }
  0x42   : > { %1708 = vmatprep.subr.bf16.mxu1 %v1973_v1 }
  0x44   : > { %1689 = vmatpush3.bf16.msra.mxu0 %v1887_v30  ;;  %v1131_v30 = vor.u32 %v1130_v28, %v1126_v27 }
  0x45   : > { %1709 = vmatpush3.bf16.msra.mxu1 %v1888_v31  ;;  %1690 = vmatprep.subr.bf16.mxu0 %v1973_v1 }
  0x46   : > { %1710 = vmatprep.subr.bf16.mxu1 %v1973_v1 }
  0x48   : > { %1691 = vmatpush3.bf16.msra.mxu0 %v1889_v33 }
  0x49   : > { %1711 = vmatpush3.bf16.msra.mxu1 %v1890_v34  ;;  %1692 = vmatprep.subr.bf16.mxu0 %v1973_v1 }
  0x4a   : > { %1712 = vmatprep.subr.bf16.mxu1 %v1973_v1 }
  0x4c   : > { %1693 = vmatpush3.bf16.msra.mxu0 %v1891_v37 }
  0x4d   : > { %1713 = vmatpush3.bf16.msra.mxu1 %v1892_v38  ;;  %1718 = vmatprep.subr.bf16.mxu0 %v1973_v1 }
  0x4e   : > { %1738 = vmatprep.subr.bf16.mxu1 %v1973_v1 }
  0x4f   : > { %1695 = vmatmul.mubr.bf16.vlgmr.msra.gmra.mxu0 %v445_v39 }
  0x50   : > { %1719 = vmatpush3.bf16.msra.mxu0 %v1893_v40  ;;  %1715 = vmatmul.mubr.bf16.vlgmr.msra.gmra.mxu1 %v1399_v41 }
  0x51   : > { %1739 = vmatpush3.bf16.msra.mxu1 %v1894_v42  ;;  %1720 = vmatprep.subr.bf16.mxu0 %v1973_v1 }
  0x52   : > { %1740 = vmatprep.subr.bf16.mxu1 %v1973_v1  ;;  %1734 = vmatprep.mubr.msk.bf16.mxu0 %vm1974_vm0, %v1973_v1 }
  0x53   : > { %1754 = vmatprep.mubr.msk.bf16.mxu1 %vm1974_vm0, %v1973_v1 }
  0x54   : > { %1721 = vmatpush3.bf16.msra.mxu0 %v1895_v43 }
  0x55   : > { %1741 = vmatpush3.bf16.msra.mxu1 %v1896_v44  ;;  %1722 = vmatprep.subr.bf16.mxu0 %v1973_v1 }
  0x56   : > { %1742 = vmatprep.subr.bf16.mxu1 %v1973_v1 }
  0x58   : > { %1723 = vmatpush3.bf16.msra.mxu0 %v1897_v45 }
  0x59   : > { %1743 = vmatpush3.bf16.msra.mxu1 %v1898_v46  ;;  %1724 = vmatprep.subr.bf16.mxu0 %v1973_v1 }
  0x5a   : > { %1744 = vmatprep.subr.bf16.mxu1 %v1973_v1 }
  0x5c   : > { %1725 = vmatpush3.bf16.msra.mxu0 %v1899_v47 }
  0x5d   : > { %1745 = vmatpush3.bf16.msra.mxu1 %v1900_v48  ;;  %1726 = vmatprep.subr.bf16.mxu0 %v1973_v1 }
  0x5e   : > { %1746 = vmatprep.subr.bf16.mxu1 %v1973_v1 }
  0x60   : > { %1727 = vmatpush3.bf16.msra.mxu0 %v1901_v49 }
  0x61   : > { %1747 = vmatpush3.bf16.msra.mxu1 %v1902_v50  ;;  %1728 = vmatprep.subr.bf16.mxu0 %v1973_v1 }
  0x62   : > { %1748 = vmatprep.subr.bf16.mxu1 %v1973_v1 }
  0x64   : > { %1729 = vmatpush3.bf16.msra.mxu0 %v1903_v51 }
  0x65   : > { %1749 = vmatpush3.bf16.msra.mxu1 %v1904_v52  ;;  %1730 = vmatprep.subr.bf16.mxu0 %v1973_v1 }
  0x66   : > { %1750 = vmatprep.subr.bf16.mxu1 %v1973_v1 }
  0x68   : > { %1731 = vmatpush3.bf16.msra.mxu0 %v1905_v54 }
  0x69   : > { %1751 = vmatpush3.bf16.msra.mxu1 %v1906_v56  ;;  %1732 = vmatprep.subr.bf16.mxu0 %v1973_v1 }
  0x6a   : > { %1752 = vmatprep.subr.bf16.mxu1 %v1973_v1 }
  0x6c   : > { %1733 = vmatpush3.bf16.msra.mxu0 %v1907_v57 }
  0x6d   : > { %1753 = vmatpush3.bf16.msra.mxu1 %v1908_v60  ;;  %1758 = vmatprep.subr.bf16.mxu0 %v1973_v1 }
  0x6e   : > { %1778 = vmatprep.subr.bf16.mxu1 %v1973_v1 }
  0x6f   : > { %1735 = vmatmul.mubr.bf16.vlgmr.msra.gmra.mxu0 %v1425_v61 }
  0x70   : > { %1759 = vmatpush3.bf16.msra.mxu0 %v1909_v62  ;;  %1755 = vmatmul.mubr.bf16.vlgmr.msra.gmra.mxu1 %v788_v63 }
  0x71   : > { %1779 = vmatpush3.bf16.msra.mxu1 %v1910_v0  ;;  %1760 = vmatprep.subr.bf16.mxu0 %v1973_v1 }
  0x72   : > { %1780 = vmatprep.subr.bf16.mxu1 %v1973_v1  ;;  %1774 = vmatprep.mubr.msk.bf16.mxu0 %vm1974_vm0, %v1973_v1 }
  0x73   : > { %1794 = vmatprep.mubr.msk.bf16.mxu1 %vm1974_vm0, %v1973_v1 }
  0x74   : > { %1761 = vmatpush3.bf16.msra.mxu0 %v1911_v2 }
  0x75   : > { %1781 = vmatpush3.bf16.msra.mxu1 %v1912_v3  ;;  %1762 = vmatprep.subr.bf16.mxu0 %v1973_v1 }
  0x76   : > { %1782 = vmatprep.subr.bf16.mxu1 %v1973_v1 }
  0x78   : > { %1763 = vmatpush3.bf16.msra.mxu0 %v1913_v4 }
  0x79   : > { %1783 = vmatpush3.bf16.msra.mxu1 %v1914_v5  ;;  %1764 = vmatprep.subr.bf16.mxu0 %v1973_v1 }
  0x7a   : > { %1784 = vmatprep.subr.bf16.mxu1 %v1973_v1 }
  0x7c   : > { %1765 = vmatpush3.bf16.msra.mxu0 %v1915_v6 }
  0x7d   : > { %1785 = vmatpush3.bf16.msra.mxu1 %v1916_v7  ;;  %1766 = vmatprep.subr.bf16.mxu0 %v1973_v1  ;;  %v1554_v7 = vld [vmem:[%s2378_s2] ss:$0 sm:$0xff] }
  0x7e   : > { %1786 = vmatprep.subr.bf16.mxu1 %v1973_v1 }
  0x80   : > { %1767 = vmatpush3.bf16.msra.mxu0 %v1917_v8 }
  0x81   : > { %1787 = vmatpush3.bf16.msra.mxu1 %v1918_v9  ;;  %1768 = vmatprep.subr.bf16.mxu0 %v1973_v1 }
  0x82   : > { %1788 = vmatprep.subr.bf16.mxu1 %v1973_v1 }
  0x84   : > { %1769 = vmatpush3.bf16.msra.mxu0 %v1919_v10 }
  0x85   : > { %1789 = vmatpush3.bf16.msra.mxu1 %v1920_v11  ;;  %1770 = vmatprep.subr.bf16.mxu0 %v1973_v1 }
  0x86   : > { %1790 = vmatprep.subr.bf16.mxu1 %v1973_v1 }
  0x88   : > { %1771 = vmatpush3.bf16.msra.mxu0 %v1921_v12 }
  0x89   : > { %1791 = vmatpush3.bf16.msra.mxu1 %v1922_v13  ;;  %1772 = vmatprep.subr.bf16.mxu0 %v1973_v1 }
  0x8a   : > { %1792 = vmatprep.subr.bf16.mxu1 %v1973_v1 }
  0x8c   : > { %1773 = vmatpush3.bf16.msra.mxu0 %v1923_v14 }
  0x8d   : > { %1793 = vmatpush3.bf16.msra.mxu1 %v1924_v15  ;;  %1798 = vmatprep.subr.bf16.mxu0 %v1973_v1 }
  0x8f   : > { %1775 = vmatmul.mubr.bf16.vlgmr.msra.gmra.mxu0 %v1477_v16 }
  0x90   : > { %1799 = vmatpush3.bf16.msra.mxu0 %v1925_v17  ;;  %1795 = vmatmul.mubr.bf16.vlgmr.msra.gmra.mxu1 %v1503_v18 }
  0x91   : > { %1800 = vmatprep.subr.bf16.mxu0 %v1973_v1  ;;  %1814 = vmatprep.mubr.msk.bf16.mxu0 %vm1974_vm0, %v1973_v1 }
  0x94   : > { %1801 = vmatpush3.bf16.msra.mxu0 %v1926_v19 }
  0x95   : > { %1802 = vmatprep.subr.bf16.mxu0 %v1973_v1 }
  0x98   : > { %1803 = vmatpush3.bf16.msra.mxu0 %v1927_v20 }
  0x99   : > { %1804 = vmatprep.subr.bf16.mxu0 %v1973_v1 }
  0x9c   : > { %1805 = vmatpush3.bf16.msra.mxu0 %v1928_v21 }
  0x9d   : > { %1806 = vmatprep.subr.bf16.mxu0 %v1973_v1 }
  0xa0   : > { %1807 = vmatpush3.bf16.msra.mxu0 %v1929_v22 }
  0xa1   : > { %1808 = vmatprep.subr.bf16.mxu0 %v1973_v1 }
  0xa4   : > { %1809 = vmatpush3.bf16.msra.mxu0 %v1930_v23 }
  0xa5   : > { %1810 = vmatprep.subr.bf16.mxu0 %v1973_v1 }
  0xa8   : > { %1811 = vmatpush3.bf16.msra.mxu0 %v1931_v26 }
  0xa9   : > { %1812 = vmatprep.subr.bf16.mxu0 %v1973_v1 }
  0xac   : > { %1813 = vmatpush3.bf16.msra.mxu0 %v1932_v29 }
  0xaf   : > { %1815 = vmatmul.mubr.bf16.vlgmr.msra.gmra.mxu0 %v1131_v30 }
  0xef   : > { %v319_v31 = vpop.f32.mrf.mxu0 }
  0xf0   : > { %v407_v32 = vpop.f32.mrf.mxu1 }
  0xf1   : > { %v408_v33 = vadd.f32 %v407_v32, %v319_v31  ;;  %v1656_v34 = vpop.f32.mrf.mxu0 }
  0xf2   : > { %v1676_v35 = vpop.f32.mrf.mxu1 }
  0xf3   : > { %v322_v36 = vpop.f32.mrf.mxu0 }
  0xf4   : > { %v410_v37 = vpop.f32.mrf.mxu1 }
  0xf5   : > { %v1657_v38 = vpop.f32.mrf.mxu0 }
  0xf6   : > { %v1677_v39 = vpop.f32.mrf.mxu1 }
 0x10f   : > { %v529_v40 = vpop.f32.mrf.mxu0 }
 0x110   : > { %v535_v41 = vadd.f32 %v529_v40, %v408_v33  ;;  %v639_v42 = vpop.f32.mrf.mxu1 }
 0x111   : > { %v1696_v43 = vpop.f32.mrf.mxu0 }
 0x112   : > { %v645_v44 = vadd.f32 %v639_v42, %v535_v41  ;;  %v1716_v45 = vpop.f32.mrf.mxu1 }
 0x113   : > { %v532_v46 = vpop.f32.mrf.mxu0 }
 0x114   : > { %v642_v1 = vpop.f32.mrf.mxu1 }
 0x115   : > { %v1697_v47 = vpop.f32.mrf.mxu0 }
 0x116   : > { %v1717_v48 = vpop.f32.mrf.mxu1 }
 0x12f   : > { %v749_v49 = vpop.f32.mrf.mxu0 }
 0x130   : > { %v872_v50 = vpop.f32.mrf.mxu1  ;;  %v755_v2 = vadd.f32 %v749_v49, %v645_v44 }
 0x131   : > { %v1736_v51 = vpop.f32.mrf.mxu0 }
 0x132   : > { %v1756_v52 = vpop.f32.mrf.mxu1  ;;  %v878_v3 = vadd.f32 %v872_v50, %v755_v2 }
 0x133   : > { %v752_v53 = vpop.f32.mrf.mxu0 }
 0x134   : > { %v875_v54 = vpop.f32.mrf.mxu1 }
 0x135   : > { %v1737_v55 = vpop.f32.mrf.mxu0 }
 0x136   : > { %v1757_v56 = vpop.f32.mrf.mxu1 }
 0x14f   : > { %v982_v57 = vpop.f32.mrf.mxu0 }
 0x150   : > { %v1092_v58 = vpop.f32.mrf.mxu1  ;;  %v988_v4 = vadd.f32 %v982_v57, %v878_v3 }
 0x151   : > { %v1776_v59 = vpop.f32.mrf.mxu0 }
 0x152   : > { %v1796_v60 = vpop.f32.mrf.mxu1  ;;  %v1098_v5 = vadd.f32 %v1092_v58, %v988_v4 }
 0x153   : > { %v985_v61 = vpop.f32.mrf.mxu0 }
 0x154   : > { %v1095_v62 = vpop.f32.mrf.mxu1 }
 0x155   : > { %v1777_v63 = vpop.f32.mrf.mxu0 }
 0x156   : > { %v1797_v0 = vpop.f32.mrf.mxu1 }
 0x16f   : > { %v1215_v6 = vpop.f32.mrf.mxu0 }
 0x170   : > { %v1221_v8 = vadd.f32 %v1215_v6, %v1098_v5 }
 0x171   : > { %v1816_v9 = vpop.f32.mrf.mxu0 }
 0x172   : > { %v1229_v10 = vadd.f32 %v1554_v7, %v1221_v8 }
 0x173   : > { %v1218_v11 = vpop.f32.mrf.mxu0 }
 0x174   : > { %v1230_v12 = vmax.f32 %v1229_v10, 0.0 }
 0x175   : > { %v1817_v13 = vpop.f32.mrf.mxu0 }
 0x176   : > { %1231 = vst [vmem:[%s195_s22] sm:$0x3] %v1230_v12 }
 0x177 PF: > { %s13_s16 = sadd.s32 1, %s1971_s16   ;;  %s2380_s12 = smov %s1963_s14 }
 0x178   : > { %p10_p8 = scmp.ge.s32.totalorder %s13_s16, 6   ;;  %s2381_s13 = smov %s1967_s15 }
 0x179   : > { %s2382_s14 = smov %s2385_s17  ;;  %s2383_s15 = smov %s2389_s18 }
 0x17a   :  { %12 = sbr.rel (!%p10_p8) target bundleno = 3 (0x3), region = 76 }

</bundles_post_ra>
